<compile_context>
chip_gen: v6e
topology: v6e:2x2x1
jax: 0.10.0
libtpu: 0.0.40
codegen_flags: <defaults>
</compile_context>

<pallas_src>
import jax
import jax.numpy as jnp
from jax.experimental import pallas as pl
from jax.experimental.pallas import tpu as pltpu


def basic_block_kernel(x_hbm, w1_ref, b1_ref, w2_ref, b2_ref, out_ref,
                       xs, ms, sem):
    """Grid = (batch, row_tile).  One (TILE_H, W) row band per step.

    x_hbm  : (N, H+4, Wp, Cp) bf16 in HBM (host-padded: 2 rows / 8 cols zeros)
    w*_ref : (3, 3, Cp, Cp)   bf16, BN scale folded into Cout
    b*_ref : (1, Cp)          f32 folded BN bias
    out_ref: (1, TILE_H, W, Cp) f32 output block
    xs     : (TILE_H+4, Wp, Cp) bf16 scratch -- haloed input band
    ms     : (TILE_H+2, Wp, Cp) bf16 scratch -- haloed conv1 activation band
    """
    n = pl.program_id(0)
    t = pl.program_id(1)
    nt = pl.num_programs(1)
    th4, Wp, Cp = xs.shape
    tile_h = th4 - 4
    W = out_ref.shape[2]

    # Fetch this band's haloed input rows straight from HBM (no staging copy).
    cp = pltpu.make_async_copy(x_hbm.at[n, pl.ds(t * tile_h, th4)], xs, sem)
    cp.start()

    # Zero the mid-scratch halo column slabs while the DMA is in flight.  Only
    # columns 7 and 8+W are ever read (via the +/-1 output rolls); the 8-wide
    # slabs keep the stores (8,128)-aligned.
    ms[:, 0:8, :] = jnp.zeros((tile_h + 2, 8, Cp), ms.dtype)
    ms[:, 8 + W:, :] = jnp.zeros((tile_h + 2, Wp - 8 - W, Cp), ms.dtype)

    cp.wait()

    def conv3x3(src, w_ref, nout):
        """3x3 conv over `nout` output rows of the haloed band `src`.

        src : (nout+2, Wp, Cp) bf16 value.  Returns f32 (nout, Wp, Cp) in
        padded-column coordinates (only columns [8, 8+W) are meaningful).
        """
        total = nout * Wp

        def dx_group(dx):
            acc = None
            for dy in range(3):
                lhs = src[dy:dy + nout].reshape(total, Cp)
                y = jnp.dot(lhs, w_ref[dy, dx],
                            preferred_element_type=jnp.float32)
                acc = y if acc is None else acc + y
            return acc

        out = (pltpu.roll(dx_group(0), 1, axis=0)             # reads col c-1
               + dx_group(1)
               + pltpu.roll(dx_group(2), total - 1, axis=0))  # reads col c+1
        return out.reshape(nout, Wp, Cp)

    # conv1 -> folded BN1 -> ReLU over tile_h + 2 rows (1-row halo for conv2).
    h1 = conv3x3(xs[...], w1_ref, tile_h + 2)[:, 8:8 + W, :] + b1_ref[...]
    ms[:, 8:8 + W, :] = jnp.maximum(h1, 0.0).astype(ms.dtype)

    # Rows outside the image must be exactly zero for conv2's zero padding.
    @pl.when(t == 0)
    def _():
        ms[0:1, :, :] = jnp.zeros((1, Wp, Cp), ms.dtype)

    @pl.when(t == nt - 1)
    def _():
        ms[tile_h + 1:tile_h + 2, :, :] = jnp.zeros((1, Wp, Cp), ms.dtype)

    # conv2 -> folded BN2 -> + residual -> ReLU.
    res = xs[2:2 + tile_h, 8:8 + W, :].astype(jnp.float32)
    h2 = conv3x3(ms[...], w2_ref, tile_h)[:, 8:8 + W, :] + b2_ref[...] + res
    out_ref[0] = jnp.maximum(h2, 0.0).astype(out_ref.dtype)


def fold_bn(gamma, beta, mean, var, eps=1e-5):
    scale = gamma / jnp.sqrt(var + eps)
    return scale, beta - mean * scale


def _round_up(v, m):
    return (v + m - 1) // m * m


def _pick_tile_h(H):
    # Largest convenient divisor that still yields >= 2 row tiles when it can
    # (feeds both v7x TensorCores at small batch).  TODO(synk): size per-gen
    # (e.g. ~32 on v5e/v6e, smaller on v7x's 64 MiB VMEM) for real resolutions.
    for cand in (32, 16, 8, 4, 2):
        if cand < H and H % cand == 0:
            return cand
    return H


def basic_block_forward(x_nchw, params, *, tile_h=None,
                        compute_dtype=jnp.bfloat16):
    """x_nchw: (N, C, H, W) float32.  Returns (N, C, H, W) float32."""
    w1, bn1, w2, bn2 = params["w1"], params["bn1"], params["w2"], params["bn2"]
    cout, cin, kh, kw = w1.shape
    assert (kh, kw) == (3, 3)
    assert cin == cout, "downsample=None path requires inplanes == planes"
    C = cout
    N, _, H, W = x_nchw.shape
    Cp = _round_up(C, 128)                      # lane-dense channel count
    if tile_h is None:
        tile_h = _pick_tile_h(H)
    assert H % tile_h == 0
    Wp = W + 16                                 # 8-wide zero halo on each side

    # NCHW -> NHWC; pad channels to Cp, rows by 2, cols by 8 (the conv halo
    # lives in HBM so the kernel never zeroes the input scratch); cast bf16.
    x = jnp.transpose(x_nchw, (0, 2, 3, 1)).astype(jnp.float32)
    x = jnp.pad(x, ((0, 0), (2, 2), (8, 8), (0, Cp - C))).astype(compute_dtype)

    def prep(w, bn):
        scale, bias = fold_bn(*bn)
        wt = (jnp.transpose(w, (2, 3, 1, 0)).astype(jnp.float32)
              * scale[None, None, None, :])                 # fold BN scale
        wt = jnp.pad(wt, ((0, 0), (0, 0), (0, Cp - C), (0, Cp - C)))
        b = jnp.pad(bias.astype(jnp.float32), (0, Cp - C)).reshape(1, Cp)
        return wt.astype(compute_dtype), b

    w1m, b1 = prep(w1, bn1)
    w2m, b2 = prep(w2, bn2)

    grid = (N, H // tile_h)
    out = pl.pallas_call(
        basic_block_kernel,
        out_shape=jax.ShapeDtypeStruct((N, H, W, Cp), jnp.float32),
        grid_spec=pltpu.PrefetchScalarGridSpec(
            num_scalar_prefetch=0,
            grid=grid,
            in_specs=[
                pl.BlockSpec(memory_space=pl.ANY),              # padded input
                pl.BlockSpec((3, 3, Cp, Cp), lambda n, t: (0, 0, 0, 0)),
                pl.BlockSpec((1, Cp), lambda n, t: (0, 0)),
                pl.BlockSpec((3, 3, Cp, Cp), lambda n, t: (0, 0, 0, 0)),
                pl.BlockSpec((1, Cp), lambda n, t: (0, 0)),
            ],
            out_specs=pl.BlockSpec((1, tile_h, W, Cp),
                                   lambda n, t: (n, t, 0, 0)),
            scratch_shapes=[
                pltpu.VMEM((tile_h + 4, Wp, Cp), compute_dtype),
                pltpu.VMEM((tile_h + 2, Wp, Cp), compute_dtype),
                pltpu.SemaphoreType.DMA,
            ],
        ),
        compiler_params=pltpu.CompilerParams(
            dimension_semantics=("parallel", "parallel"),
            vmem_limit_bytes=64 * 1024 * 1024),
    )(x, w1m, b1, w2m, b2)

    out = out[..., :C]                          # drop lane-padding channels
    return jnp.transpose(out, (0, 3, 1, 2))


# ------------------------- pure-JAX reference -------------------------
def basic_block_ref(x_nchw, params):
    x = jnp.transpose(x_nchw, (0, 2, 3, 1)).astype(jnp.float32)     # NHWC
    dn = ("NHWC", "HWIO", "NHWC")

    def conv(v, w):  # w: (Cout, Cin, 3, 3) -> HWIO
        w_hwio = jnp.transpose(w, (2, 3, 1, 0)).astype(jnp.float32)
        return jax.lax.conv_general_dilated(
            v, w_hwio, window_strides=(1, 1), padding=((1, 1), (1, 1)),
            dimension_numbers=dn)

    s1, b1 = fold_bn(*params["bn1"])
    s2, b2 = fold_bn(*params["bn2"])
    out = jnp.maximum(conv(x, params["w1"]) * s1 + b1, 0.0)
    out = conv(out, params["w2"]) * s2 + b2
    out = jnp.maximum(out + x, 0.0)
    return jnp.transpose(out, (0, 3, 1, 2))


def _make_params(key, C, wscale=0.03):
    ks = jax.random.split(key, 10)

    def bn(k0, k1, k2, k3):
        return (1.0 + 0.1 * jax.random.normal(k0, (C,), jnp.float32),   # gamma
                0.1 * jax.random.normal(k1, (C,), jnp.float32),         # beta
                0.1 * jax.random.normal(k2, (C,), jnp.float32),         # mean
                1.0 + 0.1 * jax.random.uniform(k3, (C,), jnp.float32))  # var

    return {
        "w1": wscale * jax.random.normal(ks[0], (C, C, 3, 3), jnp.float32),
        "w2": wscale * jax.random.normal(ks[1], (C, C, 3, 3), jnp.float32),
        "bn1": bn(ks[2], ks[3], ks[4], ks[5]),
        "bn2": bn(ks[6], ks[7], ks[8], ks[9]),
    }


if __name__ == "__main__":
    key = jax.random.PRNGKey(0)
    # First config matches the DLA first-level width (lane-dense, no channel
    # padding); the second exercises the pad-to-128 path.
    for (N, C, H, W) in [(2, 128, 16, 16), (2, 8, 16, 16)]:
        key, kx, kp = jax.random.split(key, 3)
        x = jax.random.normal(kx, (N, C, H, W), jnp.float32)
        params = _make_params(kp, C)

        out = jax.block_until_ready(basic_block_forward(x, params))
        ref = jax.block_until_ready(basic_block_ref(x, params))
        assert out.shape == (N, C, H, W)
        err = float(jnp.max(jnp.abs(out - ref)))
        # bf16 storage / f32 accumulation vs the pure-f32 reference.
        assert err < 8e-2, f"shape {(N, C, H, W)}: max abs err {err}"
    print("KERNEL_OK")
</pallas_src>

<mosaic_0001>
module attributes {stable_mosaic.version = 11 : i64} {
  func.func @basic_block_kernel(%arg0: i32, %arg1: i32, %arg2: memref<2x20x32x128xbf16, #tpu.memory_space<any>>, %arg3: memref<3x3x128x128xbf16, #tpu.memory_space<vmem>>, %arg4: memref<1x128xf32, #tpu.memory_space<vmem>>, %arg5: memref<3x3x128x128xbf16, #tpu.memory_space<vmem>>, %arg6: memref<1x128xf32, #tpu.memory_space<vmem>>, %arg7: memref<1x8x16x128xf32, #tpu.memory_space<vmem>>, %arg8: memref<12x32x128xbf16, #tpu.memory_space<vmem>>, %arg9: memref<10x32x128xbf16, #tpu.memory_space<vmem>>, %arg10: memref<!tpu.dma_semaphore, #tpu.memory_space<semaphore_mem>>) attributes {dimension_semantics = [#tpu.dimension_semantics<parallel>, #tpu.dimension_semantics<parallel>], iteration_bounds = array<i64: 2, 2>, scalar_prefetch = 0 : i64, scratch_operands = 3 : i64, tpu.core_type = #tpu.core_type<tc>, window_params = [{}, {pipeline_mode = #tpu.pipeline_mode<synchronous>, transform_indices = @transform_1, window_bounds = array<i64: 3, 3, 128, 128>}, {pipeline_mode = #tpu.pipeline_mode<synchronous>, transform_indices = @transform_2, window_bounds = array<i64: 1, 128>}, {pipeline_mode = #tpu.pipeline_mode<synchronous>, transform_indices = @transform_3, window_bounds = array<i64: 3, 3, 128, 128>}, {pipeline_mode = #tpu.pipeline_mode<synchronous>, transform_indices = @transform_4, window_bounds = array<i64: 1, 128>}, {transform_indices = @transform_5, window_bounds = array<i64: 1, 8, 16, 128>}]} {
    %c8_i32 = arith.constant 8 : i32
    %0 = arith.muli %arg1, %c8_i32 : i32
    %c0_i32 = arith.constant 0 : i32
    %c0_i32_0 = arith.constant 0 : i32
    %1 = tpu.memref_slice %arg2[%arg0, %0, %c0_i32, %c0_i32_0] : memref<2x20x32x128xbf16, #tpu.memory_space<any>> -> memref<1x12x32x128xbf16, #tpu.memory_space<any>>
    %2 = tpu.memref_squeeze %1 : memref<1x12x32x128xbf16, #tpu.memory_space<any>> -> memref<12x32x128xbf16, #tpu.memory_space<any>>
    tpu.enqueue_dma source(%2 : memref<12x32x128xbf16, #tpu.memory_space<any>>) target(%arg8 : memref<12x32x128xbf16, #tpu.memory_space<vmem>>) target_semaphore(%arg10 : memref<!tpu.dma_semaphore, #tpu.memory_space<semaphore_mem>>)
    %cst = arith.constant 0.000000e+00 : bf16
    %3 = vector.broadcast %cst : bf16 to vector<10x8x128xbf16>
    %c0 = arith.constant 0 : index
    %c0_1 = arith.constant 0 : index
    %c0_2 = arith.constant 0 : index
    %4 = vector.load %arg9[%c0, %c0_1, %c0_2] : memref<10x32x128xbf16, #tpu.memory_space<vmem>>, vector<10x8x128xbf16>
    tpu.vector_store %arg9[%c0, %c0_1, %c0_2], %3 {strides = array<i32>} : memref<10x32x128xbf16, #tpu.memory_space<vmem>>, vector<10x8x128xbf16>,
    %cst_3 = arith.constant 0.000000e+00 : bf16
    %5 = vector.broadcast %cst_3 : bf16 to vector<10x8x128xbf16>
    %c0_4 = arith.constant 0 : index
    %c24 = arith.constant 24 : index
    %c0_5 = arith.constant 0 : index
    %6 = vector.load %arg9[%c0_4, %c24, %c0_5] : memref<10x32x128xbf16, #tpu.memory_space<vmem>>, vector<10x8x128xbf16>
    tpu.vector_store %arg9[%c0_4, %c24, %c0_5], %5 {strides = array<i32>} : memref<10x32x128xbf16, #tpu.memory_space<vmem>>, vector<10x8x128xbf16>,
    %c0_i32_6 = arith.constant 0 : i32
    %c0_i32_7 = arith.constant 0 : i32
    %7 = tpu.memref_slice %arg2[%arg0, %0, %c0_i32_6, %c0_i32_7] : memref<2x20x32x128xbf16, #tpu.memory_space<any>> -> memref<1x12x32x128xbf16, #tpu.memory_space<any>>
    %8 = tpu.memref_squeeze %7 : memref<1x12x32x128xbf16, #tpu.memory_space<any>> -> memref<12x32x128xbf16, #tpu.memory_space<any>>
    tpu.wait_dma2 semaphore(%arg10 : memref<!tpu.dma_semaphore, #tpu.memory_space<semaphore_mem>>) src(%8 : memref<12x32x128xbf16, #tpu.memory_space<any>>) dst(%arg8 : memref<12x32x128xbf16, #tpu.memory_space<vmem>>)
    %c0_8 = arith.constant 0 : index
    %c0_9 = arith.constant 0 : index
    %c0_10 = arith.constant 0 : index
    %9 = vector.load %arg8[%c0_8, %c0_9, %c0_10] : memref<12x32x128xbf16, #tpu.memory_space<vmem>>, vector<12x32x128xbf16>
    %10 = vector.extract_strided_slice %9 {offsets = [0, 0, 0], sizes = [10, 32, 128], strides = [1, 1, 1]} : vector<12x32x128xbf16> to vector<10x32x128xbf16>
    %11 = vector.shape_cast %10 : vector<10x32x128xbf16> to vector<320x128xbf16>
    %c0_11 = arith.constant 0 : index
    %c0_12 = arith.constant 0 : index
    %c0_13 = arith.constant 0 : index
    %c0_14 = arith.constant 0 : index
    %12 = vector.load %arg3[%c0_11, %c0_12, %c0_13, %c0_14] : memref<3x3x128x128xbf16, #tpu.memory_space<vmem>>, vector<1x1x128x128xbf16>
    %13 = vector.shape_cast %12 : vector<1x1x128x128xbf16> to vector<128x128xbf16>
    %cst_15 = arith.constant dense<0.000000e+00> : vector<320x128xf32>
    %14 = tpu.matmul %11, %13, %cst_15 {dimension_numbers = #tpu.dot_dimension_numbers<[1], [0], [0], [1], [0, 0, 1, 1], [], []>} : vector<320x128xbf16>, vector<128x128xbf16>, vector<320x128xf32> -> vector<320x128xf32>
    %15 = vector.extract_strided_slice %9 {offsets = [1, 0, 0], sizes = [10, 32, 128], strides = [1, 1, 1]} : vector<12x32x128xbf16> to vector<10x32x128xbf16>
    %16 = vector.shape_cast %15 : vector<10x32x128xbf16> to vector<320x128xbf16>
    %c1 = arith.constant 1 : index
    %c0_16 = arith.constant 0 : index
    %c0_17 = arith.constant 0 : index
    %c0_18 = arith.constant 0 : index
    %17 = vector.load %arg3[%c1, %c0_16, %c0_17, %c0_18] : memref<3x3x128x128xbf16, #tpu.memory_space<vmem>>, vector<1x1x128x128xbf16>
    %18 = vector.shape_cast %17 : vector<1x1x128x128xbf16> to vector<128x128xbf16>
    %cst_19 = arith.constant dense<0.000000e+00> : vector<320x128xf32>
    %19 = tpu.matmul %16, %18, %cst_19 {dimension_numbers = #tpu.dot_dimension_numbers<[1], [0], [0], [1], [0, 0, 1, 1], [], []>} : vector<320x128xbf16>, vector<128x128xbf16>, vector<320x128xf32> -> vector<320x128xf32>
    %20 = arith.addf %14, %19 : vector<320x128xf32>
    %21 = vector.extract_strided_slice %9 {offsets = [2, 0, 0], sizes = [10, 32, 128], strides = [1, 1, 1]} : vector<12x32x128xbf16> to vector<10x32x128xbf16>
    %22 = vector.shape_cast %21 : vector<10x32x128xbf16> to vector<320x128xbf16>
    %c2 = arith.constant 2 : index
    %c0_20 = arith.constant 0 : index
    %c0_21 = arith.constant 0 : index
    %c0_22 = arith.constant 0 : index
    %23 = vector.load %arg3[%c2, %c0_20, %c0_21, %c0_22] : memref<3x3x128x128xbf16, #tpu.memory_space<vmem>>, vector<1x1x128x128xbf16>
    %24 = vector.shape_cast %23 : vector<1x1x128x128xbf16> to vector<128x128xbf16>
    %cst_23 = arith.constant dense<0.000000e+00> : vector<320x128xf32>
    %25 = tpu.matmul %22, %24, %cst_23 {dimension_numbers = #tpu.dot_dimension_numbers<[1], [0], [0], [1], [0, 0, 1, 1], [], []>} : vector<320x128xbf16>, vector<128x128xbf16>, vector<320x128xf32> -> vector<320x128xf32>
    %26 = arith.addf %20, %25 : vector<320x128xf32>
    %c1_i32 = arith.constant 1 : i32
    %27 = tpu.dynamic_rotate %26 by %c1_i32 dim 0 : vector<320x128xf32>, i32 -> vector<320x128xf32>
    %28 = vector.extract_strided_slice %9 {offsets = [0, 0, 0], sizes = [10, 32, 128], strides = [1, 1, 1]} : vector<12x32x128xbf16> to vector<10x32x128xbf16>
    %29 = vector.shape_cast %28 : vector<10x32x128xbf16> to vector<320x128xbf16>
    %c0_24 = arith.constant 0 : index
    %c1_25 = arith.constant 1 : index
    %c0_26 = arith.constant 0 : index
    %c0_27 = arith.constant 0 : index
    %30 = vector.load %arg3[%c0_24, %c1_25, %c0_26, %c0_27] : memref<3x3x128x128xbf16, #tpu.memory_space<vmem>>, vector<1x1x128x128xbf16>
    %31 = vector.shape_cast %30 : vector<1x1x128x128xbf16> to vector<128x128xbf16>
    %cst_28 = arith.constant dense<0.000000e+00> : vector<320x128xf32>
    %32 = tpu.matmul %29, %31, %cst_28 {dimension_numbers = #tpu.dot_dimension_numbers<[1], [0], [0], [1], [0, 0, 1, 1], [], []>} : vector<320x128xbf16>, vector<128x128xbf16>, vector<320x128xf32> -> vector<320x128xf32>
    %33 = vector.extract_strided_slice %9 {offsets = [1, 0, 0], sizes = [10, 32, 128], strides = [1, 1, 1]} : vector<12x32x128xbf16> to vector<10x32x128xbf16>
    %34 = vector.shape_cast %33 : vector<10x32x128xbf16> to vector<320x128xbf16>
    %c1_29 = arith.constant 1 : index
    %c1_30 = arith.constant 1 : index
    %c0_31 = arith.constant 0 : index
    %c0_32 = arith.constant 0 : index
    %35 = vector.load %arg3[%c1_29, %c1_30, %c0_31, %c0_32] : memref<3x3x128x128xbf16, #tpu.memory_space<vmem>>, vector<1x1x128x128xbf16>
    %36 = vector.shape_cast %35 : vector<1x1x128x128xbf16> to vector<128x128xbf16>
    %cst_33 = arith.constant dense<0.000000e+00> : vector<320x128xf32>
    %37 = tpu.matmul %34, %36, %cst_33 {dimension_numbers = #tpu.dot_dimension_numbers<[1], [0], [0], [1], [0, 0, 1, 1], [], []>} : vector<320x128xbf16>, vector<128x128xbf16>, vector<320x128xf32> -> vector<320x128xf32>
    %38 = arith.addf %32, %37 : vector<320x128xf32>
    %39 = vector.extract_strided_slice %9 {offsets = [2, 0, 0], sizes = [10, 32, 128], strides = [1, 1, 1]} : vector<12x32x128xbf16> to vector<10x32x128xbf16>
    %40 = vector.shape_cast %39 : vector<10x32x128xbf16> to vector<320x128xbf16>
    %c2_34 = arith.constant 2 : index
    %c1_35 = arith.constant 1 : index
    %c0_36 = arith.constant 0 : index
    %c0_37 = arith.constant 0 : index
    %41 = vector.load %arg3[%c2_34, %c1_35, %c0_36, %c0_37] : memref<3x3x128x128xbf16, #tpu.memory_space<vmem>>, vector<1x1x128x128xbf16>
    %42 = vector.shape_cast %41 : vector<1x1x128x128xbf16> to vector<128x128xbf16>
    %cst_38 = arith.constant dense<0.000000e+00> : vector<320x128xf32>
    %43 = tpu.matmul %40, %42, %cst_38 {dimension_numbers = #tpu.dot_dimension_numbers<[1], [0], [0], [1], [0, 0, 1, 1], [], []>} : vector<320x128xbf16>, vector<128x128xbf16>, vector<320x128xf32> -> vector<320x128xf32>
    %44 = arith.addf %38, %43 : vector<320x128xf32>
    %45 = arith.addf %27, %44 : vector<320x128xf32>
    %46 = vector.extract_strided_slice %9 {offsets = [0, 0, 0], sizes = [10, 32, 128], strides = [1, 1, 1]} : vector<12x32x128xbf16> to vector<10x32x128xbf16>
    %47 = vector.shape_cast %46 : vector<10x32x128xbf16> to vector<320x128xbf16>
    %c0_39 = arith.constant 0 : index
    %c2_40 = arith.constant 2 : index
    %c0_41 = arith.constant 0 : index
    %c0_42 = arith.constant 0 : index
    %48 = vector.load %arg3[%c0_39, %c2_40, %c0_41, %c0_42] : memref<3x3x128x128xbf16, #tpu.memory_space<vmem>>, vector<1x1x128x128xbf16>
    %49 = vector.shape_cast %48 : vector<1x1x128x128xbf16> to vector<128x128xbf16>
    %cst_43 = arith.constant dense<0.000000e+00> : vector<320x128xf32>
    %50 = tpu.matmul %47, %49, %cst_43 {dimension_numbers = #tpu.dot_dimension_numbers<[1], [0], [0], [1], [0, 0, 1, 1], [], []>} : vector<320x128xbf16>, vector<128x128xbf16>, vector<320x128xf32> -> vector<320x128xf32>
    %51 = vector.extract_strided_slice %9 {offsets = [1, 0, 0], sizes = [10, 32, 128], strides = [1, 1, 1]} : vector<12x32x128xbf16> to vector<10x32x128xbf16>
    %52 = vector.shape_cast %51 : vector<10x32x128xbf16> to vector<320x128xbf16>
    %c1_44 = arith.constant 1 : index
    %c2_45 = arith.constant 2 : index
    %c0_46 = arith.constant 0 : index
    %c0_47 = arith.constant 0 : index
    %53 = vector.load %arg3[%c1_44, %c2_45, %c0_46, %c0_47] : memref<3x3x128x128xbf16, #tpu.memory_space<vmem>>, vector<1x1x128x128xbf16>
    %54 = vector.shape_cast %53 : vector<1x1x128x128xbf16> to vector<128x128xbf16>
    %cst_48 = arith.constant dense<0.000000e+00> : vector<320x128xf32>
    %55 = tpu.matmul %52, %54, %cst_48 {dimension_numbers = #tpu.dot_dimension_numbers<[1], [0], [0], [1], [0, 0, 1, 1], [], []>} : vector<320x128xbf16>, vector<128x128xbf16>, vector<320x128xf32> -> vector<320x128xf32>
    %56 = arith.addf %50, %55 : vector<320x128xf32>
    %57 = vector.extract_strided_slice %9 {offsets = [2, 0, 0], sizes = [10, 32, 128], strides = [1, 1, 1]} : vector<12x32x128xbf16> to vector<10x32x128xbf16>
    %58 = vector.shape_cast %57 : vector<10x32x128xbf16> to vector<320x128xbf16>
    %c2_49 = arith.constant 2 : index
    %c2_50 = arith.constant 2 : index
    %c0_51 = arith.constant 0 : index
    %c0_52 = arith.constant 0 : index
    %59 = vector.load %arg3[%c2_49, %c2_50, %c0_51, %c0_52] : memref<3x3x128x128xbf16, #tpu.memory_space<vmem>>, vector<1x1x128x128xbf16>
    %60 = vector.shape_cast %59 : vector<1x1x128x128xbf16> to vector<128x128xbf16>
    %cst_53 = arith.constant dense<0.000000e+00> : vector<320x128xf32>
    %61 = tpu.matmul %58, %60, %cst_53 {dimension_numbers = #tpu.dot_dimension_numbers<[1], [0], [0], [1], [0, 0, 1, 1], [], []>} : vector<320x128xbf16>, vector<128x128xbf16>, vector<320x128xf32> -> vector<320x128xf32>
    %62 = arith.addf %56, %61 : vector<320x128xf32>
    %c319_i32 = arith.constant 319 : i32
    %63 = tpu.dynamic_rotate %62 by %c319_i32 dim 0 : vector<320x128xf32>, i32 -> vector<320x128xf32>
    %64 = arith.addf %45, %63 : vector<320x128xf32>
    %65 = vector.shape_cast %64 : vector<320x128xf32> to vector<10x32x128xf32>
    %66 = vector.extract_strided_slice %65 {offsets = [0, 8, 0], sizes = [10, 16, 128], strides = [1, 1, 1]} : vector<10x32x128xf32> to vector<10x16x128xf32>
    %c0_54 = arith.constant 0 : index
    %c0_55 = arith.constant 0 : index
    %67 = vector.load %arg4[%c0_54, %c0_55] : memref<1x128xf32, #tpu.memory_space<vmem>>, vector<1x128xf32>
    %68 = vector.shape_cast %67 : vector<1x128xf32> to vector<1x1x128xf32>
    %69 = vector.broadcast %68 : vector<1x1x128xf32> to vector<10x16x128xf32>
    %70 = arith.addf %66, %69 : vector<10x16x128xf32>
    %cst_56 = arith.constant 0.000000e+00 : f32
    %71 = vector.broadcast %cst_56 : f32 to vector<10x16x128xf32>
    %72 = arith.maximumf %70, %71 : vector<10x16x128xf32>
    %73 = arith.truncf %72 : vector<10x16x128xf32> to vector<10x16x128xbf16>
    %c0_57 = arith.constant 0 : index
    %c8 = arith.constant 8 : index
    %c0_58 = arith.constant 0 : index
    %74 = vector.load %arg9[%c0_57, %c8, %c0_58] : memref<10x32x128xbf16, #tpu.memory_space<vmem>>, vector<10x16x128xbf16>
    tpu.vector_store %arg9[%c0_57, %c8, %c0_58], %73 {strides = array<i32>} : memref<10x32x128xbf16, #tpu.memory_space<vmem>>, vector<10x16x128xbf16>,
    %c0_i32_59 = arith.constant 0 : i32
    %75 = arith.cmpi eq, %arg1, %c0_i32_59 : i32
    %76 = arith.extui %75 : i1 to i32
    %c0_i32_60 = arith.constant 0 : i32
    %77 = arith.cmpi ne, %76, %c0_i32_60 : i32
    scf.if %77 {
      %cst_122 = arith.constant 0.000000e+00 : bf16
      %151 = vector.broadcast %cst_122 : bf16 to vector<1x32x128xbf16>
      %c0_123 = arith.constant 0 : index
      %c0_124 = arith.constant 0 : index
      %c0_125 = arith.constant 0 : index
      %152 = vector.load %arg9[%c0_123, %c0_124, %c0_125] : memref<10x32x128xbf16, #tpu.memory_space<vmem>>, vector<1x32x128xbf16>
      tpu.vector_store %arg9[%c0_123, %c0_124, %c0_125], %151 {strides = array<i32>} : memref<10x32x128xbf16, #tpu.memory_space<vmem>>, vector<1x32x128xbf16>,
    } else {
    }
    %c1_i32_61 = arith.constant 1 : i32
    %78 = arith.cmpi eq, %arg1, %c1_i32_61 : i32
    %79 = arith.extui %78 : i1 to i32
    %c0_i32_62 = arith.constant 0 : i32
    %80 = arith.cmpi ne, %79, %c0_i32_62 : i32
    scf.if %80 {
      %cst_122 = arith.constant 0.000000e+00 : bf16
      %151 = vector.broadcast %cst_122 : bf16 to vector<1x32x128xbf16>
      %c9 = arith.constant 9 : index
      %c0_123 = arith.constant 0 : index
      %c0_124 = arith.constant 0 : index
      %152 = vector.load %arg9[%c9, %c0_123, %c0_124] : memref<10x32x128xbf16, #tpu.memory_space<vmem>>, vector<1x32x128xbf16>
      tpu.vector_store %arg9[%c9, %c0_123, %c0_124], %151 {strides = array<i32>} : memref<10x32x128xbf16, #tpu.memory_space<vmem>>, vector<1x32x128xbf16>,
    } else {
    }
    %c2_63 = arith.constant 2 : index
    %c8_64 = arith.constant 8 : index
    %c0_65 = arith.constant 0 : index
    %81 = vector.load %arg8[%c2_63, %c8_64, %c0_65] : memref<12x32x128xbf16, #tpu.memory_space<vmem>>, vector<8x16x128xbf16>
    %82 = arith.extf %81 : vector<8x16x128xbf16> to vector<8x16x128xf32>
    %c0_66 = arith.constant 0 : index
    %c0_67 = arith.constant 0 : index
    %c0_68 = arith.constant 0 : index
    %83 = vector.load %arg9[%c0_66, %c0_67, %c0_68] : memref<10x32x128xbf16, #tpu.memory_space<vmem>>, vector<10x32x128xbf16>
    %84 = vector.extract_strided_slice %83 {offsets = [0, 0, 0], sizes = [8, 32, 128], strides = [1, 1, 1]} : vector<10x32x128xbf16> to vector<8x32x128xbf16>
    %85 = vector.shape_cast %84 : vector<8x32x128xbf16> to vector<256x128xbf16>
    %c0_69 = arith.constant 0 : index
    %c0_70 = arith.constant 0 : index
    %c0_71 = arith.constant 0 : index
    %c0_72 = arith.constant 0 : index
    %86 = vector.load %arg5[%c0_69, %c0_70, %c0_71, %c0_72] : memref<3x3x128x128xbf16, #tpu.memory_space<vmem>>, vector<1x1x128x128xbf16>
    %87 = vector.shape_cast %86 : vector<1x1x128x128xbf16> to vector<128x128xbf16>
    %cst_73 = arith.constant dense<0.000000e+00> : vector<256x128xf32>
    %88 = tpu.matmul %85, %87, %cst_73 {dimension_numbers = #tpu.dot_dimension_numbers<[1], [0], [0], [1], [0, 0, 1, 1], [], []>} : vector<256x128xbf16>, vector<128x128xbf16>, vector<256x128xf32> -> vector<256x128xf32>
    %89 = vector.extract_strided_slice %83 {offsets = [1, 0, 0], sizes = [8, 32, 128], strides = [1, 1, 1]} : vector<10x32x128xbf16> to vector<8x32x128xbf16>
    %90 = vector.shape_cast %89 : vector<8x32x128xbf16> to vector<256x128xbf16>
    %c1_74 = arith.constant 1 : index
    %c0_75 = arith.constant 0 : index
    %c0_76 = arith.constant 0 : index
    %c0_77 = arith.constant 0 : index
    %91 = vector.load %arg5[%c1_74, %c0_75, %c0_76, %c0_77] : memref<3x3x128x128xbf16, #tpu.memory_space<vmem>>, vector<1x1x128x128xbf16>
    %92 = vector.shape_cast %91 : vector<1x1x128x128xbf16> to vector<128x128xbf16>
    %cst_78 = arith.constant dense<0.000000e+00> : vector<256x128xf32>
    %93 = tpu.matmul %90, %92, %cst_78 {dimension_numbers = #tpu.dot_dimension_numbers<[1], [0], [0], [1], [0, 0, 1, 1], [], []>} : vector<256x128xbf16>, vector<128x128xbf16>, vector<256x128xf32> -> vector<256x128xf32>
    %94 = arith.addf %88, %93 : vector<256x128xf32>
    %95 = vector.extract_strided_slice %83 {offsets = [2, 0, 0], sizes = [8, 32, 128], strides = [1, 1, 1]} : vector<10x32x128xbf16> to vector<8x32x128xbf16>
    %96 = vector.shape_cast %95 : vector<8x32x128xbf16> to vector<256x128xbf16>
    %c2_79 = arith.constant 2 : index
    %c0_80 = arith.constant 0 : index
    %c0_81 = arith.constant 0 : index
    %c0_82 = arith.constant 0 : index
    %97 = vector.load %arg5[%c2_79, %c0_80, %c0_81, %c0_82] : memref<3x3x128x128xbf16, #tpu.memory_space<vmem>>, vector<1x1x128x128xbf16>
    %98 = vector.shape_cast %97 : vector<1x1x128x128xbf16> to vector<128x128xbf16>
    %cst_83 = arith.constant dense<0.000000e+00> : vector<256x128xf32>
    %99 = tpu.matmul %96, %98, %cst_83 {dimension_numbers = #tpu.dot_dimension_numbers<[1], [0], [0], [1], [0, 0, 1, 1], [], []>} : vector<256x128xbf16>, vector<128x128xbf16>, vector<256x128xf32> -> vector<256x128xf32>
    %100 = arith.addf %94, %99 : vector<256x128xf32>
    %c1_i32_84 = arith.constant 1 : i32
    %101 = tpu.dynamic_rotate %100 by %c1_i32_84 dim 0 : vector<256x128xf32>, i32 -> vector<256x128xf32>
    %102 = vector.extract_strided_slice %83 {offsets = [0, 0, 0], sizes = [8, 32, 128], strides = [1, 1, 1]} : vector<10x32x128xbf16> to vector<8x32x128xbf16>
    %103 = vector.shape_cast %102 : vector<8x32x128xbf16> to vector<256x128xbf16>
    %c0_85 = arith.constant 0 : index
    %c1_86 = arith.constant 1 : index
    %c0_87 = arith.constant 0 : index
    %c0_88 = arith.constant 0 : index
    %104 = vector.load %arg5[%c0_85, %c1_86, %c0_87, %c0_88] : memref<3x3x128x128xbf16, #tpu.memory_space<vmem>>, vector<1x1x128x128xbf16>
    %105 = vector.shape_cast %104 : vector<1x1x128x128xbf16> to vector<128x128xbf16>
    %cst_89 = arith.constant dense<0.000000e+00> : vector<256x128xf32>
    %106 = tpu.matmul %103, %105, %cst_89 {dimension_numbers = #tpu.dot_dimension_numbers<[1], [0], [0], [1], [0, 0, 1, 1], [], []>} : vector<256x128xbf16>, vector<128x128xbf16>, vector<256x128xf32> -> vector<256x128xf32>
    %107 = vector.extract_strided_slice %83 {offsets = [1, 0, 0], sizes = [8, 32, 128], strides = [1, 1, 1]} : vector<10x32x128xbf16> to vector<8x32x128xbf16>
    %108 = vector.shape_cast %107 : vector<8x32x128xbf16> to vector<256x128xbf16>
    %c1_90 = arith.constant 1 : index
    %c1_91 = arith.constant 1 : index
    %c0_92 = arith.constant 0 : index
    %c0_93 = arith.constant 0 : index
    %109 = vector.load %arg5[%c1_90, %c1_91, %c0_92, %c0_93] : memref<3x3x128x128xbf16, #tpu.memory_space<vmem>>, vector<1x1x128x128xbf16>
    %110 = vector.shape_cast %109 : vector<1x1x128x128xbf16> to vector<128x128xbf16>
    %cst_94 = arith.constant dense<0.000000e+00> : vector<256x128xf32>
    %111 = tpu.matmul %108, %110, %cst_94 {dimension_numbers = #tpu.dot_dimension_numbers<[1], [0], [0], [1], [0, 0, 1, 1], [], []>} : vector<256x128xbf16>, vector<128x128xbf16>, vector<256x128xf32> -> vector<256x128xf32>
    %112 = arith.addf %106, %111 : vector<256x128xf32>
    %113 = vector.extract_strided_slice %83 {offsets = [2, 0, 0], sizes = [8, 32, 128], strides = [1, 1, 1]} : vector<10x32x128xbf16> to vector<8x32x128xbf16>
    %114 = vector.shape_cast %113 : vector<8x32x128xbf16> to vector<256x128xbf16>
    %c2_95 = arith.constant 2 : index
    %c1_96 = arith.constant 1 : index
    %c0_97 = arith.constant 0 : index
    %c0_98 = arith.constant 0 : index
    %115 = vector.load %arg5[%c2_95, %c1_96, %c0_97, %c0_98] : memref<3x3x128x128xbf16, #tpu.memory_space<vmem>>, vector<1x1x128x128xbf16>
    %116 = vector.shape_cast %115 : vector<1x1x128x128xbf16> to vector<128x128xbf16>
    %cst_99 = arith.constant dense<0.000000e+00> : vector<256x128xf32>
    %117 = tpu.matmul %114, %116, %cst_99 {dimension_numbers = #tpu.dot_dimension_numbers<[1], [0], [0], [1], [0, 0, 1, 1], [], []>} : vector<256x128xbf16>, vector<128x128xbf16>, vector<256x128xf32> -> vector<256x128xf32>
    %118 = arith.addf %112, %117 : vector<256x128xf32>
    %119 = arith.addf %101, %118 : vector<256x128xf32>
    %120 = vector.extract_strided_slice %83 {offsets = [0, 0, 0], sizes = [8, 32, 128], strides = [1, 1, 1]} : vector<10x32x128xbf16> to vector<8x32x128xbf16>
    %121 = vector.shape_cast %120 : vector<8x32x128xbf16> to vector<256x128xbf16>
    %c0_100 = arith.constant 0 : index
    %c2_101 = arith.constant 2 : index
    %c0_102 = arith.constant 0 : index
    %c0_103 = arith.constant 0 : index
    %122 = vector.load %arg5[%c0_100, %c2_101, %c0_102, %c0_103] : memref<3x3x128x128xbf16, #tpu.memory_space<vmem>>, vector<1x1x128x128xbf16>
    %123 = vector.shape_cast %122 : vector<1x1x128x128xbf16> to vector<128x128xbf16>
    %cst_104 = arith.constant dense<0.000000e+00> : vector<256x128xf32>
    %124 = tpu.matmul %121, %123, %cst_104 {dimension_numbers = #tpu.dot_dimension_numbers<[1], [0], [0], [1], [0, 0, 1, 1], [], []>} : vector<256x128xbf16>, vector<128x128xbf16>, vector<256x128xf32> -> vector<256x128xf32>
    %125 = vector.extract_strided_slice %83 {offsets = [1, 0, 0], sizes = [8, 32, 128], strides = [1, 1, 1]} : vector<10x32x128xbf16> to vector<8x32x128xbf16>
    %126 = vector.shape_cast %125 : vector<8x32x128xbf16> to vector<256x128xbf16>
    %c1_105 = arith.constant 1 : index
    %c2_106 = arith.constant 2 : index
    %c0_107 = arith.constant 0 : index
    %c0_108 = arith.constant 0 : index
    %127 = vector.load %arg5[%c1_105, %c2_106, %c0_107, %c0_108] : memref<3x3x128x128xbf16, #tpu.memory_space<vmem>>, vector<1x1x128x128xbf16>
    %128 = vector.shape_cast %127 : vector<1x1x128x128xbf16> to vector<128x128xbf16>
    %cst_109 = arith.constant dense<0.000000e+00> : vector<256x128xf32>
    %129 = tpu.matmul %126, %128, %cst_109 {dimension_numbers = #tpu.dot_dimension_numbers<[1], [0], [0], [1], [0, 0, 1, 1], [], []>} : vector<256x128xbf16>, vector<128x128xbf16>, vector<256x128xf32> -> vector<256x128xf32>
    %130 = arith.addf %124, %129 : vector<256x128xf32>
    %131 = vector.extract_strided_slice %83 {offsets = [2, 0, 0], sizes = [8, 32, 128], strides = [1, 1, 1]} : vector<10x32x128xbf16> to vector<8x32x128xbf16>
    %132 = vector.shape_cast %131 : vector<8x32x128xbf16> to vector<256x128xbf16>
    %c2_110 = arith.constant 2 : index
    %c2_111 = arith.constant 2 : index
    %c0_112 = arith.constant 0 : index
    %c0_113 = arith.constant 0 : index
    %133 = vector.load %arg5[%c2_110, %c2_111, %c0_112, %c0_113] : memref<3x3x128x128xbf16, #tpu.memory_space<vmem>>, vector<1x1x128x128xbf16>
    %134 = vector.shape_cast %133 : vector<1x1x128x128xbf16> to vector<128x128xbf16>
    %cst_114 = arith.constant dense<0.000000e+00> : vector<256x128xf32>
    %135 = tpu.matmul %132, %134, %cst_114 {dimension_numbers = #tpu.dot_dimension_numbers<[1], [0], [0], [1], [0, 0, 1, 1], [], []>} : vector<256x128xbf16>, vector<128x128xbf16>, vector<256x128xf32> -> vector<256x128xf32>
    %136 = arith.addf %130, %135 : vector<256x128xf32>
    %c255_i32 = arith.constant 255 : i32
    %137 = tpu.dynamic_rotate %136 by %c255_i32 dim 0 : vector<256x128xf32>, i32 -> vector<256x128xf32>
    %138 = arith.addf %119, %137 : vector<256x128xf32>
    %139 = vector.shape_cast %138 : vector<256x128xf32> to vector<8x32x128xf32>
    %140 = vector.extract_strided_slice %139 {offsets = [0, 8, 0], sizes = [8, 16, 128], strides = [1, 1, 1]} : vector<8x32x128xf32> to vector<8x16x128xf32>
    %c0_115 = arith.constant 0 : index
    %c0_116 = arith.constant 0 : index
    %141 = vector.load %arg6[%c0_115, %c0_116] : memref<1x128xf32, #tpu.memory_space<vmem>>, vector<1x128xf32>
    %142 = vector.shape_cast %141 : vector<1x128xf32> to vector<1x1x128xf32>
    %143 = vector.broadcast %142 : vector<1x1x128xf32> to vector<8x16x128xf32>
    %144 = arith.addf %140, %143 : vector<8x16x128xf32>
    %145 = arith.addf %144, %82 : vector<8x16x128xf32>
    %cst_117 = arith.constant 0.000000e+00 : f32
    %146 = vector.broadcast %cst_117 : f32 to vector<8x16x128xf32>
    %147 = arith.maximumf %145, %146 : vector<8x16x128xf32>
    %c0_118 = arith.constant 0 : index
    %c0_119 = arith.constant 0 : index
    %c0_120 = arith.constant 0 : index
    %c0_121 = arith.constant 0 : index
    %148 = vector.load %arg7[%c0_118, %c0_119, %c0_120, %c0_121] : memref<1x8x16x128xf32, #tpu.memory_space<vmem>>, vector<1x8x16x128xf32>
    %149 = vector.shape_cast %148 : vector<1x8x16x128xf32> to vector<8x16x128xf32>
    %150 = vector.shape_cast %147 : vector<8x16x128xf32> to vector<1x8x16x128xf32>
    tpu.vector_store %arg7[%c0_118, %c0_119, %c0_120, %c0_121], %150 {strides = array<i32>} : memref<1x8x16x128xf32, #tpu.memory_space<vmem>>, vector<1x8x16x128xf32>,
    return
  }
  func.func @transform_1(%arg0: i32, %arg1: i32) -> (i32, i32, i32, i32) {
    %c0_i32 = arith.constant 0 : i32
    %c0_i32_0 = arith.constant 0 : i32
    %c0_i32_1 = arith.constant 0 : i32
    %c0_i32_2 = arith.constant 0 : i32
    %c0_i32_3 = arith.constant 0 : i32
    return %c0_i32, %c0_i32_0, %c0_i32_1, %c0_i32_2 : i32, i32, i32, i32
  }
  func.func @transform_2(%arg0: i32, %arg1: i32) -> (i32, i32) {
    %c0_i32 = arith.constant 0 : i32
    %c0_i32_0 = arith.constant 0 : i32
    %c0_i32_1 = arith.constant 0 : i32
    return %c0_i32, %c0_i32_0 : i32, i32
  }
  func.func @transform_3(%arg0: i32, %arg1: i32) -> (i32, i32, i32, i32) {
    %c0_i32 = arith.constant 0 : i32
    %c0_i32_0 = arith.constant 0 : i32
    %c0_i32_1 = arith.constant 0 : i32
    %c0_i32_2 = arith.constant 0 : i32
    %c0_i32_3 = arith.constant 0 : i32
    return %c0_i32, %c0_i32_0, %c0_i32_1, %c0_i32_2 : i32, i32, i32, i32
  }
  func.func @transform_4(%arg0: i32, %arg1: i32) -> (i32, i32) {
    %c0_i32 = arith.constant 0 : i32
    %c0_i32_0 = arith.constant 0 : i32
    %c0_i32_1 = arith.constant 0 : i32
    return %c0_i32, %c0_i32_0 : i32, i32
  }
  func.func @transform_5(%arg0: i32, %arg1: i32) -> (i32, i32, i32, i32) {
    %c0_i32 = arith.constant 0 : i32
    %c0_i32_0 = arith.constant 0 : i32
    %c0_i32_1 = arith.constant 0 : i32
    return %arg0, %arg1, %c0_i32, %c0_i32_0 : i32, i32, i32, i32
  }
}

</mosaic_0001>

<bundles_post_ra>
// kernel: tpu_custom_call.1
= control target key start
LH: loop header
LB: loop body
LE: loop exit
PB: predicated region body
PF: predicated region fallthrough
CT: control target
= control target key end

     0   :  { %s9394_s0 = inlined_call_operand.hbm [shape: bf16[2,20,32,128], index: 0, kind: input, shape index: {}]   ;;  %s9395_s1 = inlined_call_operand.hbm [shape: bf16[3,3,128,128], index: 1, kind: input, shape index: {}]   ;;  %s9396_s2 = inlined_call_operand.vmem [shape: f32[1,128], index: 2, kind: input, shape index: {}]   ;;  %s9397_s3 = inlined_call_operand.hbm [shape: bf16[3,3,128,128], index: 3, kind: input, shape index: {}]   ;;  %s9398_s4 = inlined_call_operand.vmem [shape: f32[1,128], index: 4, kind: input, shape index: {}]   ;;  %s9399_s5 = inlined_call_operand.hbm [shape: f32[2,16,16,128], index: 5, kind: output, shape index: {}]  }
   0x1   :  { %9406 = sst [smem:[#allocation29_spill]] %s9395_s1 }
   0x2   :  { %9407 = sst [smem:[#allocation30_spill]] %s9397_s3 }
   0x3   :  { %10 = vsyncpa [#allocation6], 0 }
   0x4   :  { %11 = vsyncpa [#allocation9], 0 }
   0x5   :  { %12 = vsyncpa [#allocation7], 0 }
   0x6   :  { %14 = vsyncpa [#allocation7 + $0x1], 0  ;;  %s7747_s18 = smov 0   ;;  %s7749_s19 = smov 0  }
   0x7   :  { %s7751_s20 = smov 0   ;;  %s7753_s21 = smov 0  }
   0x8   :  { %s7755_s22 = smov 0   ;;  %s7757_s23 = smov 0  }
   0x9   :  { %s7759_s24 = smov 0   ;;  %s7761_s25 = smov 0  }
   0xa LB: > { %s5537_s26 = sadd.s32 4294967295, %s7704_s25   ;;  %s5538_s27 = sadd.s32 4294967294, %s7704_s25   ;;  %s7704_s25 = sphi %s7761_s25, %s20_s25   ;;  %s7700_s24 = sphi %s7759_s24, %s9458_s24   ;;  %s7696_s23 = sphi %s7757_s23, %s9457_s23   ;;  %s7692_s22 = sphi %s7755_s22, %s9456_s22   ;;  %s7688_s21 = sphi %s7753_s21, %s9455_s21   ;;  %s7684_s20 = sphi %s7751_s20, %s9454_s20   ;;  %s7680_s19 = sphi %s7749_s19, %s9453_s19   ;;  %s7676_s18 = sphi %s7747_s18, %s9452_s18  }
   0xb   : > { %s29_s28 = sadd.s32 1, %s7696_s23  ;;  %s32_s29 = sadd.s32 1, %s7700_s24 }
   0xc   : > { %p30_p0 = scmp.ge.s32.totalorder %s29_s28, 2  ;;  %s125_s30 = sadd.s32 1, %s7684_s20 }
   0xd   : > { %p135_p1 = scmp.ne.s32.totalorder %s7684_s20, %s7680_s19  ;;  %p136_p2 = scmp.eq.s32.totalorder %s5537_s26, 3 }
   0xe   : > { %s9460_s28 = smov (%p30_p0, %s29_s28), 0  ;;  %s9462_s29 = smov (!%p30_p0, %s32_s29), %s7700_s24 }
   0xf   : > { %9408 = sst [smem:[#allocation19_spill]] %s9460_s28  ;;  %s121_s6 = ssub.s32 %s7696_s23, %s9460_s28 }
  0x10   : > { %p7799_p3 = por %p136_p2, %p135_p1  ;;  %p34_p4 = scmp.ge.s32.totalorder %s9462_s29, 2 }
  0x11   : > { %p141_p5 = scmp.ne.s32.totalorder %s7680_s19, %s7676_s18  ;;  %p142_p6 = scmp.eq.s32.totalorder %s5538_s27, 3 }
  0x12   : > { %p5539_p7 = scmp.ge.s32.totalorder %s7704_s25, 1  ;;  %s9464_s29 = smov (%p34_p4, %s9462_s29), 0 }
  0x13   : > { %9410 = sst [smem:[#allocation20_spill]] %s9464_s29  ;;  %p7808_p8 = por %p142_p6, %p141_p5 }
  0x14   : > { %p149_p9 = scmp.lt.s32.totalorder %s7704_s25, 5  ;;  %s120_s9 = ssub.s32 %s7700_s24, %s9464_s29 }
  0x15   : > { %s122_s10 = sor.u32 %s121_s6, %s120_s9  ;;  %p7819_p12 = scmp.eq.s32.totalorder %s5537_s26, 0 }
  0x16   : > { %p7815_p10 = pnand %p5539_p7, %p149_p9  ;;  %p123_p11 = scmp.eq.s32.totalorder %s122_s10, 0 }
  0x17   : > { %s7706_s14 = smov [#allocation5]  }
  0x18   : > { %p7221_p13 = pneg %p7815_p10  ;;  %s161_s15 = sshll.u32 %s7706_s14, 4  ;;  %s162_s15 = int_to_ptr.vmem [resolvable:$true] %s161_s15 }
  0x19   : > { %s7826_s13 = scalar_select %p123_p11, %s7684_s20, %s125_s30  }
  0x1a   : > { %p7830_p0 = pnand %p7819_p12, %p7221_p13  ;;  %s7539_s17 = scalar_lea.vmem %s162_s15, 9216 }
  0x1b   : > { %p7540_p2 = scmp.ne.s32.totalorder %s162_s15, %s7539_s17  ;;  %p7547_p6 = scmp.lt.s32.totalorder %s162_s15, %s162_s15 }
  0x1c   : > { %p7530_p1 = pneg %p7830_p0  ;;  %p7548_p7 = scmp.lt.s32.totalorder %s7539_s17, %s7539_s17 }
  0x1e   : > { %p7542_p4 = pnand %p7540_p2, %p7530_p1  ;;  %p7549_p9 = por %p7548_p7, %p7547_p6 }
  0x20   : > { %p7543_p5 = pneg %p7542_p4 }
  0x22   : > { %p7550_p11 = pnand %p7549_p9, %p7543_p5 }
  0x24   : > { %7553 = shalt.err (!%p7550_p11)
}
  0x25   : > { %s7707_s26 = smov 64   ;;  %s7708_s27 = smov 4  }
  0x26   : > { %s9415_s1 = sld [smem:[#allocation29_spill]]  ;;  %s7709_s9 = smov [#allocation8]  }
  0x27   : > { %s177_s10 = sshll.u32 %s7709_s9, 4  ;;  %s178_s10 = int_to_ptr.vmem [resolvable:$true] %s177_s10 }
  0x28   : > { %s7565_s14 = scalar_lea.vmem %s178_s10, 9216  ;;  %p7573_p5 = scmp.lt.s32.totalorder %s178_s10, %s178_s10 }
  0x29   : > { %p7566_p13 = scmp.ne.s32.totalorder %s178_s10, %s7565_s14  ;;  %p7574_p6 = scmp.lt.s32.totalorder %s7565_s14, %s7565_s14 }
  0x2b   : > { %p7568_p2 = pnand %p7566_p13, %p7530_p1  ;;  %p7575_p7 = por %p7574_p6, %p7573_p5 }
  0x2c   : > { %7224 = dma.hbm_to_vmem [thread:$0]  (!%p7830_p0), %s9415_s1, 9216, %s162_s15, [#allocation6], %s7707_s26, %s7707_s26, %s7708_s27  }
  0x2d   : > { %p7569_p4 = pneg %p7568_p2 }
  0x2f   : > { %p7576_p9 = pnand %p7575_p7, %p7569_p4 }
  0x31   : > { %7579 = shalt.err (!%p7576_p9)
}
  0x32   : > { %s9416_s3 = sld [smem:[#allocation30_spill]] }
  0x34   : > { %196 = sbr.rel (%p7815_p10) target bundleno = 1315 (0x523), region = 36 }
  0x38   : > { %7227 = dma.hbm_to_vmem [thread:$0]  (!%p7830_p0), %s9416_s3, 9216, %s178_s10, [#allocation9], %s7707_s26, %s7707_s26, %s7708_s27  }
  0x39   : > { %7661 = dma.done.wait (%p7819_p12), [#allocation6], 9216  }
  0x3a   : > { %7663 = vsyncadd (%p7819_p12), [#allocation6], 4294958080 }
  0x3b   : > { %7665 = dma.done.wait (%p7819_p12), [#allocation9], 9216  }
  0x3c   : > { %7667 = vsyncadd (%p7819_p12), [#allocation9], 4294958080  ;;  %s9401_s29 = sand.u32 1, %s7680_s19   ;;  %s5769_s15 = sshll.u32 %s7688_s21, 5  ;;  %v7710_v0 = vmov 0  }
  0x3d   : > { %s7866_s11 = sshll.u32 %s9401_s29, 7  ;;  %s225_s16 = smul.u32 80, %s7692_s22  ;;  %240 = vst [vmem:[#allocation3] sm:$0xf] %v7710_v0  ;;  %241 = vst [vmem:[#allocation3 + $0x10] sm:$0xf] %v7710_v0 }
  0x3e   : > { %242 = vst [vmem:[#allocation3 + $0x20] sm:$0xf] %v7710_v0  ;;  %243 = vst [vmem:[#allocation3 + $0x30] sm:$0xf] %v7710_v0  ;;  %s7711_s26 = smov [#allocation2]   ;;  %s7582_s1 = scalar_lea.hbm %s9394_s0, 10240 }
  0x3f   : > { %244 = vst [vmem:[#allocation3 + $0x40] sm:$0xf] %v7710_v0  ;;  %245 = vst [vmem:[#allocation3 + $0x50] sm:$0xf] %v7710_v0  ;;  %s226_s12 = sadd.s32 %s5769_s15, %s225_s16  ;;  %s236_s27 = sshll.u32 %s7711_s26, 4  ;;  %s237_s27 = int_to_ptr.vmem [resolvable:$true] %s236_s27 }
  0x40   : > { %246 = vst [vmem:[#allocation3 + $0x60] sm:$0xf] %v7710_v0  ;;  %247 = vst [vmem:[#allocation3 + $0x70] sm:$0xf] %v7710_v0  ;;  %s5548_s30 = sshll.u32 %s226_s12, 6 }
  0x41   : > { %248 = vst [vmem:[#allocation3 + $0x80] sm:$0xf] %v7710_v0  ;;  %249 = vst [vmem:[#allocation3 + $0x90] sm:$0xf] %v7710_v0  ;;  %s228_s10 = scalar_lea.hbm %s9394_s0, %s5548_s30 }
  0x42   : > { %250 = vst [vmem:[#allocation3 + $0xc] sm:$0xf] %v7710_v0  ;;  %251 = vst [vmem:[#allocation3 + $0x1c] sm:$0xf] %v7710_v0  ;;  %s7580_s14 = scalar_lea.hbm %s228_s10, 3072  ;;  %p7583_p12 = scmp.lt.s32.totalorder %s228_s10, %s9394_s0 }
  0x43   : > { %252 = vst [vmem:[#allocation3 + $0x2c] sm:$0xf] %v7710_v0  ;;  %253 = vst [vmem:[#allocation3 + $0x3c] sm:$0xf] %v7710_v0  ;;  %p7581_p10 = scmp.ne.s32.totalorder %s228_s10, %s7580_s14  ;;  %p7584_p0 = scmp.lt.s32.totalorder %s7582_s1, %s7580_s14 }
  0x44   : > { %254 = vst [vmem:[#allocation3 + $0x4c] sm:$0xf] %v7710_v0  ;;  %255 = vst [vmem:[#allocation3 + $0x5c] sm:$0xf] %v7710_v0 }
  0x45   : > { %256 = vst [vmem:[#allocation3 + $0x6c] sm:$0xf] %v7710_v0  ;;  %257 = vst [vmem:[#allocation3 + $0x7c] sm:$0xf] %v7710_v0  ;;  %p7585_p1 = por %p7584_p0, %p7583_p12 }
  0x46   : > { %258 = vst [vmem:[#allocation3 + $0x8c] sm:$0xf] %v7710_v0  ;;  %259 = vst [vmem:[#allocation3 + $0x9c] sm:$0xf] %v7710_v0 }
  0x47   : > { %p7586_p11 = pnand %p7585_p1, %p7581_p10 }
  0x49   : > { %7589 = shalt.err (!%p7586_p11)  }
  0x4a   : > { %s7590_s15 = scalar_lea.vmem %s237_s27, 3072  ;;  %p7595_p2 = scmp.lt.s32.totalorder %s237_s27, %s237_s27 }
  0x4b   : > { %p7591_p13 = scmp.ne.s32.totalorder %s237_s27, %s7590_s15  ;;  %p7596_p4 = scmp.lt.s32.totalorder %s7590_s15, %s7590_s15 }
  0x4d   : > { %p7597_p5 = por %p7596_p4, %p7595_p2 }
  0x4f   : > { %p7598_p6 = pnand %p7597_p5, %p7591_p13 }
  0x51   : > { %7601 = shalt.err (!%p7598_p6)  }
  0x52   : > { %239 = dma.hbm_to_vmem [thread:$0]  %s228_s10, 3072, %s237_s27, [#allocation4] }
  0x53   : > { %s7879_s16 = scalar_lea.vmem [#allocation10], %s7866_s11 }
  0x54   : > { %7668 = dma.done.wait [#allocation4], 3072 }
  0x55   : > { %7669 = vsyncadd [#allocation4], 4294964224  ;;  %v7311_v1 = vld [vmem:[#allocation5 + $0xf8] sm:$0xff]   ;;  %v7313_v3 = vld [vmem:[#allocation5 + $0xf0] sm:$0xff]   ;;  %p5666_p7 = scmp.ne.s32.totalorder %s7688_s21, 0 }
  0x56   : > { %v7312_v2 = vld [vmem:[#allocation5 + $0x38] sm:$0xff]   ;;  %6259 = vmatprep.subr.bf16.mxu0 %v7311_v1  ;;  %v7314_v4 = vld [vmem:[#allocation5 + $0x30] sm:$0xff]   ;;  %v7315_v5 = vld [vmem:[#allocation5 + $0xe8] sm:$0xff]  }
  0x57   : > { %6315 = vmatprep.subr.bf16.mxu1 %v7312_v2  ;;  %6260 = vmatpush3.bf16.msra.mxu0 %v7311_v1  ;;  %v7316_v6 = vld [vmem:[#allocation5 + $0x28] sm:$0xff]   ;;  %v7317_v7 = vld [vmem:[#allocation5 + $0xe0] sm:$0xff]   ;;  %v7319_v9 = vld [vmem:[#allocation5 + $0xd8] sm:$0xff]  }
  0x58   : > { %6316 = vmatpush3.bf16.msra.mxu1 %v7312_v2  ;;  %6261 = vmatprep.subr.bf16.mxu0 %v7313_v3  ;;  %v7318_v8 = vld [vmem:[#allocation5 + $0x20] sm:$0xff]   ;;  %v7320_v10 = vld [vmem:[#allocation5 + $0x18] sm:$0xff]   ;;  %v7321_v11 = vld [vmem:[#allocation5 + $0xd0] sm:$0xff]  }
  0x59   : > { %6317 = vmatprep.subr.bf16.mxu1 %v7314_v4  ;;  %v7322_v12 = vld [vmem:[#allocation5 + $0x10] sm:$0xff]   ;;  %v7883_v14 = vld [vmem:[#allocation2] sm:$0xff]   ;;  %v7323_v15 = vld [vmem:[#allocation5 + $0xc8] sm:$0xff]  }
  0x5a   : > { %v7881_v13 = vld [vmem:[#allocation2 + $0x10] sm:$0xff]   ;;  %6331 = vmatprep.mubr.bf16.mxu1 %v7883_v14  ;;  %v7324_v16 = vld [vmem:[#allocation5 + $0x8] sm:$0xff]   ;;  %v7325_v17 = vld [vmem:[#allocation5 + $0xc0] sm:$0xff]  }
  0x5b   : > { %6262 = vmatpush3.bf16.msra.mxu0 %v7313_v3  ;;  %6275 = vmatprep.mubr.bf16.mxu0 %v7881_v13  ;;  %v7326_v18 = vld [vmem:[#allocation5] sm:$0xff]   ;;  %v7331_v19 = vld [vmem:[#allocation5 + $0x1b8] sm:$0xff]   ;;  %v7889_v21 = vld [vmem:[#allocation2 + $0x8] sm:$0xff]  }
  0x5c   : > { %6318 = vmatpush3.bf16.msra.mxu1 %v7314_v4  ;;  %6263 = vmatprep.subr.bf16.mxu0 %v7315_v5  ;;  %v7887_v20 = vld [vmem:[#allocation2 + $0x18] sm:$0xff]   ;;  %v7891_v22 = vld [vmem:[#allocation2 + $0x20] sm:$0xff]   ;;  %v7334_v23 = vld [vmem:[#allocation5 + $0x1b0] sm:$0xff]  }
  0x5d   : > { %6319 = vmatprep.subr.bf16.mxu1 %v7316_v6  ;;  %v7897_v24 = vld [vmem:[#allocation2 + $0x28] sm:$0xff]   ;;  %v7348_v26 = vld [vmem:[#allocation5 + $0x138] sm:$0xff]   ;;  %v7899_v27 = vld [vmem:[#allocation2 + $0x30] sm:$0xff]  }
  0x5e   : > { %v7337_v25 = vld [vmem:[#allocation5 + $0x1a8] sm:$0xff]   ;;  %v7350_v28 = vld [vmem:[#allocation5 + $0x130] sm:$0xff]   ;;  %v7340_v29 = vld [vmem:[#allocation5 + $0x1a0] sm:$0xff]  }
  0x5f   : > { %6264 = vmatpush3.bf16.msra.mxu0 %v7315_v5  ;;  %v7353_v30 = vld [vmem:[#allocation5 + $0x128] sm:$0xff]   ;;  %v7905_v31 = vld [vmem:[#allocation2 + $0x38] sm:$0xff]   ;;  %v7355_v33 = vld [vmem:[#allocation5 + $0x120] sm:$0xff]  }
  0x60   : > { %6320 = vmatpush3.bf16.msra.mxu1 %v7316_v6  ;;  %6265 = vmatprep.subr.bf16.mxu0 %v7317_v7  ;;  %v7345_v32 = vld [vmem:[#allocation5 + $0x198] sm:$0xff]   ;;  %v7907_v34 = vld [vmem:[#allocation2 + $0x40] sm:$0xff]   ;;  %v7349_v35 = vld [vmem:[#allocation5 + $0x190] sm:$0xff]  }
  0x61   : > { %6321 = vmatprep.subr.bf16.mxu1 %v7318_v8  ;;  %v7358_v36 = vld [vmem:[#allocation5 + $0x118] sm:$0xff]   ;;  %v7913_v37 = vld [vmem:[#allocation2 + $0x48] sm:$0xff]   ;;  %v7359_v39 = vld [vmem:[#allocation5 + $0x110] sm:$0xff]  }
  0x62   : > { %v7354_v38 = vld [vmem:[#allocation5 + $0x188] sm:$0xff]   ;;  %v7915_v40 = vld [vmem:[#allocation2 + $0x50] sm:$0xff]   ;;  %v7360_v41 = vld [vmem:[#allocation5 + $0x180] sm:$0xff]  }
  0x63   : > { %6266 = vmatpush3.bf16.msra.mxu0 %v7317_v7  ;;  %v7363_v42 = vld [vmem:[#allocation5 + $0x108] sm:$0xff]   ;;  %v7921_v43 = vld [vmem:[#allocation2 + $0x58] sm:$0xff]   ;;  %v7364_v45 = vld [vmem:[#allocation5 + $0x100] sm:$0xff]  }
  0x64   : > { %6322 = vmatpush3.bf16.msra.mxu1 %v7318_v8  ;;  %6267 = vmatprep.subr.bf16.mxu0 %v7319_v9  ;;  %v7365_v44 = vld [vmem:[#allocation5 + $0x78] sm:$0xff]   ;;  %v7923_v46 = vld [vmem:[#allocation2 + $0x60] sm:$0xff]   ;;  %v7929_v48 = vld [vmem:[#allocation2 + $0x68] sm:$0xff]  }
  0x65   : > { %6323 = vmatprep.subr.bf16.mxu1 %v7320_v10  ;;  %v7370_v47 = vld [vmem:[#allocation5 + $0x1f8] sm:$0xff]   ;;  %v7931_v49 = vld [vmem:[#allocation2 + $0x70] sm:$0xff]   ;;  %v7939_v51 = vld [vmem:[#allocation2 + $0x80] sm:$0xff]  }
  0x66   : > { %v7937_v50 = vld [vmem:[#allocation2 + $0x78] sm:$0xff]   ;;  %v7945_v52 = vld [vmem:[#allocation2 + $0x88] sm:$0xff]   ;;  %v7947_v53 = vld [vmem:[#allocation2 + $0x90] sm:$0xff]  }
  0x67   : > { %6268 = vmatpush3.bf16.msra.mxu0 %v7319_v9  ;;  %v7953_v54 = vld [vmem:[#allocation2 + $0x98] sm:$0xff]   ;;  %v7955_v55 = vld [vmem:[#allocation2 + $0xa0] sm:$0xff]   ;;  %v7961_v56 = vld [vmem:[#allocation2 + $0xa8] sm:$0xff]  }
  0x68   : > { %6324 = vmatpush3.bf16.msra.mxu1 %v7320_v10  ;;  %6269 = vmatprep.subr.bf16.mxu0 %v7321_v11  ;;  %v7366_v57 = vld [vmem:[#allocation5 + $0x70] sm:$0xff]   ;;  %v7367_v59 = vld [vmem:[#allocation5 + $0x68] sm:$0xff]   ;;  %v7368_v61 = vld [vmem:[#allocation5 + $0x60] sm:$0xff]  }
  0x69   : > { %6325 = vmatprep.subr.bf16.mxu1 %v7322_v12  ;;  %v7372_v58 = vld [vmem:[#allocation5 + $0x1f0] sm:$0xff]   ;;  %v7373_v60 = vld [vmem:[#allocation5 + $0x1e8] sm:$0xff]   ;;  %v7375_v62 = vld [vmem:[#allocation5 + $0x1e0] sm:$0xff]  }
  0x6a   : > { %v7369_v63 = vld [vmem:[#allocation5 + $0x58] sm:$0xff]   ;;  %v7371_v1 = vld [vmem:[#allocation5 + $0x50] sm:$0xff]   ;;  %v7374_v3 = vld [vmem:[#allocation5 + $0x48] sm:$0xff]  }
  0x6b   : > { %6270 = vmatpush3.bf16.msra.mxu0 %v7321_v11  ;;  %v7376_v0 = vld [vmem:[#allocation5 + $0x1d8] sm:$0xff]   ;;  %v7377_v2 = vld [vmem:[#allocation5 + $0x1d0] sm:$0xff]   ;;  %v7381_v4 = vld [vmem:[#allocation5 + $0x1c8] sm:$0xff]  }
  0x6c   : > { %6326 = vmatpush3.bf16.msra.mxu1 %v7322_v12  ;;  %6271 = vmatprep.subr.bf16.mxu0 %v7323_v15  ;;  %v7378_v5 = vld [vmem:[#allocation5 + $0x40] sm:$0xff]   ;;  %v7383_v7 = vld [vmem:[#allocation5 + $0x178] sm:$0xff]   ;;  %v7999_v9 = vld [vmem:[#allocation2 + $0xb0] sm:$0xff]  }
  0x6d   : > { %6327 = vmatprep.subr.bf16.mxu1 %v7324_v16  ;;  %v7382_v6 = vld [vmem:[#allocation5 + $0x1c0] sm:$0xff]   ;;  %v7388_v8 = vld [vmem:[#allocation5 + $0xb8] sm:$0xff]   ;;  %v7384_v11 = vld [vmem:[#allocation5 + $0x170] sm:$0xff]  }
  0x6e   : > { %v8005_v10 = vld [vmem:[#allocation2 + $0xb8] sm:$0xff]   ;;  %v7390_v12 = vld [vmem:[#allocation5 + $0xb0] sm:$0xff]  }
  0x6f   : > { %6272 = vmatpush3.bf16.msra.mxu0 %v7323_v15  ;;  %v7385_v15 = vld [vmem:[#allocation5 + $0x168] sm:$0xff]  }
  0x70   : > { %6328 = vmatpush3.bf16.msra.mxu1 %v7324_v16  ;;  %6273 = vmatprep.subr.bf16.mxu0 %v7325_v17  ;;  %v7391_v16 = vld [vmem:[#allocation5 + $0xa8] sm:$0xff]  }
  0x71   : > { %6329 = vmatprep.subr.bf16.mxu1 %v7326_v18 }
  0x73   : > { %6274 = vmatpush3.bf16.msra.mxu0 %v7325_v17  ;;  %v7393_v17 = vld [vmem:[#allocation5 + $0xa0] sm:$0xff]  }
  0x74   : > { %6330 = vmatpush3.bf16.msra.mxu1 %v7326_v18  ;;  %6371 = vmatprep.subr.bf16.mxu0 %v7331_v19  ;;  %v7394_v18 = vld [vmem:[#allocation5 + $0x98] sm:$0xff]  }
  0x75   : > { %6427 = vmatprep.subr.bf16.mxu1 %v7348_v26 }
  0x76   : > { %6276 = vmatmul.mubr.bf16.vlgmr.msra.gmra.mxu0 %v7887_v20 }
  0x77   : > { %6332 = vmatmul.mubr.bf16.vlgmr.msra.gmra.mxu1 %v7889_v21  ;;  %6372 = vmatpush3.bf16.msra.mxu0 %v7331_v19  ;;  %v7389_v19 = vld [vmem:[#allocation5 + $0x150] sm:$0xff]  }
  0x78   : > { %6279 = vmatprep.mubr.bf16.mxu0 %v7891_v22  ;;  %6335 = vmatprep.mubr.bf16.mxu1 %v7881_v13 }
  0x79   : > { %6373 = vmatprep.subr.bf16.mxu0 %v7334_v23  ;;  %6428 = vmatpush3.bf16.msra.mxu1 %v7348_v26  ;;  %v7397_v26 = vld [vmem:[#allocation5 + $0x88] sm:$0xff]  }
  0x7a   : > { %6429 = vmatprep.subr.bf16.mxu1 %v7350_v28 }
  0x7b   : > { %6374 = vmatpush3.bf16.msra.mxu0 %v7334_v23  ;;  %v7395_v23 = vld [vmem:[#allocation5 + $0x90] sm:$0xff]  }
  0x7c   : > { %6375 = vmatprep.subr.bf16.mxu0 %v7337_v25 }
  0x7d   : > { %6430 = vmatpush3.bf16.msra.mxu1 %v7350_v28  ;;  %v7396_v28 = vld [vmem:[#allocation5 + $0x140] sm:$0xff]  }
  0x7e   : > { %6280 = vmatmul.mubr.bf16.gmra.mxu0 %v7897_v24  ;;  %6431 = vmatprep.subr.bf16.mxu1 %v7353_v30 }
  0x7f   : > { %6336 = vmatmul.mubr.bf16.gmra.mxu1 %v7887_v20  ;;  %6283 = vmatprep.mubr.bf16.mxu0 %v7899_v27 }
  0x80   : > { %6339 = vmatprep.mubr.bf16.mxu1 %v7891_v22  ;;  %6376 = vmatpush3.bf16.msra.mxu0 %v7337_v25  ;;  %v7392_v25 = vld [vmem:[#allocation5 + $0x148] sm:$0xff]  }
  0x81   : > { %6377 = vmatprep.subr.bf16.mxu0 %v7340_v29  ;;  %6432 = vmatpush3.bf16.msra.mxu1 %v7353_v30  ;;  %v8027_v30 = vld [vmem:[#allocation5 + $0x238] sm:$0xff]  }
  0x82   : > { %6433 = vmatprep.subr.bf16.mxu1 %v7355_v33 }
  0x84   : > { %6378 = vmatpush3.bf16.msra.mxu0 %v7340_v29  ;;  %v7398_v29 = vld [vmem:[#allocation5 + $0x80] sm:$0xff]  }
  0x85   : > { %6379 = vmatprep.subr.bf16.mxu0 %v7345_v32  ;;  %6434 = vmatpush3.bf16.msra.mxu1 %v7355_v33 }
  0x86   : > { %6284 = vmatmul.mubr.bf16.gmra.mxu0 %v7905_v31  ;;  %6435 = vmatprep.subr.bf16.mxu1 %v7358_v36 }
  0x87   : > { %6340 = vmatmul.mubr.bf16.gmra.mxu1 %v7897_v24  ;;  %6287 = vmatprep.mubr.bf16.mxu0 %v7907_v34 }
  0x88   : > { %6343 = vmatprep.mubr.bf16.mxu1 %v7899_v27  ;;  %6380 = vmatpush3.bf16.msra.mxu0 %v7345_v32 }
  0x89   : > { %6381 = vmatprep.subr.bf16.mxu0 %v7349_v35  ;;  %6436 = vmatpush3.bf16.msra.mxu1 %v7358_v36 }
  0x8a   : > { %6437 = vmatprep.subr.bf16.mxu1 %v7359_v39 }
  0x8c   : > { %6382 = vmatpush3.bf16.msra.mxu0 %v7349_v35 }
  0x8d   : > { %6383 = vmatprep.subr.bf16.mxu0 %v7354_v38  ;;  %6438 = vmatpush3.bf16.msra.mxu1 %v7359_v39 }
  0x8e   : > { %6288 = vmatmul.mubr.bf16.gmra.mxu0 %v7913_v37  ;;  %6439 = vmatprep.subr.bf16.mxu1 %v7363_v42 }
  0x8f   : > { %6344 = vmatmul.mubr.bf16.gmra.mxu1 %v7905_v31  ;;  %6291 = vmatprep.mubr.bf16.mxu0 %v7915_v40 }
  0x90   : > { %6347 = vmatprep.mubr.bf16.mxu1 %v7907_v34  ;;  %6384 = vmatpush3.bf16.msra.mxu0 %v7354_v38 }
  0x91   : > { %6385 = vmatprep.subr.bf16.mxu0 %v7360_v41  ;;  %6440 = vmatpush3.bf16.msra.mxu1 %v7363_v42 }
  0x92   : > { %6441 = vmatprep.subr.bf16.mxu1 %v7364_v45 }
  0x94   : > { %6386 = vmatpush3.bf16.msra.mxu0 %v7360_v41 }
  0x95   : > { %6483 = vmatprep.subr.bf16.mxu0 %v7365_v44  ;;  %6442 = vmatpush3.bf16.msra.mxu1 %v7364_v45 }
  0x96   : > { %6292 = vmatmul.mubr.bf16.gmra.mxu0 %v7921_v43  ;;  %6539 = vmatprep.subr.bf16.mxu1 %v7370_v47 }
  0x97   : > { %6348 = vmatmul.mubr.bf16.gmra.mxu1 %v7913_v37  ;;  %6295 = vmatprep.mubr.bf16.mxu0 %v7923_v46 }
  0x98   : > { %6351 = vmatprep.mubr.bf16.mxu1 %v7915_v40 }
  0x9e   : > { %6296 = vmatmul.mubr.bf16.gmra.mxu0 %v7929_v48 }
  0x9f   : > { %6352 = vmatmul.mubr.bf16.gmra.mxu1 %v7921_v43  ;;  %6299 = vmatprep.mubr.bf16.mxu0 %v7931_v49 }
  0xa0   : > { %6355 = vmatprep.mubr.bf16.mxu1 %v7923_v46 }
  0xa6   : > { %6300 = vmatmul.mubr.bf16.gmra.mxu0 %v7937_v50 }
  0xa7   : > { %6356 = vmatmul.mubr.bf16.gmra.mxu1 %v7929_v48  ;;  %6303 = vmatprep.mubr.bf16.mxu0 %v7939_v51 }
  0xa8   : > { %6359 = vmatprep.mubr.bf16.mxu1 %v7931_v49 }
  0xae   : > { %6304 = vmatmul.mubr.bf16.gmra.mxu0 %v7945_v52 }
  0xaf   : > { %6360 = vmatmul.mubr.bf16.gmra.mxu1 %v7937_v50  ;;  %6307 = vmatprep.mubr.bf16.mxu0 %v7947_v53 }
  0xb0   : > { %6363 = vmatprep.mubr.bf16.mxu1 %v7939_v51 }
  0xb6   : > { %6308 = vmatmul.mubr.bf16.gmra.mxu0 %v7953_v54 }
  0xb7   : > { %6364 = vmatmul.mubr.bf16.gmra.mxu1 %v7945_v52  ;;  %6311 = vmatprep.mubr.bf16.mxu0 %v7955_v55 }
  0xb8   : > { %6367 = vmatprep.mubr.bf16.mxu1 %v7947_v53 }
  0xbe   : > { %6312 = vmatmul.mubr.bf16.gmra.mxu0 %v7961_v56 }
  0xbf   : > { %6368 = vmatmul.mubr.bf16.gmra.mxu1 %v7953_v54  ;;  %6387 = vmatprep.mubr.bf16.mxu0 %v7891_v22 }
  0xc0   : > { %6443 = vmatprep.mubr.bf16.mxu1 %v7881_v13 }
  0xc6   : > { %6388 = vmatmul.mubr.bf16.vlgmr.msra.gmra.mxu0 %v7897_v24 }
  0xc7   : > { %6444 = vmatmul.mubr.bf16.vlgmr.msra.gmra.mxu1 %v7887_v20  ;;  %6484 = vmatpush3.bf16.msra.mxu0 %v7365_v44 }
  0xc8   : > { %6391 = vmatprep.mubr.bf16.mxu0 %v7899_v27  ;;  %6447 = vmatprep.mubr.bf16.mxu1 %v7891_v22 }
  0xc9   : > { %6485 = vmatprep.subr.bf16.mxu0 %v7366_v57  ;;  %6540 = vmatpush3.bf16.msra.mxu1 %v7370_v47 }
  0xca   : > { %6541 = vmatprep.subr.bf16.mxu1 %v7372_v58 }
  0xcb   : > { %6486 = vmatpush3.bf16.msra.mxu0 %v7366_v57 }
  0xcc   : > { %6487 = vmatprep.subr.bf16.mxu0 %v7367_v59 }
  0xcd   : > { %6542 = vmatpush3.bf16.msra.mxu1 %v7372_v58 }
  0xce   : > { %6392 = vmatmul.mubr.bf16.gmra.mxu0 %v7905_v31  ;;  %6543 = vmatprep.subr.bf16.mxu1 %v7373_v60 }
  0xcf   : > { %6448 = vmatmul.mubr.bf16.gmra.mxu1 %v7897_v24  ;;  %6395 = vmatprep.mubr.bf16.mxu0 %v7907_v34 }
  0xd0   : > { %6451 = vmatprep.mubr.bf16.mxu1 %v7899_v27  ;;  %6488 = vmatpush3.bf16.msra.mxu0 %v7367_v59 }
  0xd1   : > { %6489 = vmatprep.subr.bf16.mxu0 %v7368_v61  ;;  %6544 = vmatpush3.bf16.msra.mxu1 %v7373_v60 }
  0xd2   : > { %6545 = vmatprep.subr.bf16.mxu1 %v7375_v62 }
  0xd4   : > { %6490 = vmatpush3.bf16.msra.mxu0 %v7368_v61 }
  0xd5   : > { %6491 = vmatprep.subr.bf16.mxu0 %v7369_v63  ;;  %6546 = vmatpush3.bf16.msra.mxu1 %v7375_v62 }
  0xd6   : > { %6396 = vmatmul.mubr.bf16.gmra.mxu0 %v7913_v37  ;;  %6547 = vmatprep.subr.bf16.mxu1 %v7376_v0 }
  0xd7   : > { %6452 = vmatmul.mubr.bf16.gmra.mxu1 %v7905_v31  ;;  %6399 = vmatprep.mubr.bf16.mxu0 %v7915_v40 }
  0xd8   : > { %6455 = vmatprep.mubr.bf16.mxu1 %v7907_v34  ;;  %6492 = vmatpush3.bf16.msra.mxu0 %v7369_v63 }
  0xd9   : > { %6493 = vmatprep.subr.bf16.mxu0 %v7371_v1  ;;  %6548 = vmatpush3.bf16.msra.mxu1 %v7376_v0 }
  0xda   : > { %6549 = vmatprep.subr.bf16.mxu1 %v7377_v2 }
  0xdc   : > { %6494 = vmatpush3.bf16.msra.mxu0 %v7371_v1 }
  0xdd   : > { %6495 = vmatprep.subr.bf16.mxu0 %v7374_v3  ;;  %6550 = vmatpush3.bf16.msra.mxu1 %v7377_v2 }
  0xde   : > { %6400 = vmatmul.mubr.bf16.gmra.mxu0 %v7921_v43  ;;  %6551 = vmatprep.subr.bf16.mxu1 %v7381_v4 }
  0xdf   : > { %6456 = vmatmul.mubr.bf16.gmra.mxu1 %v7913_v37  ;;  %6403 = vmatprep.mubr.bf16.mxu0 %v7923_v46 }
  0xe0   : > { %6459 = vmatprep.mubr.bf16.mxu1 %v7915_v40  ;;  %6496 = vmatpush3.bf16.msra.mxu0 %v7374_v3 }
  0xe1   : > { %6497 = vmatprep.subr.bf16.mxu0 %v7378_v5  ;;  %6552 = vmatpush3.bf16.msra.mxu1 %v7381_v4 }
  0xe2   : > { %6553 = vmatprep.subr.bf16.mxu1 %v7382_v6 }
  0xe4   : > { %6498 = vmatpush3.bf16.msra.mxu0 %v7378_v5 }
  0xe5   : > { %6554 = vmatpush3.bf16.msra.mxu1 %v7382_v6  ;;  %6595 = vmatprep.subr.bf16.mxu0 %v7383_v7 }
  0xe6   : > { %6404 = vmatmul.mubr.bf16.gmra.mxu0 %v7929_v48  ;;  %6651 = vmatprep.subr.bf16.mxu1 %v7388_v8 }
  0xe7   : > { %6460 = vmatmul.mubr.bf16.gmra.mxu1 %v7921_v43  ;;  %6407 = vmatprep.mubr.bf16.mxu0 %v7931_v49 }
  0xe8   : > { %6463 = vmatprep.mubr.bf16.mxu1 %v7923_v46 }
  0xee   : > { %6408 = vmatmul.mubr.bf16.gmra.mxu0 %v7937_v50 }
  0xef   : > { %6464 = vmatmul.mubr.bf16.gmra.mxu1 %v7929_v48  ;;  %6411 = vmatprep.mubr.bf16.mxu0 %v7939_v51 }
  0xf0   : > { %6467 = vmatprep.mubr.bf16.mxu1 %v7931_v49 }
  0xf6   : > { %6412 = vmatmul.mubr.bf16.gmra.mxu0 %v7945_v52 }
  0xf7   : > { %6468 = vmatmul.mubr.bf16.gmra.mxu1 %v7937_v50  ;;  %6415 = vmatprep.mubr.bf16.mxu0 %v7947_v53 }
  0xf8   : > { %6471 = vmatprep.mubr.bf16.mxu1 %v7939_v51 }
  0xfe   : > { %6416 = vmatmul.mubr.bf16.gmra.mxu0 %v7953_v54 }
  0xff   : > { %6472 = vmatmul.mubr.bf16.gmra.mxu1 %v7945_v52  ;;  %6419 = vmatprep.mubr.bf16.mxu0 %v7955_v55 }
 0x100   : > { %6475 = vmatprep.mubr.bf16.mxu1 %v7947_v53 }
 0x106   : > { %6420 = vmatmul.mubr.bf16.gmra.mxu0 %v7961_v56 }
 0x107   : > { %6476 = vmatmul.mubr.bf16.gmra.mxu1 %v7953_v54  ;;  %6423 = vmatprep.mubr.bf16.mxu0 %v7999_v9 }
 0x108   : > { %6479 = vmatprep.mubr.bf16.mxu1 %v7955_v55 }
 0x10e   : > { %6424 = vmatmul.mubr.bf16.gmra.mxu0 %v8005_v10 }
 0x10f   : > { %6480 = vmatmul.mubr.bf16.gmra.mxu1 %v7961_v56  ;;  %6499 = vmatprep.mubr.bf16.mxu0 %v7883_v14  ;;  %v7386_v14 = vld [vmem:[#allocation5 + $0x160] sm:$0xff]  }
 0x110   : > { %6555 = vmatprep.mubr.bf16.mxu1 %v7891_v22 }
 0x116   : > { %6500 = vmatmul.mubr.bf16.vlgmr.msra.gmra.mxu0 %v7889_v21 }
 0x117   : > { %6556 = vmatmul.mubr.bf16.vlgmr.msra.gmra.mxu1 %v7897_v24  ;;  %6596 = vmatpush3.bf16.msra.mxu0 %v7383_v7 }
 0x118   : > { %6503 = vmatprep.mubr.bf16.mxu0 %v7881_v13  ;;  %6559 = vmatprep.mubr.bf16.mxu1 %v7899_v27  ;;  %v7387_v13 = vld [vmem:[#allocation5 + $0x158] sm:$0xff]  }
 0x119   : > { %6597 = vmatprep.subr.bf16.mxu0 %v7384_v11  ;;  %6652 = vmatpush3.bf16.msra.mxu1 %v7388_v8 }
 0x11a   : > { %6653 = vmatprep.subr.bf16.mxu1 %v7390_v12 }
 0x11b   : > { %6598 = vmatpush3.bf16.msra.mxu0 %v7384_v11 }
 0x11c   : > { %6599 = vmatprep.subr.bf16.mxu0 %v7385_v15 }
 0x11d   : > { %6654 = vmatpush3.bf16.msra.mxu1 %v7390_v12 }
 0x11e   : > { %6504 = vmatmul.mubr.bf16.gmra.mxu0 %v7887_v20  ;;  %6655 = vmatprep.subr.bf16.mxu1 %v7391_v16 }
 0x11f   : > { %6560 = vmatmul.mubr.bf16.gmra.mxu1 %v7905_v31  ;;  %6507 = vmatprep.mubr.bf16.mxu0 %v7891_v22 }
 0x120   : > { %6563 = vmatprep.mubr.bf16.mxu1 %v7907_v34  ;;  %6600 = vmatpush3.bf16.msra.mxu0 %v7385_v15 }
 0x121   : > { %6601 = vmatprep.subr.bf16.mxu0 %v7386_v14  ;;  %6656 = vmatpush3.bf16.msra.mxu1 %v7391_v16 }
 0x122   : > { %6657 = vmatprep.subr.bf16.mxu1 %v7393_v17 }
 0x124   : > { %6602 = vmatpush3.bf16.msra.mxu0 %v7386_v14 }
 0x125   : > { %6603 = vmatprep.subr.bf16.mxu0 %v7387_v13  ;;  %6658 = vmatpush3.bf16.msra.mxu1 %v7393_v17 }
 0x126   : > { %6508 = vmatmul.mubr.bf16.gmra.mxu0 %v7897_v24  ;;  %6659 = vmatprep.subr.bf16.mxu1 %v7394_v18 }
 0x127   : > { %6564 = vmatmul.mubr.bf16.gmra.mxu1 %v7913_v37  ;;  %6511 = vmatprep.mubr.bf16.mxu0 %v7899_v27 }
 0x128   : > { %6567 = vmatprep.mubr.bf16.mxu1 %v7915_v40  ;;  %6604 = vmatpush3.bf16.msra.mxu0 %v7387_v13 }
 0x129   : > { %6605 = vmatprep.subr.bf16.mxu0 %v7389_v19  ;;  %6660 = vmatpush3.bf16.msra.mxu1 %v7394_v18 }
 0x12a   : > { %6661 = vmatprep.subr.bf16.mxu1 %v7395_v23 }
 0x12c   : > { %6606 = vmatpush3.bf16.msra.mxu0 %v7389_v19 }
 0x12d   : > { %6607 = vmatprep.subr.bf16.mxu0 %v7392_v25  ;;  %6662 = vmatpush3.bf16.msra.mxu1 %v7395_v23 }
 0x12e   : > { %6512 = vmatmul.mubr.bf16.gmra.mxu0 %v7905_v31  ;;  %6663 = vmatprep.subr.bf16.mxu1 %v7397_v26 }
 0x12f   : > { %6568 = vmatmul.mubr.bf16.gmra.mxu1 %v7921_v43  ;;  %6515 = vmatprep.mubr.bf16.mxu0 %v7907_v34 }
 0x130   : > { %6571 = vmatprep.mubr.bf16.mxu1 %v7923_v46  ;;  %6608 = vmatpush3.bf16.msra.mxu0 %v7392_v25 }
 0x131   : > { %6609 = vmatprep.subr.bf16.mxu0 %v7396_v28  ;;  %6664 = vmatpush3.bf16.msra.mxu1 %v7397_v26 }
 0x132   : > { %6665 = vmatprep.subr.bf16.mxu1 %v7398_v29 }
 0x134   : > { %6610 = vmatpush3.bf16.msra.mxu0 %v7396_v28 }
 0x135   : > { %6666 = vmatpush3.bf16.msra.mxu1 %v7398_v29  ;;  %6707 = vmatprep.subr.bf16.mxu0 %v8027_v30 }
 0x136   : > { %v6277_v32 = vpop.f32.mrf.mxu0  ;;  %6516 = vmatmul.mubr.bf16.gmra.mxu0 %v7913_v37 }
 0x137   : > { %v6333_v33 = vpop.f32.mrf.mxu1  ;;  %6572 = vmatmul.mubr.bf16.gmra.mxu1 %v7929_v48  ;;  %6519 = vmatprep.mubr.bf16.mxu0 %v7915_v40 }
 0x138   : > { %v8033_v35 = vadd.f32 %v6333_v33, %v6277_v32  ;;  %v548_v36 = vpop.f32.mrf.mxu0  ;;  %6575 = vmatprep.mubr.bf16.mxu1 %v7931_v49 }
 0x139   : > { %v791_v38 = vpop.f32.mrf.mxu1 }
 0x13a   : > { %v8036_v39 = vadd.f32 %v791_v38, %v548_v36  ;;  %v6278_v41 = vpop.f32.mrf.mxu0 }
 0x13b   : > { %v6334_v42 = vpop.f32.mrf.mxu1 }
 0x13c   : > { %v551_v44 = vpop.f32.mrf.mxu0 }
 0x13d   : > { %v794_v45 = vpop.f32.mrf.mxu1 }
 0x13e   : > { %v8038_v47 = vadd.f32 %v794_v45, %v551_v44  ;;  %v6281_v57 = vpop.f32.mrf.mxu0  ;;  %6520 = vmatmul.mubr.bf16.gmra.mxu0 %v7921_v43 }
 0x13f   : > { %v6337_v58 = vpop.f32.mrf.mxu1  ;;  %6576 = vmatmul.mubr.bf16.gmra.mxu1 %v7937_v50  ;;  %6523 = vmatprep.mubr.bf16.mxu0 %v7923_v46 }
 0x140   : > { %v8043_v59 = vadd.f32 %v6337_v58, %v6281_v57  ;;  %v563_v60 = vpop.f32.mrf.mxu0  ;;  %6579 = vmatprep.mubr.bf16.mxu1 %v7939_v51 }
 0x141   : > { %v806_v61 = vpop.f32.mrf.mxu1 }
 0x142   : > { %v8046_v62 = vadd.f32 %v806_v61, %v563_v60  ;;  %v6282_v63 = vpop.f32.mrf.mxu0 }
 0x143   : > { %v6338_v0 = vpop.f32.mrf.mxu1 }
 0x144   : > { %v566_v1 = vpop.f32.mrf.mxu0 }
 0x145   : > { %v809_v2 = vpop.f32.mrf.mxu1 }
 0x146   : > { %v8048_v3 = vadd.f32 %v809_v2, %v566_v1  ;;  %v6285_v4 = vpop.f32.mrf.mxu0  ;;  %6524 = vmatmul.mubr.bf16.gmra.mxu0 %v7929_v48 }
 0x147   : > { %v6341_v5 = vpop.f32.mrf.mxu1  ;;  %6580 = vmatmul.mubr.bf16.gmra.mxu1 %v7945_v52  ;;  %6527 = vmatprep.mubr.bf16.mxu0 %v7931_v49 }
 0x148   : > { %v8053_v6 = vadd.f32 %v6341_v5, %v6285_v4  ;;  %v578_v7 = vpop.f32.mrf.mxu0  ;;  %6583 = vmatprep.mubr.bf16.mxu1 %v7947_v53  ;;  %v7407_v4 = vld [vmem:[#allocation2 + $0x10] sm:$0xff]  }
 0x149   : > { %v821_v8 = vpop.f32.mrf.mxu1 }
 0x14a   : > { %v8056_v11 = vadd.f32 %v821_v8, %v578_v7  ;;  %v6286_v12 = vpop.f32.mrf.mxu0  ;;  %v7408_v8 = vld [vmem:[#allocation2] sm:$0xff]  }
 0x14b   : > { %v6342_v15 = vpop.f32.mrf.mxu1 }
 0x14c   : > { %v581_v16 = vpop.f32.mrf.mxu0 }
 0x14d   : > { %v824_v14 = vpop.f32.mrf.mxu1 }
 0x14e   : > { %v8058_v17 = vadd.f32 %v824_v14, %v581_v16  ;;  %v6289_v13 = vpop.f32.mrf.mxu0  ;;  %6528 = vmatmul.mubr.bf16.gmra.mxu0 %v7937_v50 }
 0x14f   : > { %v6345_v18 = vpop.f32.mrf.mxu1  ;;  %6584 = vmatmul.mubr.bf16.gmra.mxu1 %v7953_v54  ;;  %6531 = vmatprep.mubr.bf16.mxu0 %v7939_v51 }
 0x150   : > { %v8063_v19 = vadd.f32 %v6345_v18, %v6289_v13  ;;  %v593_v23 = vpop.f32.mrf.mxu0  ;;  %6587 = vmatprep.mubr.bf16.mxu1 %v7955_v55 }
 0x151   : > { %v836_v25 = vpop.f32.mrf.mxu1 }
 0x152   : > { %v8066_v26 = vadd.f32 %v836_v25, %v593_v23  ;;  %v6290_v28 = vpop.f32.mrf.mxu0  ;;  %v7400_v23 = vld [vmem:[#allocation5 + $0x230] sm:$0xff]  }
 0x153   : > { %v6346_v29 = vpop.f32.mrf.mxu1 }
 0x154   : > { %v596_v32 = vpop.f32.mrf.mxu0 }
 0x155   : > { %v839_v33 = vpop.f32.mrf.mxu1 }
 0x156   : > { %v8068_v36 = vadd.f32 %v839_v33, %v596_v32  ;;  %v6293_v38 = vpop.f32.mrf.mxu0  ;;  %6532 = vmatmul.mubr.bf16.gmra.mxu0 %v7945_v52  ;;  %v7401_v33 = vld [vmem:[#allocation5 + $0x228] sm:$0xff]  }
 0x157   : > { %v6349_v41 = vpop.f32.mrf.mxu1  ;;  %6588 = vmatmul.mubr.bf16.gmra.mxu1 %v7961_v56  ;;  %6535 = vmatprep.mubr.bf16.mxu0 %v7947_v53 }
 0x158   : > { %v8073_v42 = vadd.f32 %v6349_v41, %v6293_v38  ;;  %v608_v44 = vpop.f32.mrf.mxu0  ;;  %6591 = vmatprep.mubr.bf16.mxu1 %v7999_v9 }
 0x159   : > { %v851_v45 = vpop.f32.mrf.mxu1 }
 0x15a   : > { %v8076_v57 = vadd.f32 %v851_v45, %v608_v44  ;;  %v6294_v58 = vpop.f32.mrf.mxu0 }
 0x15b   : > { %v6350_v60 = vpop.f32.mrf.mxu1 }
 0x15c   : > { %v611_v61 = vpop.f32.mrf.mxu0 }
 0x15d   : > { %v854_v63 = vpop.f32.mrf.mxu1 }
 0x15e   : > { %v8078_v0 = vadd.f32 %v854_v63, %v611_v61  ;;  %v6297_v1 = vpop.f32.mrf.mxu0  ;;  %6536 = vmatmul.mubr.bf16.gmra.mxu0 %v7953_v54  ;;  %v7409_v63 = vld [vmem:[#allocation2 + $0x18] sm:$0xff]  }
 0x15f   : > { %v6353_v2 = vpop.f32.mrf.mxu1  ;;  %6592 = vmatmul.mubr.bf16.gmra.mxu1 %v8005_v10  ;;  %6611 = vmatprep.mubr.bf16.mxu0 %v7407_v4 }
 0x160   : > { %v8082_v5 = vadd.f32 %v6353_v2, %v6297_v1  ;;  %v623_v7 = vpop.f32.mrf.mxu0  ;;  %6667 = vmatprep.mubr.bf16.mxu1 %v7408_v8 }
 0x161   : > { %v866_v12 = vpop.f32.mrf.mxu1 }
 0x162   : > { %v8084_v15 = vadd.f32 %v866_v12, %v623_v7  ;;  %v6298_v16 = vpop.f32.mrf.mxu0  ;;  %v7403_v7 = vld [vmem:[#allocation5 + $0x218] sm:$0xff]  }
 0x163   : > { %v6354_v14 = vpop.f32.mrf.mxu1 }
 0x164   : > { %v626_v13 = vpop.f32.mrf.mxu0 }
 0x165   : > { %v869_v18 = vpop.f32.mrf.mxu1 }
 0x166   : > { %v8086_v25 = vadd.f32 %v869_v18, %v626_v13  ;;  %v6301_v28 = vpop.f32.mrf.mxu0  ;;  %6612 = vmatmul.mubr.bf16.vlgmr.msra.gmra.mxu0 %v7887_v20  ;;  %v7404_v18 = vld [vmem:[#allocation5 + $0x210] sm:$0xff]  }
 0x167   : > { %v6357_v10 = vpop.f32.mrf.mxu1  ;;  %6668 = vmatmul.mubr.bf16.vlgmr.msra.gmra.mxu1 %v7889_v21  ;;  %6708 = vmatpush3.bf16.msra.mxu0 %v8027_v30  ;;  %v7402_v21 = vld [vmem:[#allocation5 + $0x220] sm:$0xff]  }
 0x168   : > { %v8091_v29 = vadd.f32 %v6357_v10, %v6301_v28  ;;  %v638_v32 = vpop.f32.mrf.mxu0  ;;  %6615 = vmatprep.mubr.bf16.mxu0 %v7891_v22  ;;  %6671 = vmatprep.mubr.bf16.mxu1 %v7407_v4 }
 0x169   : > { %v881_v38 = vpop.f32.mrf.mxu1  ;;  %6709 = vmatprep.subr.bf16.mxu0 %v7400_v23 }
 0x16a   : > { %v8094_v41 = vadd.f32 %v881_v38, %v638_v32  ;;  %v6302_v44 = vpop.f32.mrf.mxu0  ;;  %v7405_v38 = vld [vmem:[#allocation5 + $0x208] sm:$0xff]  }
 0x16b   : > { %v6358_v45 = vpop.f32.mrf.mxu1  ;;  %6710 = vmatpush3.bf16.msra.mxu0 %v7400_v23 }
 0x16c   : > { %v641_v20 = vpop.f32.mrf.mxu0  ;;  %6711 = vmatprep.subr.bf16.mxu0 %v7401_v33 }
 0x16d   : > { %v884_v58 = vpop.f32.mrf.mxu1 }
 0x16e   : > { %v8096_v60 = vadd.f32 %v884_v58, %v641_v20  ;;  %v6305_v30 = vpop.f32.mrf.mxu0  ;;  %6616 = vmatmul.mubr.bf16.gmra.mxu0 %v7897_v24 }
 0x16f   : > { %v6361_v61 = vpop.f32.mrf.mxu1  ;;  %6672 = vmatmul.mubr.bf16.gmra.mxu1 %v7409_v63  ;;  %6619 = vmatprep.mubr.bf16.mxu0 %v7899_v27 }
 0x170   : > { %v8100_v1 = vadd.f32 %v6361_v61, %v6305_v30  ;;  %v653_v2 = vpop.f32.mrf.mxu0  ;;  %6675 = vmatprep.mubr.bf16.mxu1 %v7891_v22  ;;  %6712 = vmatpush3.bf16.msra.mxu0 %v7401_v33 }
 0x171   : > { %v896_v4 = vpop.f32.mrf.mxu1  ;;  %6713 = vmatprep.subr.bf16.mxu0 %v7402_v21 }
 0x172   : > { %v8103_v8 = vadd.f32 %v896_v4, %v653_v2  ;;  %v6306_v12 = vpop.f32.mrf.mxu0 }
 0x173   : > { %v6362_v16 = vpop.f32.mrf.mxu1 }
 0x174   : > { %v656_v14 = vpop.f32.mrf.mxu0  ;;  %6714 = vmatpush3.bf16.msra.mxu0 %v7402_v21 }
 0x175   : > { %v899_v13 = vpop.f32.mrf.mxu1  ;;  %6715 = vmatprep.subr.bf16.mxu0 %v7403_v7 }
 0x176   : > { %v8105_v23 = vadd.f32 %v899_v13, %v656_v14  ;;  %v6309_v28 = vpop.f32.mrf.mxu0  ;;  %6620 = vmatmul.mubr.bf16.gmra.mxu0 %v7905_v31 }
 0x177   : > { %v6365_v10 = vpop.f32.mrf.mxu1  ;;  %6676 = vmatmul.mubr.bf16.gmra.mxu1 %v7897_v24  ;;  %6623 = vmatprep.mubr.bf16.mxu0 %v7907_v34  ;;  %v7406_v24 = vld [vmem:[#allocation5 + $0x200] sm:$0xff]  }
 0x178   : > { %v8110_v22 = vadd.f32 %v6365_v10, %v6309_v28  ;;  %v668_v32 = vpop.f32.mrf.mxu0  ;;  %6679 = vmatprep.mubr.bf16.mxu1 %v7899_v27  ;;  %6716 = vmatpush3.bf16.msra.mxu0 %v7403_v7  ;;  %v1260_v28 = vlaneseq }
 0x179   : > { %v911_v33 = vpop.f32.mrf.mxu1  ;;  %6717 = vmatprep.subr.bf16.mxu0 %v7404_v18 }
 0x17a   : > { %v8113_v44 = vadd.f32 %v911_v33, %v668_v32  ;;  %v6310_v45 = vpop.f32.mrf.mxu0 }
 0x17b   : > { %v6366_v20 = vpop.f32.mrf.mxu1 }
 0x17c   : > { %v671_v58 = vpop.f32.mrf.mxu0  ;;  %6718 = vmatpush3.bf16.msra.mxu0 %v7404_v18  ;;  %v8135_v20 = vshrl.u32 %v1260_v28, 7 }
 0x17d   : > { %v914_v21 = vpop.f32.mrf.mxu1  ;;  %6719 = vmatprep.subr.bf16.mxu0 %v7405_v38 }
 0x17e   : > { %v8115_v30 = vadd.f32 %v914_v21, %v671_v58  ;;  %v6313_v61 = vpop.f32.mrf.mxu0  ;;  %6624 = vmatmul.mubr.bf16.gmra.mxu0 %v7913_v37  ;;  %vm1262_vm0 = vcmp.lt.s32.totalorder %v8135_v20, 1  ;;  %vm2841_vm1 = vcmp.lt.s32.totalorder %v8135_v20, 7 }
 0x17f   : > { %v6369_v63 = vpop.f32.mrf.mxu1  ;;  %6680 = vmatmul.mubr.bf16.gmra.mxu1 %v7905_v31  ;;  %6627 = vmatprep.mubr.bf16.mxu0 %v7915_v40 }
 0x180   : > { %v8120_v27 = vadd.f32 %v6369_v63, %v6313_v61  ;;  %v683_v2 = vpop.f32.mrf.mxu0  ;;  %6683 = vmatprep.mubr.bf16.mxu1 %v7907_v34  ;;  %6720 = vmatpush3.bf16.msra.mxu0 %v7405_v38 }
 0x181   : > { %v926_v4 = vpop.f32.mrf.mxu1  ;;  %6721 = vmatprep.subr.bf16.mxu0 %v7406_v24 }
 0x182   : > { %v8123_v7 = vadd.f32 %v926_v4, %v683_v2  ;;  %v6314_v12 = vpop.f32.mrf.mxu0 }
 0x183   : > { %v6370_v16 = vpop.f32.mrf.mxu1 }
 0x184   : > { %v686_v14 = vpop.f32.mrf.mxu0  ;;  %6722 = vmatpush3.bf16.msra.mxu0 %v7406_v24 }
 0x185   : > { %v929_v13 = vpop.f32.mrf.mxu1 }
 0x186   : > { %v8125_v18 = vadd.f32 %v929_v13, %v686_v14  ;;  %v6389_v31 = vpop.f32.mrf.mxu0  ;;  %6628 = vmatmul.mubr.bf16.gmra.mxu0 %v7921_v43 }
 0x187   : > { %v1202_v10 = vadd.f32 %v6389_v31, %v8033_v35  ;;  %v8129_v32 = vpop.f32.mrf.mxu1  ;;  %6684 = vmatmul.mubr.bf16.gmra.mxu1 %v7913_v37  ;;  %6631 = vmatprep.mubr.bf16.mxu0 %v7923_v46 }
 0x188   : > { %v1051_v34 = vpop.f32.mrf.mxu0  ;;  %6687 = vmatprep.mubr.bf16.mxu1 %v7915_v40 }
 0x189   : > { %v1200_v33 = vadd.f32 %v1051_v34, %v8036_v39  ;;  %v1399_v38 = vpop.f32.mrf.mxu1  ;;  %v1232_v37 = vrot.slane %v1202_v10, 7 }
 0x18a   : > { %v6390_v45 = vpop.f32.mrf.mxu0 }
 0x18b   : > { %v6446_v58 = vpop.f32.mrf.mxu1  ;;  %v1230_v63 = vrot.slane %v1200_v33, 7 }
 0x18c   : > { %v1054_v21 = vpop.f32.mrf.mxu0 }
 0x18d   : > { %v1201_v24 = vadd.f32 %v1054_v21, %v8038_v47  ;;  %v8138_v35 = vpop.f32.mrf.mxu1 }
 0x18e   : > { %v6393_v61 = vpop.f32.mrf.mxu0  ;;  %6632 = vmatmul.mubr.bf16.gmra.mxu0 %v7929_v48 }
 0x18f   : > { %v1231_v40 = vrot.slane %v1201_v24, 7  ;;  %v1205_v39 = vadd.f32 %v6393_v61, %v8043_v59  ;;  %v8143_v2 = vpop.f32.mrf.mxu1  ;;  %6688 = vmatmul.mubr.bf16.gmra.mxu1 %v7921_v43  ;;  %6635 = vmatprep.mubr.bf16.mxu0 %v7931_v49 }
 0x190   : > { %v1066_v4 = vpop.f32.mrf.mxu0  ;;  %6691 = vmatprep.mubr.bf16.mxu1 %v7923_v46 }
 0x191   : > { %v1203_v47 = vadd.f32 %v1066_v4, %v8046_v62  ;;  %v1413_v12 = vpop.f32.mrf.mxu1  ;;  %v8151_v16 = vsel %vm1262_vm0, %v1231_v40, %v1232_v37  ;;  %v8155_v14 = vsel %vm1262_vm0, %v1230_v63, %v1231_v40  ;;  %v1235_v46 = vrot.slane %v1205_v39, 7 }
 0x192   : > { %v6394_v59 = vpop.f32.mrf.mxu0 }
 0x193   : > { %v6450_v13 = vpop.f32.mrf.mxu1  ;;  %v1233_v62 = vrot.slane %v1203_v47, 7 }
 0x194   : > { %v1069_v31 = vpop.f32.mrf.mxu0 }
 0x195   : > { %v1204_v43 = vadd.f32 %v1069_v31, %v8048_v3  ;;  %v8158_v28 = vpop.f32.mrf.mxu1 }
 0x196   : > { %v6397_v10 = vpop.f32.mrf.mxu0  ;;  %6636 = vmatmul.mubr.bf16.gmra.mxu0 %v7937_v50 }
 0x197   : > { %v1234_v34 = vrot.slane %v1204_v43, 7  ;;  %v1208_v33 = vadd.f32 %v6397_v10, %v8053_v6  ;;  %v8162_v38 = vpop.f32.mrf.mxu1  ;;  %6692 = vmatmul.mubr.bf16.gmra.mxu1 %v7929_v48  ;;  %6639 = vmatprep.mubr.bf16.mxu0 %v7939_v51 }
 0x198   : > { %v1081_v45 = vpop.f32.mrf.mxu0  ;;  %6695 = vmatprep.mubr.bf16.mxu1 %v7931_v49 }
 0x199   : > { %v1206_v3 = vadd.f32 %v1081_v45, %v8056_v11  ;;  %v1427_v58 = vpop.f32.mrf.mxu1  ;;  %v8170_v21 = vsel %vm1262_vm0, %v1234_v34, %v1235_v46  ;;  %v8174_v24 = vsel %vm1262_vm0, %v1233_v62, %v1234_v34  ;;  %v1238_v49 = vrot.slane %v1208_v33, 7 }
 0x19a   : > { %v6398_v6 = vpop.f32.mrf.mxu0 }
 0x19b   : > { %v6454_v61 = vpop.f32.mrf.mxu1  ;;  %v1236_v11 = vrot.slane %v1206_v3, 7 }
 0x19c   : > { %v1084_v37 = vpop.f32.mrf.mxu0 }
 0x19d   : > { %v1207_v48 = vadd.f32 %v1084_v37, %v8058_v17  ;;  %v8177_v63 = vpop.f32.mrf.mxu1 }
 0x19e   : > { %v6401_v40 = vpop.f32.mrf.mxu0  ;;  %6640 = vmatmul.mubr.bf16.gmra.mxu0 %v7945_v52 }
 0x19f   : > { %v1237_v39 = vrot.slane %v1207_v48, 7  ;;  %v1211_v4 = vadd.f32 %v6401_v40, %v8063_v19  ;;  %v8181_v47 = vpop.f32.mrf.mxu1  ;;  %6696 = vmatmul.mubr.bf16.gmra.mxu1 %v7937_v50  ;;  %6643 = vmatprep.mubr.bf16.mxu0 %v7947_v53 }
 0x1a0   : > { %v1096_v12 = vpop.f32.mrf.mxu0  ;;  %6699 = vmatprep.mubr.bf16.mxu1 %v7939_v51 }
 0x1a1   : > { %v1209_v17 = vadd.f32 %v1096_v12, %v8066_v26  ;;  %v1441_v59 = vpop.f32.mrf.mxu1  ;;  %v8189_v13 = vsel %vm1262_vm0, %v1237_v39, %v1238_v49  ;;  %v8193_v31 = vsel %vm1262_vm0, %v1236_v11, %v1237_v39  ;;  %v1241_v51 = vrot.slane %v1211_v4, 7  ;;  %v7410_v4 = vld [vmem:[#allocation2 + $0x20] sm:$0xff]  }
 0x1a2   : > { %v6402_v19 = vpop.f32.mrf.mxu0 }
 0x1a3   : > { %v6458_v43 = vpop.f32.mrf.mxu1  ;;  %v1239_v26 = vrot.slane %v1209_v17, 7 }
 0x1a4   : > { %v1099_v10 = vpop.f32.mrf.mxu0 }
 0x1a5   : > { %v1210_v50 = vadd.f32 %v1099_v10, %v8068_v36  ;;  %v8196_v46 = vpop.f32.mrf.mxu1 }
 0x1a6   : > { %v6405_v62 = vpop.f32.mrf.mxu0  ;;  %6644 = vmatmul.mubr.bf16.gmra.mxu0 %v7953_v54 }
 0x1a7   : > { %v1240_v34 = vrot.slane %v1210_v50, 7  ;;  %v1214_v33 = vadd.f32 %v6405_v62, %v8073_v42  ;;  %v8200_v45 = vpop.f32.mrf.mxu1  ;;  %6700 = vmatmul.mubr.bf16.gmra.mxu1 %v7945_v52  ;;  %6647 = vmatprep.mubr.bf16.mxu0 %v7955_v55  ;;  %v7411_v62 = vld [vmem:[#allocation2 + $0x28] sm:$0xff]  }
 0x1a8   : > { %v1111_v3 = vpop.f32.mrf.mxu0  ;;  %6703 = vmatprep.mubr.bf16.mxu1 %v7947_v53 }
 0x1a9   : > { %v1212_v36 = vadd.f32 %v1111_v3, %v8076_v57  ;;  %v1455_v58 = vpop.f32.mrf.mxu1  ;;  %v8208_v6 = vsel %vm1262_vm0, %v1240_v34, %v1241_v51  ;;  %v8212_v61 = vsel %vm1262_vm0, %v1239_v26, %v1240_v34  ;;  %v1244_v53 = vrot.slane %v1214_v33, 7  ;;  %v7412_v3 = vld [vmem:[#allocation2 + $0x30] sm:$0xff]  }
 0x1aa   : > { %v6406_v42 = vpop.f32.mrf.mxu0 }
 0x1ab   : > { %v6462_v37 = vpop.f32.mrf.mxu1  ;;  %v1242_v57 = vrot.slane %v1212_v36, 7 }
 0x1ac   : > { %v1114_v48 = vpop.f32.mrf.mxu0 }
 0x1ad   : > { %v1213_v52 = vadd.f32 %v1114_v48, %v8078_v0  ;;  %v8215_v55 = vpop.f32.mrf.mxu1 }
 0x1ae   : > { %v6409_v40 = vpop.f32.mrf.mxu0  ;;  %6648 = vmatmul.mubr.bf16.gmra.mxu0 %v7961_v56 }
 0x1af   : > { %v1243_v49 = vrot.slane %v1213_v52, 7  ;;  %v1217_v11 = vadd.f32 %v6409_v40, %v8082_v5  ;;  %v8219_v39 = vpop.f32.mrf.mxu1  ;;  %6704 = vmatmul.mubr.bf16.gmra.mxu1 %v7953_v54  ;;  %6723 = vmatprep.mubr.bf16.mxu0 %v7410_v4 }
 0x1b0   : > { %v1126_v12 = vpop.f32.mrf.mxu0 }
 0x1b1   : > { %v1215_v17 = vadd.f32 %v1126_v12, %v8084_v15  ;;  %v1469_v0 = vpop.f32.mrf.mxu1  ;;  %v8225_v59 = vsel %vm1262_vm0, %v1243_v49, %v1244_v53  ;;  %v8229_v56 = vsel %vm1262_vm0, %v1242_v57, %v1243_v49  ;;  %v1247_v15 = vrot.slane %v1217_v11, 7  ;;  %v7413_v49 = vld [vmem:[#allocation2 + $0x38] sm:$0xff]  }
 0x1b2   : > { %v6410_v19 = vpop.f32.mrf.mxu0  ;;  %v7414_v0 = vld [vmem:[#allocation2 + $0x40] sm:$0xff]  }
 0x1b3   : > { %v6466_v5 = vpop.f32.mrf.mxu1  ;;  %v1245_v51 = vrot.slane %v1215_v17, 7 }
 0x1b4   : > { %v1129_v43 = vpop.f32.mrf.mxu0 }
 0x1b5   : > { %v1216_v10 = vadd.f32 %v1129_v43, %v8086_v25  ;;  %v8232_v54 = vpop.f32.mrf.mxu1 }
 0x1b6   : > { %v6413_v50 = vpop.f32.mrf.mxu0  ;;  %6724 = vmatmul.mubr.bf16.vlgmr.msra.gmra.mxu0 %v7411_v62 }
 0x1b7   : > { %v1246_v26 = vrot.slane %v1216_v10, 7  ;;  %v1220_v34 = vadd.f32 %v6413_v50, %v8091_v29  ;;  %v8235_v33 = vpop.f32.mrf.mxu1  ;;  %6727 = vmatprep.mubr.bf16.mxu0 %v7412_v3 }
 0x1b8   : > { %v1141_v36 = vpop.f32.mrf.mxu0 }
 0x1b9   : > { %v1218_v58 = vadd.f32 %v1141_v36, %v8094_v41  ;;  %v1483_v42 = vpop.f32.mrf.mxu1  ;;  %v8240_v25 = vsel %vm1262_vm0, %v1246_v26, %v1247_v15  ;;  %v8244_v37 = vsel %vm1262_vm0, %v1245_v51, %v1246_v26  ;;  %v1250_v41 = vrot.slane %v1220_v34, 7  ;;  %v7415_v34 = vld [vmem:[#allocation2 + $0x48] sm:$0xff]  }
 0x1ba   : > { %v6414_v48 = vpop.f32.mrf.mxu0 }
 0x1bb   : > { %v6470_v52 = vpop.f32.mrf.mxu1  ;;  %v1248_v11 = vrot.slane %v1218_v58, 7  ;;  %v7416_v48 = vld [vmem:[#allocation2 + $0x50] sm:$0xff]  }
 0x1bc   : > { %v1144_v40 = vpop.f32.mrf.mxu0 }
 0x1bd   : > { %v1219_v29 = vadd.f32 %v1144_v40, %v8096_v60  ;;  %v8247_v53 = vpop.f32.mrf.mxu1 }
 0x1be   : > { %v6417_v57 = vpop.f32.mrf.mxu0  ;;  %6728 = vmatmul.mubr.bf16.gmra.mxu0 %v7413_v49 }
 0x1bf   : > { %v1249_v4 = vrot.slane %v1219_v29, 7  ;;  %v1223_v12 = vadd.f32 %v6417_v57, %v8100_v1  ;;  %v8250_v17 = vpop.f32.mrf.mxu1  ;;  %6731 = vmatprep.mubr.bf16.mxu0 %v7414_v0  ;;  %v7417_v0 = vld [vmem:[#allocation2 + $0x58] sm:$0xff]  }
 0x1c0   : > { %v1156_v19 = vpop.f32.mrf.mxu0 }
 0x1c1   : > { %v1221_v5 = vadd.f32 %v1156_v19, %v8103_v8  ;;  %v1497_v43 = vpop.f32.mrf.mxu1  ;;  %v8255_v60 = vsel %vm1262_vm0, %v1249_v4, %v1250_v41  ;;  %v8259_v10 = vsel %vm1262_vm0, %v1248_v11, %v1249_v4  ;;  %v1253_v8 = vrot.slane %v1223_v12, 7 }
 0x1c2   : > { %v6418_v50 = vpop.f32.mrf.mxu0 }
 0x1c3   : > { %v6474_v62 = vpop.f32.mrf.mxu1  ;;  %v1251_v3 = vrot.slane %v1221_v5, 7 }
 0x1c4   : > { %v1159_v15 = vpop.f32.mrf.mxu0  ;;  %v7418_v62 = vld [vmem:[#allocation2 + $0x60] sm:$0xff]  }
 0x1c5   : > { %v1222_v1 = vadd.f32 %v1159_v15, %v8105_v23  ;;  %v8262_v51 = vpop.f32.mrf.mxu1 }
 0x1c6   : > { %v6421_v26 = vpop.f32.mrf.mxu0  ;;  %6732 = vmatmul.mubr.bf16.gmra.mxu0 %v7415_v34 }
 0x1c7   : > { %v1252_v36 = vrot.slane %v1222_v1, 7  ;;  %v1226_v58 = vadd.f32 %v6421_v26, %v8110_v22  ;;  %v8265_v42 = vpop.f32.mrf.mxu1  ;;  %6735 = vmatprep.mubr.bf16.mxu0 %v7416_v48 }
 0x1c8   : > { %v1171_v52 = vpop.f32.mrf.mxu0 }
 0x1c9   : > { %v1224_v40 = vadd.f32 %v1171_v52, %v8113_v44  ;;  %v1511_v29 = vpop.f32.mrf.mxu1  ;;  %v8270_v23 = vsel %vm1262_vm0, %v1252_v36, %v1253_v8  ;;  %v8274_v57 = vsel %vm1262_vm0, %v1251_v3, %v1252_v36  ;;  %v1256_v44 = vrot.slane %v1226_v58, 7  ;;  %v7419_v52 = vld [vmem:[#allocation2 + $0x68] sm:$0xff]  }
 0x1ca   : > { %v6422_v49 = vpop.f32.mrf.mxu0 }
 0x1cb   : > { %v6478_v41 = vpop.f32.mrf.mxu1  ;;  %v1254_v19 = vrot.slane %v1224_v40, 7 }
 0x1cc   : > { %v1174_v11 = vpop.f32.mrf.mxu0 }
 0x1cd   : > { %v1225_v22 = vadd.f32 %v1174_v11, %v8115_v30  ;;  %v8277_v4 = vpop.f32.mrf.mxu1  ;;  %v7420_v11 = vld [vmem:[#allocation2 + $0x70] sm:$0xff]  }
 0x1ce   : > { %v6425_v12 = vpop.f32.mrf.mxu0  ;;  %6736 = vmatmul.mubr.bf16.gmra.mxu0 %v7417_v0 }
 0x1cf   : > { %v1255_v5 = vrot.slane %v1225_v22, 7  ;;  %v1229_v43 = vadd.f32 %v6425_v12, %v8120_v27  ;;  %v8280_v50 = vpop.f32.mrf.mxu1  ;;  %6739 = vmatprep.mubr.bf16.mxu0 %v7418_v62 }
 0x1d0   : > { %v1186_v15 = vpop.f32.mrf.mxu0 }
 0x1d1   : > { %v1227_v1 = vadd.f32 %v1186_v15, %v8123_v7  ;;  %v1525_v26 = vpop.f32.mrf.mxu1  ;;  %v8285_v30 = vsel %vm1262_vm0, %v1255_v5, %v1256_v44  ;;  %v8289_v34 = vsel %vm1262_vm0, %v1254_v19, %v1255_v5  ;;  %v1259_v7 = vrot.slane %v1229_v43, 7 }
 0x1d2   : > { %v6426_v8 = vpop.f32.mrf.mxu0  ;;  %v7421_v26 = vld [vmem:[#allocation2 + $0x78] sm:$0xff]  }
 0x1d3   : > { %v6482_v3 = vpop.f32.mrf.mxu1  ;;  %v1257_v40 = vrot.slane %v1227_v1, 7 }
 0x1d4   : > { %v1189_v36 = vpop.f32.mrf.mxu0 }
 0x1d5   : > { %v1228_v27 = vadd.f32 %v1189_v36, %v8125_v18  ;;  %v8292_v58 = vpop.f32.mrf.mxu1 }
 0x1d6   : > { %v6501_v48 = vpop.f32.mrf.mxu0  ;;  %6740 = vmatmul.mubr.bf16.gmra.mxu0 %v7419_v52 }
 0x1d7   : > { %v1258_v29 = vrot.slane %v1228_v27, 7  ;;  %v1628_v49 = vadd.f32 %v6501_v48, %v8129_v32  ;;  %v6557_v41 = vpop.f32.mrf.mxu1  ;;  %6743 = vmatprep.mubr.bf16.mxu0 %v7420_v11  ;;  %v7422_v27 = vld [vmem:[#allocation2 + $0x80] sm:$0xff]  }
 0x1d8   : > { %v1620_v22 = vpop.f32.mrf.mxu0 }
 0x1d9   : > { %v1998_v12 = vadd.f32 %v6557_v41, %v1628_v49  ;;  %v1858_v0 = vpop.f32.mrf.mxu1  ;;  %v8297_v44 = vsel %vm1262_vm0, %v1258_v29, %v1259_v7  ;;  %v8301_v18 = vsel %vm1262_vm0, %v1257_v40, %v1258_v29 }
 0x1da   : > { %v6502_v19 = vpop.f32.mrf.mxu0 }
 0x1db   : > { %v8304_v5 = vadd.f32 %v1998_v12, %v8151_v16  ;;  %v6558_v43 = vpop.f32.mrf.mxu1 }
 0x1dc   : > { %v1622_v32 = vpop.f32.mrf.mxu0 }
 0x1dd   : > { %v1623_v62 = vadd.f32 %v1622_v32, %v8138_v35  ;;  %v1860_v15 = vpop.f32.mrf.mxu1 }
 0x1de   : > { %v6505_v1 = vpop.f32.mrf.mxu0  ;;  %6744 = vmatmul.mubr.bf16.gmra.mxu0 %v7421_v26 }
 0x1df   : > { %v1997_v8 = vadd.f32 %v1860_v15, %v1623_v62  ;;  %v1642_v3 = vadd.f32 %v6505_v1, %v8143_v2  ;;  %v6561_v36 = vpop.f32.mrf.mxu1  ;;  %6747 = vmatprep.mubr.bf16.mxu0 %v7422_v27  ;;  %v7423_v2 = vld [vmem:[#allocation2 + $0x88] sm:$0xff]  }
 0x1e0   : > { %v1634_v48 = vpop.f32.mrf.mxu0 }
 0x1e1   : > { %v8309_v52 = vadd.f32 %v1997_v8, %v8155_v14  ;;  %v2000_v16 = vadd.f32 %v6561_v36, %v1642_v3  ;;  %v1872_v7 = vpop.f32.mrf.mxu1  ;;  %v7424_v14 = vld [vmem:[#allocation2 + $0x90] sm:$0xff]  }
 0x1e2   : > { %v6506_v40 = vpop.f32.mrf.mxu0 }
 0x1e3   : > { %v8312_v29 = vadd.f32 %v2000_v16, %v8170_v21  ;;  %v6562_v35 = vpop.f32.mrf.mxu1 }
 0x1e4   : > { %v1636_v49 = vpop.f32.mrf.mxu0 }
 0x1e5   : > { %v1637_v41 = vadd.f32 %v1636_v49, %v8158_v28  ;;  %v1874_v11 = vpop.f32.mrf.mxu1 }
 0x1e6   : > { %v6509_v22 = vpop.f32.mrf.mxu0  ;;  %6748 = vmatmul.mubr.bf16.gmra.mxu0 %v7423_v2 }
 0x1e7   : > { %v1999_v12 = vadd.f32 %v1874_v11, %v1637_v41  ;;  %v1656_v0 = vadd.f32 %v6509_v22, %v8162_v38  ;;  %v6565_v19 = vpop.f32.mrf.mxu1  ;;  %6751 = vmatprep.mubr.bf16.mxu0 %v7424_v14  ;;  %v7425_v38 = vld [vmem:[#allocation2 + $0x98] sm:$0xff]  }
 0x1e8   : > { %v1648_v43 = vpop.f32.mrf.mxu0 }
 0x1e9   : > { %v8317_v32 = vadd.f32 %v1999_v12, %v8174_v24  ;;  %v2002_v21 = vadd.f32 %v6565_v19, %v1656_v0  ;;  %v1886_v62 = vpop.f32.mrf.mxu1  ;;  %v7426_v24 = vld [vmem:[#allocation2 + $0xa0] sm:$0xff]  }
 0x1ea   : > { %v6510_v15 = vpop.f32.mrf.mxu0 }
 0x1eb   : > { %v8320_v1 = vadd.f32 %v2002_v21, %v8189_v13  ;;  %v6566_v28 = vpop.f32.mrf.mxu1 }
 0x1ec   : > { %v1650_v26 = vpop.f32.mrf.mxu0 }
 0x1ed   : > { %v1651_v8 = vadd.f32 %v1650_v26, %v8177_v63  ;;  %v1888_v3 = vpop.f32.mrf.mxu1 }
 0x1ee   : > { %v6513_v36 = vpop.f32.mrf.mxu0  ;;  %6752 = vmatmul.mubr.bf16.gmra.mxu0 %v7425_v38 }
 0x1ef   : > { %v2001_v27 = vadd.f32 %v1888_v3, %v1651_v8  ;;  %v1670_v48 = vadd.f32 %v6513_v36, %v8181_v47  ;;  %v6569_v16 = vpop.f32.mrf.mxu1  ;;  %6755 = vmatprep.mubr.bf16.mxu0 %v7426_v24  ;;  %v7427_v47 = vld [vmem:[#allocation2 + $0xa8] sm:$0xff]  }
 0x1f0   : > { %v1662_v7 = vpop.f32.mrf.mxu0 }
 0x1f1   : > { %v8325_v40 = vadd.f32 %v2001_v27, %v8193_v31  ;;  %v2004_v13 = vadd.f32 %v6569_v16, %v1670_v48  ;;  %v1900_v35 = vpop.f32.mrf.mxu1 }
 0x1f2   : > { %v6514_v49 = vpop.f32.mrf.mxu0 }
 0x1f3   : > { %v8328_v41 = vadd.f32 %v2004_v13, %v8208_v6  ;;  %v6570_v63 = vpop.f32.mrf.mxu1 }
 0x1f4   : > { %v1664_v11 = vpop.f32.mrf.mxu0 }
 0x1f5   : > { %v1665_v22 = vadd.f32 %v1664_v11, %v8196_v46  ;;  %v1902_v2 = vpop.f32.mrf.mxu1 }
 0x1f6   : > { %v6517_v12 = vpop.f32.mrf.mxu0  ;;  %6756 = vmatmul.mubr.bf16.gmra.mxu0 %v7427_v47 }
 0x1f7   : > { %v2003_v0 = vadd.f32 %v1902_v2, %v1665_v22  ;;  %v1684_v19 = vadd.f32 %v6517_v12, %v8200_v45  ;;  %v6573_v14 = vpop.f32.mrf.mxu1  ;;  %6759 = vmatprep.mubr.bf16.mxu0 %v7999_v9  ;;  %v7428_v45 = vld [vmem:[#allocation2 + $0xb8] sm:$0xff]  }
 0x1f8   : > { %v1676_v31 = vpop.f32.mrf.mxu0 }
 0x1f9   : > { %v8334_v43 = vadd.f32 %v2003_v0, %v8212_v61  ;;  %v2006_v6 = vadd.f32 %v6573_v14, %v1684_v19  ;;  %v1914_v21 = vpop.f32.mrf.mxu1 }
 0x1fa   : > { %v6518_v62 = vpop.f32.mrf.mxu0 }
 0x1fb   : > { %v8337_v15 = vadd.f32 %v2006_v6, %v8225_v59  ;;  %v6574_v46 = vpop.f32.mrf.mxu1 }
 0x1fc   : > { %v1678_v28 = vpop.f32.mrf.mxu0 }
 0x1fd   : > { %v1679_v26 = vadd.f32 %v1678_v28, %v8215_v55  ;;  %v1916_v8 = vpop.f32.mrf.mxu1 }
 0x1fe   : > { %v6521_v3 = vpop.f32.mrf.mxu0  ;;  %6760 = vmatmul.mubr.bf16.gmra.mxu0 %v7428_v45 }
 0x1ff   : > { %v2005_v36 = vadd.f32 %v1916_v8, %v1679_v26  ;;  %v1698_v9 = vadd.f32 %v6521_v3, %v8219_v39  ;;  %v6577_v38 = vpop.f32.mrf.mxu1 }
 0x200   : > { %v1690_v61 = vpop.f32.mrf.mxu0 }
 0x201   : > { %v8342_v27 = vadd.f32 %v2005_v36, %v8229_v56  ;;  %v2008_v48 = vadd.f32 %v6577_v38, %v1698_v9  ;;  %v1928_v16 = vpop.f32.mrf.mxu1 }
 0x202   : > { %v6522_v59 = vpop.f32.mrf.mxu0 }
 0x203   : > { %v8345_v24 = vadd.f32 %v2008_v48, %v8240_v25  ;;  %v6578_v7 = vpop.f32.mrf.mxu1 }
 0x204   : > { %v1692_v55 = vpop.f32.mrf.mxu0 }
 0x205   : > { %v1693_v13 = vadd.f32 %v1692_v55, %v8232_v54  ;;  %v1930_v35 = vpop.f32.mrf.mxu1 }
 0x206   : > { %v6525_v49 = vpop.f32.mrf.mxu0 }
 0x207   : > { %v2007_v63 = vadd.f32 %v1930_v35, %v1693_v13  ;;  %v1712_v39 = vadd.f32 %v6525_v49, %v8235_v33  ;;  %v6581_v11 = vpop.f32.mrf.mxu1 }
 0x208   : > { %v1704_v22 = vpop.f32.mrf.mxu0 }
 0x209   : > { %v8350_v56 = vadd.f32 %v2007_v63, %v8244_v37  ;;  %v2010_v2 = vadd.f32 %v6581_v11, %v1712_v39  ;;  %v1942_v12 = vpop.f32.mrf.mxu1 }
 0x20a   : > { %v6526_v47 = vpop.f32.mrf.mxu0 }
 0x20b   : > { %v8353_v25 = vadd.f32 %v2010_v2, %v8255_v60  ;;  %v6582_v0 = vpop.f32.mrf.mxu1 }
 0x20c   : > { %v1706_v19 = vpop.f32.mrf.mxu0 }
 0x20d   : > { %v1707_v54 = vadd.f32 %v1706_v19, %v8247_v53  ;;  %v1944_v14 = vpop.f32.mrf.mxu1 }
 0x20e   : > { %v6529_v31 = vpop.f32.mrf.mxu0 }
 0x20f   : > { %v2009_v6 = vadd.f32 %v1944_v14, %v1707_v54  ;;  %v1726_v33 = vadd.f32 %v6529_v31, %v8250_v17  ;;  %v6585_v21 = vpop.f32.mrf.mxu1 }
 0x210   : > { %v1718_v62 = vpop.f32.mrf.mxu0 }
 0x211   : > { %v8358_v37 = vadd.f32 %v2009_v6, %v8259_v10  ;;  %v2012_v46 = vadd.f32 %v6585_v21, %v1726_v33  ;;  %v1956_v28 = vpop.f32.mrf.mxu1 }
 0x212   : > { %v6530_v26 = vpop.f32.mrf.mxu0 }
 0x213   : > { %v8361_v60 = vadd.f32 %v2012_v46, %v8270_v23  ;;  %v6586_v8 = vpop.f32.mrf.mxu1 }
 0x214   : > { %v1720_v3 = vpop.f32.mrf.mxu0 }
 0x215   : > { %v1721_v53 = vadd.f32 %v1720_v3, %v8262_v51  ;;  %v1958_v45 = vpop.f32.mrf.mxu1 }
 0x216   : > { %v6533_v36 = vpop.f32.mrf.mxu0 }
 0x217   : > { %v2011_v9 = vadd.f32 %v1958_v45, %v1721_v53  ;;  %v1740_v17 = vadd.f32 %v6533_v36, %v8265_v42  ;;  %v6589_v38 = vpop.f32.mrf.mxu1 }
 0x218   : > { %v1732_v61 = vpop.f32.mrf.mxu0 }
 0x219   : > { %v8366_v10 = vadd.f32 %v2011_v9, %v8274_v57  ;;  %v2014_v48 = vadd.f32 %v6589_v38, %v1740_v17  ;;  %v1970_v16 = vpop.f32.mrf.mxu1 }
 0x21a   : > { %v6534_v59 = vpop.f32.mrf.mxu0 }
 0x21b   : > { %v8369_v23 = vadd.f32 %v2014_v48, %v8285_v30  ;;  %v6590_v7 = vpop.f32.mrf.mxu1 }
 0x21c   : > { %v1734_v55 = vpop.f32.mrf.mxu0 }
 0x21d   : > { %v1735_v51 = vadd.f32 %v1734_v55, %v8277_v4  ;;  %v1972_v13 = vpop.f32.mrf.mxu1 }
 0x21e   : > { %v6537_v35 = vpop.f32.mrf.mxu0 }
 0x21f   : > { %v2013_v49 = vadd.f32 %v1972_v13, %v1735_v51  ;;  %v1754_v42 = vadd.f32 %v6537_v35, %v8280_v50  ;;  %v6593_v63 = vpop.f32.mrf.mxu1 }
 0x220   : > { %v1746_v39 = vpop.f32.mrf.mxu0 }
 0x221   : > { %v8374_v57 = vadd.f32 %v2013_v49, %v8289_v34  ;;  %v2016_v11 = vadd.f32 %v6593_v63, %v1754_v42  ;;  %v1984_v22 = vpop.f32.mrf.mxu1 }
 0x222   : > { %v6538_v2 = vpop.f32.mrf.mxu0 }
 0x223   : > { %v8377_v30 = vadd.f32 %v2016_v11, %v8297_v44  ;;  %v6594_v12 = vpop.f32.mrf.mxu1 }
 0x224   : > { %v1748_v47 = vpop.f32.mrf.mxu0 }
 0x225   : > { %9417 = vst [vmem:[#allocation21_spill] sm:$0xff] %v8377_v30  ;;  %v1749_v4 = vadd.f32 %v1748_v47, %v8292_v58  ;;  %v1986_v0 = vpop.f32.mrf.mxu1 }
 0x226   : > { %v6613_v19 = vpop.f32.mrf.mxu0 }
 0x227   : > { %v2015_v54 = vadd.f32 %v1986_v0, %v1749_v4  ;;  %v6669_v14 = vpop.f32.mrf.mxu1 }
 0x228   : > { %v8380_v50 = vadd.f32 %v6669_v14, %v6613_v19  ;;  %v2153_v31 = vpop.f32.mrf.mxu0 }
 0x229   : > { %v8383_v34 = vadd.f32 %v2015_v54, %v8301_v18  ;;  %v2384_v6 = vpop.f32.mrf.mxu1 }
 0x22a   : > { %v6614_v33 = vpop.f32.mrf.mxu0 }
 0x22b   : > { %9418 = vst [vmem:[#allocation22_spill] sm:$0xff] %v8383_v34  ;;  %v6670_v21 = vpop.f32.mrf.mxu1 }
 0x22c   : > { %v8385_v62 = vadd.f32 %v6670_v21, %v6614_v33  ;;  %v2155_v44 = vpop.f32.mrf.mxu0 }
 0x22d   : > { %v2386_v46 = vpop.f32.mrf.mxu1 }
 0x22e   : > { %v8387_v28 = vadd.f32 %v2386_v46, %v2155_v44  ;;  %v6617_v58 = vpop.f32.mrf.mxu0 }
 0x22f   : > { %v6673_v26 = vpop.f32.mrf.mxu1 }
 0x230   : > { %v8389_v8 = vadd.f32 %v6673_v26, %v6617_v58  ;;  %v2168_v3 = vpop.f32.mrf.mxu0 }
 0x231   : > { %v2399_v53 = vpop.f32.mrf.mxu1 }
 0x232   : > { %v6618_v45 = vpop.f32.mrf.mxu0 }
 0x233   : > { %v6674_v36 = vpop.f32.mrf.mxu1 }
 0x234   : > { %v8391_v9 = vadd.f32 %v6674_v36, %v6618_v45  ;;  %v2170_v18 = vpop.f32.mrf.mxu0 }
 0x235   : > { %v2401_v17 = vpop.f32.mrf.mxu1 }
 0x236   : > { %v8393_v38 = vadd.f32 %v2401_v17, %v2170_v18  ;;  %v6621_v61 = vpop.f32.mrf.mxu0 }
 0x237   : > { %v6677_v48 = vpop.f32.mrf.mxu1 }
 0x238   : > { %v8395_v16 = vadd.f32 %v6677_v48, %v6621_v61  ;;  %v2183_v59 = vpop.f32.mrf.mxu0 }
 0x239   : > { %v2414_v7 = vpop.f32.mrf.mxu1 }
 0x23a   : > { %v6622_v55 = vpop.f32.mrf.mxu0 }
 0x23b   : > { %v6678_v51 = vpop.f32.mrf.mxu1 }
 0x23c   : > { %v8397_v13 = vadd.f32 %v6678_v51, %v6622_v55  ;;  %v2185_v35 = vpop.f32.mrf.mxu0 }
 0x23d   : > { %v2416_v49 = vpop.f32.mrf.mxu1 }
 0x23e   : > { %v8399_v42 = vadd.f32 %v2416_v49, %v2185_v35  ;;  %v6625_v63 = vpop.f32.mrf.mxu0 }
 0x23f   : > { %v6681_v39 = vpop.f32.mrf.mxu1 }
 0x240   : > { %v8401_v11 = vadd.f32 %v6681_v39, %v6625_v63  ;;  %v2198_v22 = vpop.f32.mrf.mxu0 }
 0x241   : > { %v2429_v2 = vpop.f32.mrf.mxu1 }
 0x242   : > { %v6626_v12 = vpop.f32.mrf.mxu0 }
 0x243   : > { %v6682_v47 = vpop.f32.mrf.mxu1 }
 0x244   : > { %v8403_v4 = vadd.f32 %v6682_v47, %v6626_v12  ;;  %v2200_v0 = vpop.f32.mrf.mxu0 }
 0x245   : > { %v2431_v19 = vpop.f32.mrf.mxu1 }
 0x246   : > { %v8405_v54 = vadd.f32 %v2431_v19, %v2200_v0  ;;  %v6629_v14 = vpop.f32.mrf.mxu0 }
 0x247   : > { %v6685_v31 = vpop.f32.mrf.mxu1 }
 0x248   : > { %v8407_v6 = vadd.f32 %v6685_v31, %v6629_v14  ;;  %v2213_v33 = vpop.f32.mrf.mxu0 }
 0x249   : > { %v2444_v21 = vpop.f32.mrf.mxu1 }
 0x24a   : > { %v6630_v44 = vpop.f32.mrf.mxu0 }
 0x24b   : > { %v6686_v46 = vpop.f32.mrf.mxu1 }
 0x24c   : > { %v8409_v58 = vadd.f32 %v6686_v46, %v6630_v44  ;;  %v2215_v26 = vpop.f32.mrf.mxu0 }
 0x24d   : > { %v2446_v3 = vpop.f32.mrf.mxu1 }
 0x24e   : > { %v8411_v53 = vadd.f32 %v2446_v3, %v2215_v26  ;;  %v6633_v45 = vpop.f32.mrf.mxu0 }
 0x24f   : > { %v6689_v36 = vpop.f32.mrf.mxu1 }
 0x250   : > { %v8413_v18 = vadd.f32 %v6689_v36, %v6633_v45  ;;  %v2228_v17 = vpop.f32.mrf.mxu0 }
 0x251   : > { %v2459_v61 = vpop.f32.mrf.mxu1 }
 0x252   : > { %v6634_v48 = vpop.f32.mrf.mxu0 }
 0x253   : > { %v6690_v59 = vpop.f32.mrf.mxu1 }
 0x254   : > { %v8415_v7 = vadd.f32 %v6690_v59, %v6634_v48  ;;  %v2230_v55 = vpop.f32.mrf.mxu0 }
 0x255   : > { %v2461_v51 = vpop.f32.mrf.mxu1 }
 0x256   : > { %v8417_v35 = vadd.f32 %v2461_v51, %v2230_v55  ;;  %v6637_v49 = vpop.f32.mrf.mxu0 }
 0x257   : > { %v6693_v63 = vpop.f32.mrf.mxu1 }
 0x258   : > { %v8419_v39 = vadd.f32 %v6693_v63, %v6637_v49  ;;  %v2243_v22 = vpop.f32.mrf.mxu0 }
 0x259   : > { %v2474_v2 = vpop.f32.mrf.mxu1 }
 0x25a   : > { %v6638_v12 = vpop.f32.mrf.mxu0 }
 0x25b   : > { %v6694_v47 = vpop.f32.mrf.mxu1 }
 0x25c   : > { %v8421_v0 = vadd.f32 %v6694_v47, %v6638_v12  ;;  %v2245_v19 = vpop.f32.mrf.mxu0 }
 0x25d   : > { %v2476_v14 = vpop.f32.mrf.mxu1 }
 0x25e   : > { %v8423_v31 = vadd.f32 %v2476_v14, %v2245_v19  ;;  %v6641_v33 = vpop.f32.mrf.mxu0 }
 0x25f   : > { %v6697_v21 = vpop.f32.mrf.mxu1 }
 0x260   : > { %v8425_v44 = vadd.f32 %v6697_v21, %v6641_v33  ;;  %v2258_v46 = vpop.f32.mrf.mxu0 }
 0x261   : > { %v2489_v26 = vpop.f32.mrf.mxu1 }
 0x262   : > { %v6642_v3 = vpop.f32.mrf.mxu0 }
 0x263   : > { %v6698_v45 = vpop.f32.mrf.mxu1 }
 0x264   : > { %v8427_v36 = vadd.f32 %v6698_v45, %v6642_v3  ;;  %v2260_v17 = vpop.f32.mrf.mxu0 }
 0x265   : > { %v2491_v61 = vpop.f32.mrf.mxu1 }
 0x266   : > { %v8429_v48 = vadd.f32 %v2491_v61, %v2260_v17  ;;  %v6645_v59 = vpop.f32.mrf.mxu0 }
 0x267   : > { %v6701_v55 = vpop.f32.mrf.mxu1 }
 0x268   : > { %v8431_v51 = vadd.f32 %v6701_v55, %v6645_v59  ;;  %v2273_v49 = vpop.f32.mrf.mxu0 }
 0x269   : > { %v2504_v63 = vpop.f32.mrf.mxu1 }
 0x26a   : > { %v6646_v22 = vpop.f32.mrf.mxu0 }
 0x26b   : > { %v6702_v2 = vpop.f32.mrf.mxu1 }
 0x26c   : > { %v8433_v12 = vadd.f32 %v6702_v2, %v6646_v22  ;;  %v2275_v47 = vpop.f32.mrf.mxu0 }
 0x26d   : > { %v2506_v19 = vpop.f32.mrf.mxu1 }
 0x26e   : > { %v8435_v14 = vadd.f32 %v2506_v19, %v2275_v47  ;;  %v6649_v33 = vpop.f32.mrf.mxu0 }
 0x26f   : > { %v6705_v21 = vpop.f32.mrf.mxu1 }
 0x270   : > { %v8437_v46 = vadd.f32 %v6705_v21, %v6649_v33  ;;  %v2288_v26 = vpop.f32.mrf.mxu0 }
 0x271   : > { %v2519_v3 = vpop.f32.mrf.mxu1  ;;  %v8452_v26 = vld [vmem:[%s9396_s2] ss:$0 sm:$0xff] }
 0x272   : > { %v8439_v45 = vpop.f32.mrf.mxu0 }
 0x274   : > { %v8441_v17 = vpop.f32.mrf.mxu0 }
 0x276   : > { %v6725_v61 = vpop.f32.mrf.mxu0 }
 0x277   : > { %v2782_v55 = vadd.f32 %v6725_v61, %v8380_v50 }
 0x278   : > { %v2632_v59 = vpop.f32.mrf.mxu0 }
 0x279   : > { %v2812_v2 = vrot.slane %v2782_v55, 1 }
 0x27a   : > { %v6726_v49 = vpop.f32.mrf.mxu0 }
 0x27b   : > { %v2783_v63 = vadd.f32 %v6726_v49, %v8385_v62 }
 0x27c   : > { %v2634_v22 = vpop.f32.mrf.mxu0 }
 0x27d   : > { %v2813_v47 = vrot.slane %v2783_v63, 1  ;;  %v2781_v19 = vadd.f32 %v2634_v22, %v8387_v28 }
 0x27e   : > { %v6729_v33 = vpop.f32.mrf.mxu0 }
 0x27f   : > { %v2860_v21 = vsel %vm2841_vm1, %v2812_v2, %v2813_v47  ;;  %v2811_v50 = vrot.slane %v2781_v19, 1  ;;  %v2785_v59 = vadd.f32 %v6729_v33, %v8389_v8 }
 0x280   : > { %v2863_v3 = vadd.f32 %v2860_v21, %v8304_v5  ;;  %v2647_v62 = vpop.f32.mrf.mxu0 }
 0x281   : > { %v2861_v61 = vsel %vm2841_vm1, %v2811_v50, %v2812_v2  ;;  %v2815_v19 = vrot.slane %v2785_v59, 1 }
 0x282   : > { %v2890_v28 = vadd.f32 %v8452_v26, %v2863_v3  ;;  %v2862_v55 = vadd.f32 %v2861_v61, %v8309_v52  ;;  %v6730_v49 = vpop.f32.mrf.mxu0 }
 0x283   : > { %v2786_v63 = vadd.f32 %v6730_v49, %v8391_v9 }
 0x284   : > { %v2910_v22 = vmax.f32 %v2890_v28, 0.0  ;;  %v2889_v47 = vadd.f32 %v8452_v26, %v2862_v55  ;;  %v2649_v34 = vpop.f32.mrf.mxu0 }
 0x285   : > { %v2816_v30 = vrot.slane %v2786_v63, 1  ;;  %v2784_v5 = vadd.f32 %v2649_v34, %v8393_v38 }
 0x286   : > { %v5771_v21 = vpack.c.bf16 %v2910_v22, %v2910_v22  ;;  %v2909_v62 = vmax.f32 %v2889_v47, 0.0  ;;  %v6733_v2 = vpop.f32.mrf.mxu0 }
 0x287   : > { %v2858_v8 = vsel %vm2841_vm1, %v2815_v19, %v2816_v30  ;;  %v2814_v33 = vrot.slane %v2784_v5, 1  ;;  %v2788_v61 = vadd.f32 %v6733_v2, %v8395_v16 }
 0x288   : > { %3010 = vst [vmem:[#allocation3 + $0x8] sm:$0xf] %v5771_v21  ;;  %v5770_v52 = vpack.c.bf16 %v2909_v62, %v2909_v62  ;;  %v2865_v50 = vadd.f32 %v2858_v8, %v8312_v29  ;;  %v2662_v9 = vpop.f32.mrf.mxu0 }
 0x289   : > { %v2859_v3 = vsel %vm2841_vm1, %v2814_v33, %v2815_v19  ;;  %v2818_v63 = vrot.slane %v2788_v61, 1 }
 0x28a   : > { %3009 = vst [vmem:[#allocation3 + $0x4] sm:$0xf] %v5770_v52  ;;  %v2892_v34 = vadd.f32 %v8452_v26, %v2865_v50  ;;  %v2864_v38 = vadd.f32 %v2859_v3, %v8317_v32  ;;  %v6734_v59 = vpop.f32.mrf.mxu0 }
 0x28b   : > { %v2789_v28 = vadd.f32 %v6734_v59, %v8397_v13 }
 0x28c   : > { %v2912_v30 = vmax.f32 %v2892_v34, 0.0  ;;  %v2891_v55 = vadd.f32 %v8452_v26, %v2864_v38  ;;  %v2664_v49 = vpop.f32.mrf.mxu0 }
 0x28d   : > { %v2819_v29 = vrot.slane %v2789_v28, 1  ;;  %v2787_v22 = vadd.f32 %v2664_v49, %v8399_v42 }
 0x28e   : > { %v5773_v47 = vpack.c.bf16 %v2912_v30, %v2912_v30  ;;  %v2911_v19 = vmax.f32 %v2891_v55, 0.0  ;;  %v6737_v5 = vpop.f32.mrf.mxu0 }
 0x28f   : > { %v2856_v16 = vsel %vm2841_vm1, %v2818_v63, %v2819_v29  ;;  %v2817_v21 = vrot.slane %v2787_v22, 1  ;;  %v2791_v8 = vadd.f32 %v6737_v5, %v8401_v11 }
 0x290   : > { %3012 = vst [vmem:[#allocation3 + $0x18] sm:$0xf] %v5773_v47  ;;  %v5772_v32 = vpack.c.bf16 %v2911_v19, %v2911_v19  ;;  %v2867_v62 = vadd.f32 %v2856_v16, %v8320_v1  ;;  %v2677_v13 = vpop.f32.mrf.mxu0 }
 0x291   : > { %v2857_v2 = vsel %vm2841_vm1, %v2817_v21, %v2818_v63  ;;  %v2821_v34 = vrot.slane %v2791_v8, 1 }
 0x292   : > { %3011 = vst [vmem:[#allocation3 + $0x14] sm:$0xf] %v5772_v32  ;;  %v2894_v42 = vadd.f32 %v8452_v26, %v2867_v62  ;;  %v2866_v33 = vadd.f32 %v2857_v2, %v8325_v40  ;;  %v6738_v52 = vpop.f32.mrf.mxu0 }
 0x293   : > { %v2792_v50 = vadd.f32 %v6738_v52, %v8403_v4 }
 0x294   : > { %v2914_v9 = vmax.f32 %v2894_v42, 0.0  ;;  %v2893_v3 = vadd.f32 %v8452_v26, %v2866_v33  ;;  %v2679_v61 = vpop.f32.mrf.mxu0 }
 0x295   : > { %v2822_v1 = vrot.slane %v2792_v50, 1  ;;  %v2790_v38 = vadd.f32 %v2679_v61, %v8405_v54 }
 0x296   : > { %v5775_v59 = vpack.c.bf16 %v2914_v9, %v2914_v9  ;;  %v2913_v28 = vmax.f32 %v2893_v3, 0.0  ;;  %v6741_v30 = vpop.f32.mrf.mxu0 }
 0x297   : > { %v2854_v11 = vsel %vm2841_vm1, %v2821_v34, %v2822_v1  ;;  %v2820_v55 = vrot.slane %v2790_v38, 1  ;;  %v2794_v29 = vadd.f32 %v6741_v30, %v8407_v6 }
 0x298   : > { %3014 = vst [vmem:[#allocation3 + $0x28] sm:$0xf] %v5775_v59  ;;  %v5774_v40 = vpack.c.bf16 %v2913_v28, %v2913_v28  ;;  %v2869_v49 = vadd.f32 %v2854_v11, %v8328_v41  ;;  %v2692_v4 = vpop.f32.mrf.mxu0 }
 0x299   : > { %v2855_v63 = vsel %vm2841_vm1, %v2820_v55, %v2821_v34  ;;  %v2824_v32 = vrot.slane %v2794_v29, 1 }
 0x29a   : > { %3013 = vst [vmem:[#allocation3 + $0x24] sm:$0xf] %v5774_v40  ;;  %v2896_v54 = vadd.f32 %v8452_v26, %v2869_v49  ;;  %v2868_v22 = vadd.f32 %v2855_v63, %v8334_v43  ;;  %v6742_v47 = vpop.f32.mrf.mxu0 }
 0x29b   : > { %v2795_v19 = vadd.f32 %v6742_v47, %v8409_v58 }
 0x29c   : > { %v2916_v5 = vmax.f32 %v2896_v54, 0.0  ;;  %v2895_v16 = vadd.f32 %v8452_v26, %v2868_v22  ;;  %v2694_v21 = vpop.f32.mrf.mxu0 }
 0x29d   : > { %v2825_v41 = vrot.slane %v2795_v19, 1  ;;  %v2793_v62 = vadd.f32 %v2694_v21, %v8411_v53 }
 0x29e   : > { %v5777_v13 = vpack.c.bf16 %v2916_v5, %v2916_v5  ;;  %v2915_v2 = vmax.f32 %v2895_v16, 0.0  ;;  %v6745_v8 = vpop.f32.mrf.mxu0 }
 0x29f   : > { %v2852_v6 = vsel %vm2841_vm1, %v2824_v32, %v2825_v41  ;;  %v2823_v42 = vrot.slane %v2793_v62, 1  ;;  %v2797_v50 = vadd.f32 %v6745_v8, %v8413_v18 }
 0x2a0   : > { %3016 = vst [vmem:[#allocation3 + $0x38] sm:$0xf] %v5777_v13  ;;  %v5776_v43 = vpack.c.bf16 %v2915_v2, %v2915_v2  ;;  %v2871_v33 = vadd.f32 %v2852_v6, %v8337_v15  ;;  %v2707_v58 = vpop.f32.mrf.mxu0 }
 0x2a1   : > { %v2853_v52 = vsel %vm2841_vm1, %v2823_v42, %v2824_v32  ;;  %v2827_v59 = vrot.slane %v2797_v50, 1 }
 0x2a2   : > { %3015 = vst [vmem:[#allocation3 + $0x34] sm:$0xf] %v5776_v43  ;;  %v2898_v53 = vadd.f32 %v8452_v26, %v2871_v33  ;;  %v2870_v9 = vadd.f32 %v2853_v52, %v8342_v27  ;;  %v6746_v3 = vpop.f32.mrf.mxu0 }
 0x2a3   : > { %v2798_v61 = vadd.f32 %v6746_v3, %v8415_v7 }
 0x2a4   : > { %v2918_v34 = vmax.f32 %v2898_v53, 0.0  ;;  %v2897_v1 = vadd.f32 %v8452_v26, %v2870_v9  ;;  %v2709_v38 = vpop.f32.mrf.mxu0 }
 0x2a5   : > { %v2828_v15 = vrot.slane %v2798_v61, 1  ;;  %v2796_v28 = vadd.f32 %v2709_v38, %v8417_v35 }
 0x2a6   : > { %v5779_v30 = vpack.c.bf16 %v2918_v34, %v2918_v34  ;;  %v2917_v11 = vmax.f32 %v2897_v1, 0.0  ;;  %v6749_v55 = vpop.f32.mrf.mxu0 }
 0x2a7   : > { %v2850_v18 = vsel %vm2841_vm1, %v2827_v59, %v2828_v15  ;;  %v2826_v40 = vrot.slane %v2796_v28, 1  ;;  %v2800_v63 = vadd.f32 %v6749_v55, %v8419_v39  ;;  %v6706_v55 = vpop.f32.mrf.mxu1 }
 0x2a8   : > { %3018 = vst [vmem:[#allocation3 + $0x48] sm:$0xf] %v5779_v30  ;;  %v5778_v27 = vpack.c.bf16 %v2917_v11, %v2917_v11  ;;  %v2873_v49 = vadd.f32 %v2850_v18, %v8345_v24  ;;  %v2722_v7 = vpop.f32.mrf.mxu0 }
 0x2a9   : > { %v2851_v4 = vsel %vm2841_vm1, %v2826_v40, %v2827_v59  ;;  %v2830_v16 = vrot.slane %v2800_v63, 1 }
 0x2aa   : > { %3017 = vst [vmem:[#allocation3 + $0x44] sm:$0xf] %v5778_v27  ;;  %v2900_v35 = vadd.f32 %v8452_v26, %v2873_v49  ;;  %v2872_v29 = vadd.f32 %v2851_v4, %v8350_v56  ;;  %v6750_v54 = vpop.f32.mrf.mxu0 }
 0x2ab   : > { %v2801_v22 = vadd.f32 %v6750_v54, %v8421_v0 }
 0x2ac   : > { %v2920_v47 = vmax.f32 %v2900_v35, 0.0  ;;  %v2899_v19 = vadd.f32 %v8452_v26, %v2872_v29  ;;  %v2724_v5 = vpop.f32.mrf.mxu0 }
 0x2ad   : > { %v2831_v24 = vrot.slane %v2801_v22, 1  ;;  %v2799_v21 = vadd.f32 %v2724_v5, %v8423_v31 }
 0x2ae   : > { %v5781_v32 = vpack.c.bf16 %v2920_v47, %v2920_v47  ;;  %v2919_v41 = vmax.f32 %v2899_v19, 0.0  ;;  %v6753_v62 = vpop.f32.mrf.mxu0  ;;  %v2530_v47 = vadd.f32 %v6706_v55, %v8439_v45 }
 0x2af   : > { %v2848_v39 = vsel %vm2841_vm1, %v2830_v16, %v2831_v24  ;;  %v2829_v13 = vrot.slane %v2799_v21, 1  ;;  %v2803_v6 = vadd.f32 %v6753_v62, %v8425_v44 }
 0x2b0   : > { %3020 = vst [vmem:[#allocation3 + $0x58] sm:$0xf] %v5781_v32  ;;  %v5780_v56 = vpack.c.bf16 %v2919_v41, %v2919_v41  ;;  %v2875_v2 = vadd.f32 %v2848_v39, %v8353_v25  ;;  %v2737_v0 = vpop.f32.mrf.mxu0 }
 0x2b1   : > { %v2849_v8 = vsel %vm2841_vm1, %v2829_v13, %v2830_v16  ;;  %v2833_v53 = vrot.slane %v2803_v6, 1 }
 0x2b2   : > { %3019 = vst [vmem:[#allocation3 + $0x54] sm:$0xf] %v5780_v56  ;;  %v2902_v31 = vadd.f32 %v8452_v26, %v2875_v2  ;;  %v2874_v42 = vadd.f32 %v2849_v8, %v8358_v37  ;;  %v6754_v43 = vpop.f32.mrf.mxu0 }
 0x2b3   : > { %v2804_v33 = vadd.f32 %v6754_v43, %v8427_v36 }
 0x2b4   : > { %v2922_v58 = vmax.f32 %v2902_v31, 0.0  ;;  %v2901_v52 = vadd.f32 %v8452_v26, %v2874_v42  ;;  %v2739_v50 = vpop.f32.mrf.mxu0  ;;  %v9420_v42 = vld [vmem:[#allocation22_spill] sm:$0xff] }
 0x2b5   : > { %v2834_v25 = vrot.slane %v2804_v33, 1  ;;  %v2802_v9 = vadd.f32 %v2739_v50, %v8429_v48 }
 0x2b6   : > { %v5783_v3 = vpack.c.bf16 %v2922_v58, %v2922_v58  ;;  %v2921_v61 = vmax.f32 %v2901_v52, 0.0  ;;  %v6757_v34 = vpop.f32.mrf.mxu0 }
 0x2b7   : > { %v2846_v44 = vsel %vm2841_vm1, %v2833_v53, %v2834_v25  ;;  %v2832_v1 = vrot.slane %v2802_v9, 1  ;;  %v2806_v15 = vadd.f32 %v6757_v34, %v8431_v51 }
 0x2b8   : > { %3022 = vst [vmem:[#allocation3 + $0x68] sm:$0xf] %v5783_v3  ;;  %v5782_v37 = vpack.c.bf16 %v2921_v61, %v2921_v61  ;;  %v2877_v38 = vadd.f32 %v2846_v44, %v8361_v60  ;;  %v2752_v36 = vpop.f32.mrf.mxu0 }
 0x2b9   : > { %v2847_v59 = vsel %vm2841_vm1, %v2832_v1, %v2833_v53  ;;  %v2836_v60 = vrot.slane %v2806_v15, 1 }
 0x2ba   : > { %3021 = vst [vmem:[#allocation3 + $0x64] sm:$0xf] %v5782_v37  ;;  %v2904_v48 = vadd.f32 %v8452_v26, %v2877_v38  ;;  %v2876_v28 = vadd.f32 %v2847_v59, %v8366_v10  ;;  %v6758_v30 = vpop.f32.mrf.mxu0  ;;  %v2521_v10 = vpop.f32.mrf.mxu1 }
 0x2bb   : > { %v2807_v11 = vadd.f32 %v6758_v30, %v8433_v12  ;;  %v2522_v21 = vadd.f32 %v2521_v10, %v8441_v17 }
 0x2bc   : > { %v2924_v18 = vmax.f32 %v2904_v48, 0.0  ;;  %v2903_v40 = vadd.f32 %v8452_v26, %v2876_v28  ;;  %v2754_v27 = vpop.f32.mrf.mxu0 }
 0x2bd   : > { %v2837_v49 = vrot.slane %v2807_v11, 1  ;;  %v2805_v7 = vadd.f32 %v2754_v27, %v8435_v14 }
 0x2be   : > { %v5785_v4 = vpack.c.bf16 %v2924_v18, %v2924_v18  ;;  %v2923_v63 = vmax.f32 %v2903_v40, 0.0  ;;  %v6761_v51 = vpop.f32.mrf.mxu0 }
 0x2bf   : > { %v2844_v35 = vsel %vm2841_vm1, %v2836_v60, %v2837_v49  ;;  %v2835_v29 = vrot.slane %v2805_v7, 1  ;;  %v2809_v14 = vadd.f32 %v6761_v51, %v8437_v46 }
 0x2c0   : > { %3024 = vst [vmem:[#allocation3 + $0x78] sm:$0xf] %v5785_v4  ;;  %v5784_v54 = vpack.c.bf16 %v2923_v63, %v2923_v63  ;;  %v2879_v12 = vadd.f32 %v2844_v35, %v8369_v23  ;;  %v2767_v22 = vpop.f32.mrf.mxu0 }
 0x2c1   : > { %v2845_v19 = vsel %vm2841_vm1, %v2835_v29, %v2836_v60  ;;  %v2839_v39 = vrot.slane %v2809_v14, 1 }
 0x2c2   : > { %3023 = vst [vmem:[#allocation3 + $0x74] sm:$0xf] %v5784_v54  ;;  %v2906_v5 = vadd.f32 %v8452_v26, %v2879_v12  ;;  %v2878_v16 = vadd.f32 %v2845_v19, %v8374_v57  ;;  %v6762_v24 = vpop.f32.mrf.mxu0  ;;  %v9419_v57 = vld [vmem:[#allocation21_spill] sm:$0xff] }
 0x2c3   : > { %v2810_v32 = vadd.f32 %v6762_v24, %v2530_v47 }
 0x2c4   : > { %v2926_v41 = vmax.f32 %v2906_v5, 0.0  ;;  %v2905_v23 = vadd.f32 %v8452_v26, %v2878_v16  ;;  %v2769_v62 = vpop.f32.mrf.mxu0 }
 0x2c5   : > { %v2840_v45 = vrot.slane %v2810_v32, 1  ;;  %v2808_v13 = vadd.f32 %v2769_v62, %v2522_v21 }
 0x2c6   : > { %v5787_v56 = vpack.c.bf16 %v2926_v41, %v2926_v41  ;;  %v2925_v2 = vmax.f32 %v2905_v23, 0.0 }
 0x2c7   : > { %v2842_v46 = vsel %vm2841_vm1, %v2839_v39, %v2840_v45  ;;  %v2838_v0 = vrot.slane %v2808_v13, 1 }
 0x2c8   : > { %3026 = vst [vmem:[#allocation3 + $0x88] sm:$0xf] %v5787_v56  ;;  %v5786_v8 = vpack.c.bf16 %v2925_v2, %v2925_v2  ;;  %v2881_v6 = vadd.f32 %v2842_v46, %v9419_v57 }
 0x2c9   : > { %v2843_v17 = vsel %vm2841_vm1, %v2838_v0, %v2839_v39 }
 0x2ca   : > { %3025 = vst [vmem:[#allocation3 + $0x84] sm:$0xf] %v5786_v8  ;;  %v2908_v31 = vadd.f32 %v8452_v26, %v2881_v6  ;;  %v2880_v43 = vadd.f32 %v2843_v17, %v9420_v42 }
 0x2cc   : > { %v2928_v33 = vmax.f32 %v2908_v31, 0.0  ;;  %v2907_v58 = vadd.f32 %v8452_v26, %v2880_v43 }
 0x2ce   : > { %v5789_v52 = vpack.c.bf16 %v2928_v33, %v2928_v33  ;;  %v2927_v50 = vmax.f32 %v2907_v58, 0.0  ;;  %3032 = sbr.rel (%p5666_p7) target bundleno = 726 (0x2d6), region = 52 }
 0x2d0   : > { %3028 = vst [vmem:[#allocation3 + $0x98] sm:$0xf] %v5789_v52  ;;  %v5788_v53 = vpack.c.bf16 %v2927_v50, %v2927_v50 }
 0x2d2   : > { %3027 = vst [vmem:[#allocation3 + $0x94] sm:$0xf] %v5788_v53 }
 0x2d3   : > { %v7712_v25 = vmov 0  }
 0x2d4   : > { %3033 = vst [vmem:[#allocation3] sm:$0xf] %v7712_v25  ;;  %3034 = vst [vmem:[#allocation3 + $0x4] sm:$0xf] %v7712_v25 }
 0x2d5   : > { %3035 = vst [vmem:[#allocation3 + $0x8] sm:$0xf] %v7712_v25  ;;  %3036 = vst [vmem:[#allocation3 + $0xc] sm:$0xf] %v7712_v25 }
 0x2d6 PF: > { %p5667_p9 = scmp.ne.s32.totalorder %s7688_s21, 1 }
 0x2d8   : > { %3040 = sbr.rel (%p5667_p9) target bundleno = 736 (0x2e0), region = 56 }
 0x2dd   : > { %v7713_v9 = vmov 0  }
 0x2de   : > { %3042 = vst [vmem:[#allocation3 + $0x90] sm:$0xf] %v7713_v9  ;;  %3043 = vst [vmem:[#allocation3 + $0x94] sm:$0xf] %v7713_v9 }
 0x2df   : > { %3044 = vst [vmem:[#allocation3 + $0x98] sm:$0xf] %v7713_v9  ;;  %3045 = vst [vmem:[#allocation3 + $0x9c] sm:$0xf] %v7713_v9 }
 0x2e0 PF: > { %v7429_v26 = vld [vmem:[#allocation8 + $0xf8] sm:$0xff]   ;;  %v7430_v3 = vld [vmem:[#allocation8 + $0xf0] sm:$0xff]   ;;  %v7431_v61 = vld [vmem:[#allocation8 + $0xe8] sm:$0xff]   ;;  %s5790_s11 = sshll.u32 %s7688_s21, 4  ;;  %s5764_s12 = sshll.u32 %s7692_s22, 5 }
 0x2e1   : > { %6763 = vmatprep.subr.bf16.mxu1 %v7429_v26  ;;  %v7432_v34 = vld [vmem:[#allocation8 + $0xe0] sm:$0xff]   ;;  %v8561_v44 = vld [vmem:[#allocation3 + $0x10] sm:$0xff]   ;;  %v7433_v37 = vld [vmem:[#allocation8 + $0xd8] sm:$0xff]   ;;  %s5437_s26 = sadd.s32 %s5790_s11, %s5764_s12  ;;  %s5440_s22 = sshll.u32 %s7879_s16, 4  ;;  %s9337_s22 = int_to_ptr.vmem [resolvable:$true] %s5440_s22 }
 0x2e2   : > { %6764 = vmatpush3.bf16.msra.mxu1 %v7429_v26  ;;  %6779 = vmatprep.mubr.bf16.mxu1 %v8561_v44  ;;  %v8564_v1 = vld [vmem:[#allocation3 + $0x20] sm:$0xff]   ;;  %v7434_v38 = vld [vmem:[#allocation8 + $0xd0] sm:$0xff]   ;;  %v7435_v36 = vld [vmem:[#allocation8 + $0xc8] sm:$0xff]   ;;  %s5765_s21 = sshll.u32 %s5437_s26, 7  ;;  %s9449_s9 = sand.u32 1, %s7680_s19  }
 0x2e3   : > { %6765 = vmatprep.subr.bf16.mxu1 %v7430_v3  ;;  %6875 = vmatprep.mubr.bf16.mxu0 %v8564_v1  ;;  %v7436_v59 = vld [vmem:[#allocation8 + $0xc0] sm:$0xff]   ;;  %v7452_v15 = vld [vmem:[#allocation8 + $0x1b8] sm:$0xff]   ;;  %v7453_v48 = vld [vmem:[#allocation8 + $0x1b0] sm:$0xff]   ;;  %s9335_s6 = scalar_lea.hbm %s9399_s5, %s5765_s21  ;;  %s9343_s10 = scalar_lea.sflag [#allocation7], %s9449_s9 }
 0x2e4   : > { %6859 = vmatprep.subr.bf16.mxu0 %v7452_v15  ;;  %v7439_v28 = vld [vmem:[#allocation8 + $0x38] sm:$0xff]   ;;  %v7457_v30 = vld [vmem:[#allocation8 + $0x1a8] sm:$0xff]   ;;  %v7442_v55 = vld [vmem:[#allocation8 + $0x30] sm:$0xff]   ;;  %s7602_s14 = scalar_lea.vmem %s9337_s22, 2048  ;;  %s7714_s17 = smov [#allocation10]  }
 0x2e5   : > { %6860 = vmatpush3.bf16.msra.mxu0 %v7452_v15  ;;  %v8567_v11 = vld [vmem:[#allocation3 + $0x18] sm:$0xff]   ;;  %v7458_v18 = vld [vmem:[#allocation8 + $0x1a0] sm:$0xff]   ;;  %v7445_v27 = vld [vmem:[#allocation8 + $0x28] sm:$0xff]   ;;  %p7603_p10 = scmp.ne.s32.totalorder %s9337_s22, %s7602_s14  ;;  %s7606_s15 = sshll.u32 %s7714_s17, 4  ;;  %s7607_s15 = int_to_ptr.vmem [resolvable:$false] %s7606_s15 }
 0x2e6   : > { %6766 = vmatpush3.bf16.msra.mxu1 %v7430_v3  ;;  %6861 = vmatprep.subr.bf16.mxu0 %v7453_v48  ;;  %v7462_v40 = vld [vmem:[#allocation8 + $0x198] sm:$0xff]   ;;  %v8571_v60 = vld [vmem:[#allocation3 + $0x28] sm:$0xff]   ;;  %v8573_v49 = vld [vmem:[#allocation3 + $0x30] sm:$0xff]   ;;  %s7608_s1 = scalar_lea.vmem %s7607_s15, 4096  ;;  %p7609_p1 = scmp.lt.s32.totalorder %s9337_s22, %s7607_s15 }
 0x2e7   : > { %6767 = vmatprep.subr.bf16.mxu1 %v7431_v61  ;;  %v7448_v7 = vld [vmem:[#allocation8 + $0x20] sm:$0xff]   ;;  %v7463_v4 = vld [vmem:[#allocation8 + $0x190] sm:$0xff]   ;;  %v7467_v63 = vld [vmem:[#allocation8 + $0x188] sm:$0xff]   ;;  %p7604_p12 = pnand %p7603_p10, %p7799_p3  ;;  %p7610_p11 = scmp.lt.s32.totalorder %s7608_s1, %s7602_s14 }
 0x2e8   : > { %v7451_v51 = vld [vmem:[#allocation8 + $0x18] sm:$0xff]   ;;  %v8579_v29 = vld [vmem:[#allocation3 + $0x40] sm:$0xff]   ;;  %v7456_v10 = vld [vmem:[#allocation8 + $0x10] sm:$0xff]  }
 0x2e9   : > { %6862 = vmatpush3.bf16.msra.mxu0 %v7453_v48  ;;  %v8577_v35 = vld [vmem:[#allocation3 + $0x38] sm:$0xff]   ;;  %v7468_v54 = vld [vmem:[#allocation8 + $0x180] sm:$0xff]   ;;  %v7461_v22 = vld [vmem:[#allocation8 + $0x8] sm:$0xff]   ;;  %p7605_p0 = pneg %p7604_p12  ;;  %p7611_p13 = por %p7610_p11, %p7609_p1 }
 0x2ea   : > { %6768 = vmatpush3.bf16.msra.mxu1 %v7431_v61  ;;  %6863 = vmatprep.subr.bf16.mxu0 %v7457_v30  ;;  %v7474_v12 = vld [vmem:[#allocation8 + $0x78] sm:$0xff]   ;;  %v8583_v47 = vld [vmem:[#allocation3 + $0x48] sm:$0xff]   ;;  %v8585_v19 = vld [vmem:[#allocation3 + $0x50] sm:$0xff]  }
 0x2eb   : > { %6769 = vmatprep.subr.bf16.mxu1 %v7432_v34  ;;  %v7466_v14 = vld [vmem:[#allocation8] sm:$0xff]   ;;  %v7476_v5 = vld [vmem:[#allocation8 + $0x70] sm:$0xff]   ;;  %v7471_v16 = vld [vmem:[#allocation8 + $0x138] sm:$0xff]   ;;  %p7612_p2 = pnand %p7611_p13, %p7605_p0 }
 0x2ec   : > { %v7478_v24 = vld [vmem:[#allocation8 + $0x68] sm:$0xff]   ;;  %v8591_v21 = vld [vmem:[#allocation3 + $0x58] sm:$0xff]   ;;  %v8593_v32 = vld [vmem:[#allocation3 + $0x60] sm:$0xff]  }
 0x2ed   : > { %6864 = vmatpush3.bf16.msra.mxu0 %v7457_v30  ;;  %v7480_v41 = vld [vmem:[#allocation8 + $0x60] sm:$0xff]   ;;  %v7482_v23 = vld [vmem:[#allocation8 + $0x58] sm:$0xff]   ;;  %v8599_v62 = vld [vmem:[#allocation3 + $0x68] sm:$0xff]  }
 0x2ee   : > { %6770 = vmatpush3.bf16.msra.mxu1 %v7432_v34  ;;  %6865 = vmatprep.subr.bf16.mxu0 %v7458_v18  ;;  %v8601_v39 = vld [vmem:[#allocation3 + $0x70] sm:$0xff]   ;;  %v7487_v13 = vld [vmem:[#allocation8 + $0x48] sm:$0xff]   ;;  %v8607_v56 = vld [vmem:[#allocation3 + $0x78] sm:$0xff]  }
 0x2ef   : > { %6771 = vmatprep.subr.bf16.mxu1 %v7433_v37  ;;  %v7483_v45 = vld [vmem:[#allocation8 + $0x50] sm:$0xff]   ;;  %9421 = vst [vmem:[#allocation21_spill] sm:$0xff] %v8607_v56  ;;  %v8609_v2 = vld [vmem:[#allocation3 + $0x80] sm:$0xff]   ;;  %v7492_v0 = vld [vmem:[#allocation8 + $0x178] sm:$0xff]  }
 0x2f0   : > { %v7488_v46 = vld [vmem:[#allocation8 + $0x40] sm:$0xff]   ;;  %v8615_v8 = vld [vmem:[#allocation3 + $0x88] sm:$0xff]   ;;  %v7472_v17 = vld [vmem:[#allocation8 + $0x130] sm:$0xff]  }
 0x2f1   : > { %6866 = vmatpush3.bf16.msra.mxu0 %v7458_v18  ;;  %v8617_v57 = vld [vmem:[#allocation3] sm:$0xff]   ;;  %v8623_v6 = vld [vmem:[#allocation3 + $0x8] sm:$0xff]   ;;  %v8629_v42 = vld [vmem:[#allocation3 + $0x90] sm:$0xff]  }
 0x2f2   : > { %6772 = vmatpush3.bf16.msra.mxu1 %v7433_v37  ;;  %6867 = vmatprep.subr.bf16.mxu0 %v7462_v40  ;;  %v7473_v31 = vld [vmem:[#allocation8 + $0x128] sm:$0xff]   ;;  %9422 = vst [vmem:[#allocation22_spill] sm:$0xff] %v8629_v42  ;;  %v7475_v43 = vld [vmem:[#allocation8 + $0x120] sm:$0xff]   ;;  %v7477_v33 = vld [vmem:[#allocation8 + $0x118] sm:$0xff]  }
 0x2f3   : > { %6773 = vmatprep.subr.bf16.mxu1 %v7434_v38  ;;  %v8635_v58 = vld [vmem:[#allocation3 + $0x98] sm:$0xff]   ;;  %v7479_v52 = vld [vmem:[#allocation8 + $0x110] sm:$0xff]   ;;  %v7481_v50 = vld [vmem:[#allocation8 + $0x108] sm:$0xff]  }
 0x2f4   : > { %9423 = vst [vmem:[#allocation23_spill] sm:$0xff] %v8635_v58  ;;  %v7486_v53 = vld [vmem:[#allocation8 + $0x100] sm:$0xff]   ;;  %v7494_v25 = vld [vmem:[#allocation8 + $0x170] sm:$0xff]   ;;  %v7489_v9 = vld [vmem:[#allocation8 + $0x1f8] sm:$0xff]  }
 0x2f5   : > { %6868 = vmatpush3.bf16.msra.mxu0 %v7462_v40  ;;  %v7496_v26 = vld [vmem:[#allocation8 + $0x168] sm:$0xff]   ;;  %v7498_v3 = vld [vmem:[#allocation8 + $0x160] sm:$0xff]   ;;  %v7500_v61 = vld [vmem:[#allocation8 + $0x158] sm:$0xff]  }
 0x2f6   : > { %6774 = vmatpush3.bf16.msra.mxu1 %v7434_v38  ;;  %6869 = vmatprep.subr.bf16.mxu0 %v7463_v4  ;;  %v7501_v34 = vld [vmem:[#allocation8 + $0x150] sm:$0xff]   ;;  %v7503_v37 = vld [vmem:[#allocation8 + $0x148] sm:$0xff]   ;;  %v7504_v38 = vld [vmem:[#allocation8 + $0x140] sm:$0xff]  }
 0x2f7   : > { %6775 = vmatprep.subr.bf16.mxu1 %v7435_v36  ;;  %v7491_v15 = vld [vmem:[#allocation8 + $0x1e8] sm:$0xff]   ;;  %v7493_v48 = vld [vmem:[#allocation8 + $0x1e0] sm:$0xff]   ;;  %v7497_v30 = vld [vmem:[#allocation8 + $0x1d0] sm:$0xff]  }
 0x2f8   : > { %v7502_v18 = vld [vmem:[#allocation8 + $0x1c0] sm:$0xff]   ;;  %v8677_v40 = vld [vmem:[#allocation8 + $0x230] sm:$0xff]  }
 0x2f9   : > { %6870 = vmatpush3.bf16.msra.mxu0 %v7463_v4  ;;  %v8701_v4 = vld [vmem:[#allocation8 + $0x210] sm:$0xff]  }
 0x2fa   : > { %6776 = vmatpush3.bf16.msra.mxu1 %v7435_v36  ;;  %6871 = vmatprep.subr.bf16.mxu0 %v7467_v63  ;;  %v8657_v36 = vld [vmem:[#allocation8 + $0x238] sm:$0xff]  }
 0x2fb   : > { %6777 = vmatprep.subr.bf16.mxu1 %v7436_v59 }
 0x2fd   : > { %6872 = vmatpush3.bf16.msra.mxu0 %v7467_v63  ;;  %v8708_v63 = vld [vmem:[#allocation8 + $0x208] sm:$0xff]  }
 0x2fe   : > { %6778 = vmatpush3.bf16.msra.mxu1 %v7436_v59  ;;  %6873 = vmatprep.subr.bf16.mxu0 %v7468_v54  ;;  %v7490_v59 = vld [vmem:[#allocation8 + $0x1f0] sm:$0xff]  }
 0x2ff   : > { %6811 = vmatprep.subr.bf16.mxu1 %v7439_v28 }
 0x301   : > { %6780 = vmatmul.mubr.bf16.vlgmr.msra.gmra.mxu1 %v8567_v11  ;;  %6874 = vmatpush3.bf16.msra.mxu0 %v7468_v54 }
 0x302   : > { %6812 = vmatpush3.bf16.msra.mxu1 %v7439_v28  ;;  %6783 = vmatprep.mubr.bf16.mxu1 %v8564_v1  ;;  %v7495_v28 = vld [vmem:[#allocation8 + $0x1d8] sm:$0xff]  }
 0x303   : > { %6813 = vmatprep.subr.bf16.mxu1 %v7442_v55  ;;  %6955 = vmatprep.subr.bf16.mxu0 %v7474_v12 }
 0x304   : > { %6876 = vmatmul.mubr.bf16.vlgmr.msra.gmra.mxu0 %v8571_v60 }
 0x305   : > { %6879 = vmatprep.mubr.bf16.mxu0 %v8573_v49  ;;  %6956 = vmatpush3.bf16.msra.mxu0 %v7474_v12 }
 0x306   : > { %6814 = vmatpush3.bf16.msra.mxu1 %v7442_v55  ;;  %6957 = vmatprep.subr.bf16.mxu0 %v7476_v5  ;;  %v7499_v55 = vld [vmem:[#allocation8 + $0x1c8] sm:$0xff]  }
 0x307   : > { %6815 = vmatprep.subr.bf16.mxu1 %v7445_v27 }
 0x309   : > { %6784 = vmatmul.mubr.bf16.gmra.mxu1 %v8571_v60  ;;  %6958 = vmatpush3.bf16.msra.mxu0 %v7476_v5 }
 0x30a   : > { %6787 = vmatprep.mubr.bf16.mxu1 %v8573_v49  ;;  %6816 = vmatpush3.bf16.msra.mxu1 %v7445_v27  ;;  %v8684_v27 = vld [vmem:[#allocation8 + $0x228] sm:$0xff]  }
 0x30b   : > { %6817 = vmatprep.subr.bf16.mxu1 %v7448_v7  ;;  %6959 = vmatprep.subr.bf16.mxu0 %v7478_v24 }
 0x30c   : > { %6880 = vmatmul.mubr.bf16.gmra.mxu0 %v8577_v35 }
 0x30d   : > { %6883 = vmatprep.mubr.bf16.mxu0 %v8579_v29  ;;  %6960 = vmatpush3.bf16.msra.mxu0 %v7478_v24 }
 0x30e   : > { %6818 = vmatpush3.bf16.msra.mxu1 %v7448_v7  ;;  %6961 = vmatprep.subr.bf16.mxu0 %v7480_v41  ;;  %v8696_v7 = vld [vmem:[#allocation8 + $0x218] sm:$0xff]  }
 0x30f   : > { %6819 = vmatprep.subr.bf16.mxu1 %v7451_v51 }
 0x311   : > { %6788 = vmatmul.mubr.bf16.gmra.mxu1 %v8577_v35  ;;  %6962 = vmatpush3.bf16.msra.mxu0 %v7480_v41 }
 0x312   : > { %6791 = vmatprep.mubr.bf16.mxu1 %v8579_v29  ;;  %6820 = vmatpush3.bf16.msra.mxu1 %v7451_v51  ;;  %v8713_v51 = vld [vmem:[#allocation8 + $0x200] sm:$0xff]  }
 0x313   : > { %6821 = vmatprep.subr.bf16.mxu1 %v7456_v10  ;;  %6963 = vmatprep.subr.bf16.mxu0 %v7482_v23 }
 0x314   : > { %6884 = vmatmul.mubr.bf16.gmra.mxu0 %v8583_v47 }
 0x315   : > { %6887 = vmatprep.mubr.bf16.mxu0 %v8585_v19  ;;  %6964 = vmatpush3.bf16.msra.mxu0 %v7482_v23  ;;  %v7511_v23 = vld [vmem:[#allocation8 + $0x98] sm:$0xff]  }
 0x316   : > { %6822 = vmatpush3.bf16.msra.mxu1 %v7456_v10  ;;  %6965 = vmatprep.subr.bf16.mxu0 %v7483_v45  ;;  %v7506_v10 = vld [vmem:[#allocation8 + $0xb0] sm:$0xff]  }
 0x317   : > { %6823 = vmatprep.subr.bf16.mxu1 %v7461_v22 }
 0x319   : > { %6792 = vmatmul.mubr.bf16.gmra.mxu1 %v8583_v47  ;;  %6966 = vmatpush3.bf16.msra.mxu0 %v7483_v45 }
 0x31a   : > { %6795 = vmatprep.mubr.bf16.mxu1 %v8585_v19  ;;  %6824 = vmatpush3.bf16.msra.mxu1 %v7461_v22  ;;  %v7507_v22 = vld [vmem:[#allocation8 + $0xa8] sm:$0xff]  }
 0x31b   : > { %6825 = vmatprep.subr.bf16.mxu1 %v7466_v14  ;;  %6967 = vmatprep.subr.bf16.mxu0 %v7487_v13 }
 0x31c   : > { %6888 = vmatmul.mubr.bf16.gmra.mxu0 %v8591_v21 }
 0x31d   : > { %6891 = vmatprep.mubr.bf16.mxu0 %v8593_v32  ;;  %6968 = vmatpush3.bf16.msra.mxu0 %v7487_v13 }
 0x31e   : > { %6826 = vmatpush3.bf16.msra.mxu1 %v7466_v14  ;;  %6969 = vmatprep.subr.bf16.mxu0 %v7488_v46 }
 0x31f   : > { %6907 = vmatprep.subr.bf16.mxu1 %v7471_v16 }
 0x321   : > { %6796 = vmatmul.mubr.bf16.gmra.mxu1 %v8591_v21  ;;  %6970 = vmatpush3.bf16.msra.mxu0 %v7488_v46  ;;  %v7513_v46 = vld [vmem:[#allocation8 + $0x90] sm:$0xff]  }
 0x322   : > { %6799 = vmatprep.mubr.bf16.mxu1 %v8593_v32  ;;  %7051 = vmatprep.subr.bf16.mxu0 %v7492_v0 }
 0x324   : > { %6892 = vmatmul.mubr.bf16.gmra.mxu0 %v8599_v62 }
 0x325   : > { %6895 = vmatprep.mubr.bf16.mxu0 %v8601_v39 }
 0x329   : > { %6800 = vmatmul.mubr.bf16.gmra.mxu1 %v8599_v62 }
 0x32a   : > { %6803 = vmatprep.mubr.bf16.mxu1 %v8601_v39 }
 0x32c   : > { %6896 = vmatmul.mubr.bf16.gmra.mxu0 %v8607_v56 }
 0x32d   : > { %6899 = vmatprep.mubr.bf16.mxu0 %v8609_v2 }
 0x331   : > { %6804 = vmatmul.mubr.bf16.gmra.mxu1 %v8607_v56 }
 0x332   : > { %6807 = vmatprep.mubr.bf16.mxu1 %v8609_v2 }
 0x334   : > { %6900 = vmatmul.mubr.bf16.gmra.mxu0 %v8615_v8 }
 0x335   : > { %6903 = vmatprep.mubr.bf16.mxu0 %v8629_v42 }
 0x339   : > { %6808 = vmatmul.mubr.bf16.gmra.mxu1 %v8615_v8 }
 0x33a   : > { %6827 = vmatprep.mubr.bf16.mxu1 %v8617_v57 }
 0x33c   : > { %6904 = vmatmul.mubr.bf16.gmra.mxu0 %v8635_v58 }
 0x33d   : > { %6971 = vmatprep.mubr.bf16.mxu0 %v8617_v57 }
 0x341   : > { %6828 = vmatmul.mubr.bf16.vlgmr.msra.gmra.mxu1 %v8623_v6 }
 0x342   : > { %6908 = vmatpush3.bf16.msra.mxu1 %v7471_v16  ;;  %6831 = vmatprep.mubr.bf16.mxu1 %v8561_v44  ;;  %v7509_v16 = vld [vmem:[#allocation8 + $0xa0] sm:$0xff]  }
 0x343   : > { %6909 = vmatprep.subr.bf16.mxu1 %v7472_v17 }
 0x344   : > { %6972 = vmatmul.mubr.bf16.vlgmr.msra.gmra.mxu0 %v8623_v6 }
 0x345   : > { %6975 = vmatprep.mubr.bf16.mxu0 %v8561_v44  ;;  %7052 = vmatpush3.bf16.msra.mxu0 %v7492_v0 }
 0x346   : > { %6910 = vmatpush3.bf16.msra.mxu1 %v7472_v17  ;;  %7053 = vmatprep.subr.bf16.mxu0 %v7494_v25 }
 0x347   : > { %6911 = vmatprep.subr.bf16.mxu1 %v7473_v31 }
 0x349   : > { %6832 = vmatmul.mubr.bf16.gmra.mxu1 %v8567_v11  ;;  %7054 = vmatpush3.bf16.msra.mxu0 %v7494_v25 }
 0x34a   : > { %6835 = vmatprep.mubr.bf16.mxu1 %v8564_v1  ;;  %6912 = vmatpush3.bf16.msra.mxu1 %v7473_v31  ;;  %v7515_v31 = vld [vmem:[#allocation8 + $0x88] sm:$0xff]  }
 0x34b   : > { %6913 = vmatprep.subr.bf16.mxu1 %v7475_v43  ;;  %7055 = vmatprep.subr.bf16.mxu0 %v7496_v26 }
 0x34c   : > { %6976 = vmatmul.mubr.bf16.gmra.mxu0 %v8567_v11 }
 0x34d   : > { %6979 = vmatprep.mubr.bf16.mxu0 %v8564_v1  ;;  %7056 = vmatpush3.bf16.msra.mxu0 %v7496_v26 }
 0x34e   : > { %6914 = vmatpush3.bf16.msra.mxu1 %v7475_v43  ;;  %7057 = vmatprep.subr.bf16.mxu0 %v7498_v3 }
 0x34f   : > { %6915 = vmatprep.subr.bf16.mxu1 %v7477_v33 }
 0x351   : > { %6836 = vmatmul.mubr.bf16.gmra.mxu1 %v8571_v60  ;;  %7058 = vmatpush3.bf16.msra.mxu0 %v7498_v3 }
 0x352   : > { %6839 = vmatprep.mubr.bf16.mxu1 %v8573_v49  ;;  %6916 = vmatpush3.bf16.msra.mxu1 %v7477_v33 }
 0x353   : > { %6917 = vmatprep.subr.bf16.mxu1 %v7479_v52  ;;  %7059 = vmatprep.subr.bf16.mxu0 %v7500_v61 }
 0x354   : > { %6980 = vmatmul.mubr.bf16.gmra.mxu0 %v8571_v60 }
 0x355   : > { %6983 = vmatprep.mubr.bf16.mxu0 %v8573_v49  ;;  %7060 = vmatpush3.bf16.msra.mxu0 %v7500_v61 }
 0x356   : > { %6918 = vmatpush3.bf16.msra.mxu1 %v7479_v52  ;;  %7061 = vmatprep.subr.bf16.mxu0 %v7501_v34  ;;  %v7518_v52 = vld [vmem:[#allocation8 + $0x80] sm:$0xff]  }
 0x357   : > { %6919 = vmatprep.subr.bf16.mxu1 %v7481_v50 }
 0x359   : > { %6840 = vmatmul.mubr.bf16.gmra.mxu1 %v8577_v35  ;;  %7062 = vmatpush3.bf16.msra.mxu0 %v7501_v34 }
 0x35a   : > { %6843 = vmatprep.mubr.bf16.mxu1 %v8579_v29  ;;  %6920 = vmatpush3.bf16.msra.mxu1 %v7481_v50 }
 0x35b   : > { %6921 = vmatprep.subr.bf16.mxu1 %v7486_v53  ;;  %7063 = vmatprep.subr.bf16.mxu0 %v7503_v37 }
 0x35c   : > { %6984 = vmatmul.mubr.bf16.gmra.mxu0 %v8577_v35 }
 0x35d   : > { %6987 = vmatprep.mubr.bf16.mxu0 %v8579_v29  ;;  %7064 = vmatpush3.bf16.msra.mxu0 %v7503_v37 }
 0x35e   : > { %6922 = vmatpush3.bf16.msra.mxu1 %v7486_v53  ;;  %7065 = vmatprep.subr.bf16.mxu0 %v7504_v38 }
 0x35f   : > { %7003 = vmatprep.subr.bf16.mxu1 %v7489_v9 }
 0x361   : > { %6844 = vmatmul.mubr.bf16.gmra.mxu1 %v8583_v47  ;;  %7066 = vmatpush3.bf16.msra.mxu0 %v7504_v38 }
 0x362   : > { %6847 = vmatprep.mubr.bf16.mxu1 %v8585_v19  ;;  %7147 = vmatprep.subr.bf16.mxu0 %v8657_v36 }
 0x364   : > { %6988 = vmatmul.mubr.bf16.gmra.mxu0 %v8583_v47 }
 0x365   : > { %6991 = vmatprep.mubr.bf16.mxu0 %v8585_v19 }
 0x369   : > { %6848 = vmatmul.mubr.bf16.gmra.mxu1 %v8591_v21 }
 0x36a   : > { %6851 = vmatprep.mubr.bf16.mxu1 %v8593_v32 }
 0x36c   : > { %6992 = vmatmul.mubr.bf16.gmra.mxu0 %v8591_v21 }
 0x36d   : > { %6995 = vmatprep.mubr.bf16.mxu0 %v8593_v32 }
 0x371   : > { %6852 = vmatmul.mubr.bf16.gmra.mxu1 %v8599_v62 }
 0x372   : > { %6855 = vmatprep.mubr.bf16.mxu1 %v8601_v39 }
 0x374   : > { %6996 = vmatmul.mubr.bf16.gmra.mxu0 %v8599_v62 }
 0x375   : > { %6999 = vmatprep.mubr.bf16.mxu0 %v8601_v39 }
 0x379   : > { %6856 = vmatmul.mubr.bf16.gmra.mxu1 %v8607_v56 }
 0x37a   : > { %6923 = vmatprep.mubr.bf16.mxu1 %v8561_v44 }
 0x37c   : > { %7000 = vmatmul.mubr.bf16.gmra.mxu0 %v8607_v56 }
 0x37d   : > { %7067 = vmatprep.mubr.bf16.mxu0 %v8561_v44  ;;  %v7505_v44 = vld [vmem:[#allocation8 + $0xb8] sm:$0xff]  }
 0x381   : > { %6924 = vmatmul.mubr.bf16.vlgmr.msra.gmra.mxu1 %v8567_v11 }
 0x382   : > { %7004 = vmatpush3.bf16.msra.mxu1 %v7489_v9  ;;  %6927 = vmatprep.mubr.bf16.mxu1 %v8564_v1 }
 0x383   : > { %7005 = vmatprep.subr.bf16.mxu1 %v7490_v59 }
 0x384   : > { %7068 = vmatmul.mubr.bf16.vlgmr.msra.gmra.mxu0 %v8567_v11  ;;  %v8689_v11 = vld [vmem:[#allocation8 + $0x220] sm:$0xff]  }
 0x385   : > { %7071 = vmatprep.mubr.bf16.mxu0 %v8564_v1  ;;  %7148 = vmatpush3.bf16.msra.mxu0 %v8657_v36 }
 0x386   : > { %7006 = vmatpush3.bf16.msra.mxu1 %v7490_v59  ;;  %7149 = vmatprep.subr.bf16.mxu0 %v8677_v40 }
 0x387   : > { %7007 = vmatprep.subr.bf16.mxu1 %v7491_v15 }
 0x389   : > { %6928 = vmatmul.mubr.bf16.gmra.mxu1 %v8571_v60  ;;  %7150 = vmatpush3.bf16.msra.mxu0 %v8677_v40 }
 0x38a   : > { %6931 = vmatprep.mubr.bf16.mxu1 %v8573_v49  ;;  %7008 = vmatpush3.bf16.msra.mxu1 %v7491_v15 }
 0x38b   : > { %7009 = vmatprep.subr.bf16.mxu1 %v7493_v48  ;;  %7151 = vmatprep.subr.bf16.mxu0 %v8684_v27 }
 0x38c   : > { %7072 = vmatmul.mubr.bf16.gmra.mxu0 %v8571_v60 }
 0x38d   : > { %7075 = vmatprep.mubr.bf16.mxu0 %v8573_v49  ;;  %7152 = vmatpush3.bf16.msra.mxu0 %v8684_v27 }
 0x38e   : > { %7010 = vmatpush3.bf16.msra.mxu1 %v7493_v48  ;;  %7153 = vmatprep.subr.bf16.mxu0 %v8689_v11 }
 0x38f   : > { %7011 = vmatprep.subr.bf16.mxu1 %v7495_v28 }
 0x391   : > { %6932 = vmatmul.mubr.bf16.gmra.mxu1 %v8577_v35  ;;  %7154 = vmatpush3.bf16.msra.mxu0 %v8689_v11 }
 0x392   : > { %6935 = vmatprep.mubr.bf16.mxu1 %v8579_v29  ;;  %7012 = vmatpush3.bf16.msra.mxu1 %v7495_v28 }
 0x393   : > { %7013 = vmatprep.subr.bf16.mxu1 %v7497_v30  ;;  %7155 = vmatprep.subr.bf16.mxu0 %v8696_v7 }
 0x394   : > { %7076 = vmatmul.mubr.bf16.gmra.mxu0 %v8577_v35 }
 0x395   : > { %7079 = vmatprep.mubr.bf16.mxu0 %v8579_v29  ;;  %7156 = vmatpush3.bf16.msra.mxu0 %v8696_v7 }
 0x396   : > { %7014 = vmatpush3.bf16.msra.mxu1 %v7497_v30  ;;  %7157 = vmatprep.subr.bf16.mxu0 %v8701_v4 }
 0x397   : > { %7015 = vmatprep.subr.bf16.mxu1 %v7499_v55 }
 0x399   : > { %6936 = vmatmul.mubr.bf16.gmra.mxu1 %v8583_v47  ;;  %7158 = vmatpush3.bf16.msra.mxu0 %v8701_v4 }
 0x39a   : > { %6939 = vmatprep.mubr.bf16.mxu1 %v8585_v19  ;;  %7016 = vmatpush3.bf16.msra.mxu1 %v7499_v55 }
 0x39b   : > { %7017 = vmatprep.subr.bf16.mxu1 %v7502_v18  ;;  %7159 = vmatprep.subr.bf16.mxu0 %v8708_v63 }
 0x39c   : > { %7080 = vmatmul.mubr.bf16.gmra.mxu0 %v8583_v47 }
 0x39d   : > { %7083 = vmatprep.mubr.bf16.mxu0 %v8585_v19  ;;  %7160 = vmatpush3.bf16.msra.mxu0 %v8708_v63 }
 0x39e   : > { %7018 = vmatpush3.bf16.msra.mxu1 %v7502_v18  ;;  %7161 = vmatprep.subr.bf16.mxu0 %v8713_v51 }
 0x39f   : > { %7099 = vmatprep.subr.bf16.mxu1 %v7505_v44 }
 0x3a1   : > { %6940 = vmatmul.mubr.bf16.gmra.mxu1 %v8591_v21  ;;  %7162 = vmatpush3.bf16.msra.mxu0 %v8713_v51 }
 0x3a2   : > { %6943 = vmatprep.mubr.bf16.mxu1 %v8593_v32 }
 0x3a4   : > { %7084 = vmatmul.mubr.bf16.gmra.mxu0 %v8591_v21 }
 0x3a5   : > { %7087 = vmatprep.mubr.bf16.mxu0 %v8593_v32 }
 0x3a9   : > { %6944 = vmatmul.mubr.bf16.gmra.mxu1 %v8599_v62 }
 0x3aa   : > { %6947 = vmatprep.mubr.bf16.mxu1 %v8601_v39 }
 0x3ac   : > { %7088 = vmatmul.mubr.bf16.gmra.mxu0 %v8599_v62 }
 0x3ad   : > { %7091 = vmatprep.mubr.bf16.mxu0 %v8601_v39 }
 0x3b1   : > { %6948 = vmatmul.mubr.bf16.gmra.mxu1 %v8607_v56 }
 0x3b2   : > { %6951 = vmatprep.mubr.bf16.mxu1 %v8609_v2 }
 0x3b4   : > { %7092 = vmatmul.mubr.bf16.gmra.mxu0 %v8607_v56 }
 0x3b5   : > { %7095 = vmatprep.mubr.bf16.mxu0 %v8609_v2 }
 0x3b9   : > { %6952 = vmatmul.mubr.bf16.gmra.mxu1 %v8615_v8 }
 0x3ba   : > { %7019 = vmatprep.mubr.bf16.mxu1 %v8564_v1 }
 0x3bc   : > { %7096 = vmatmul.mubr.bf16.gmra.mxu0 %v8615_v8 }
 0x3bd   : > { %7163 = vmatprep.mubr.bf16.mxu0 %v8564_v1 }
 0x3c1   : > { %v8726_v54 = vpop.f32.mrf.mxu1  ;;  %7020 = vmatmul.mubr.bf16.vlgmr.msra.gmra.mxu1 %v8571_v60 }
 0x3c2   : > { %7100 = vmatpush3.bf16.msra.mxu1 %v7505_v44  ;;  %7023 = vmatprep.mubr.bf16.mxu1 %v8573_v49 }
 0x3c3   : > { %v8731_v12 = vpop.f32.mrf.mxu1  ;;  %7101 = vmatprep.subr.bf16.mxu1 %v7506_v10 }
 0x3c4   : > { %v8755_v50 = vpop.f32.mrf.mxu0  ;;  %7164 = vmatmul.mubr.bf16.vlgmr.msra.gmra.mxu0 %v8571_v60 }
 0x3c5   : > { %v6782_v14 = vpop.f32.mrf.mxu1  ;;  %7167 = vmatprep.mubr.bf16.mxu0 %v8573_v49 }
 0x3c6   : > { %7102 = vmatpush3.bf16.msra.mxu1 %v7506_v10  ;;  %v8763_v1 = vpop.f32.mrf.mxu0 }
 0x3c7   : > { %v8733_v5 = vpop.f32.mrf.mxu1  ;;  %7103 = vmatprep.subr.bf16.mxu1 %v7507_v22 }
 0x3c8   : > { %v6878_v9 = vpop.f32.mrf.mxu0 }
 0x3c9   : > { %v8736_v24 = vpop.f32.mrf.mxu1  ;;  %7024 = vmatmul.mubr.bf16.gmra.mxu1 %v8577_v35 }
 0x3ca   : > { %7027 = vmatprep.mubr.bf16.mxu1 %v8579_v29  ;;  %7104 = vmatpush3.bf16.msra.mxu1 %v7507_v22  ;;  %v8767_v3 = vpop.f32.mrf.mxu0 }
 0x3cb   : > { %v8741_v41 = vpop.f32.mrf.mxu1  ;;  %7105 = vmatprep.subr.bf16.mxu1 %v7509_v16 }
 0x3cc   : > { %v8772_v61 = vpop.f32.mrf.mxu0  ;;  %7168 = vmatmul.mubr.bf16.gmra.mxu0 %v8577_v35 }
 0x3cd   : > { %v6786_v45 = vpop.f32.mrf.mxu1  ;;  %7171 = vmatprep.mubr.bf16.mxu0 %v8579_v29 }
 0x3ce   : > { %7106 = vmatpush3.bf16.msra.mxu1 %v7509_v16  ;;  %v8780_v34 = vpop.f32.mrf.mxu0 }
 0x3cf   : > { %v8743_v13 = vpop.f32.mrf.mxu1  ;;  %7107 = vmatprep.subr.bf16.mxu1 %v7511_v23 }
 0x3d0   : > { %v6882_v38 = vpop.f32.mrf.mxu0 }
 0x3d1   : > { %v8746_v0 = vpop.f32.mrf.mxu1  ;;  %7028 = vmatmul.mubr.bf16.gmra.mxu1 %v8583_v47 }
 0x3d2   : > { %7031 = vmatprep.mubr.bf16.mxu1 %v8585_v19  ;;  %7108 = vmatpush3.bf16.msra.mxu1 %v7511_v23  ;;  %v8784_v15 = vpop.f32.mrf.mxu0 }
 0x3d3   : > { %v8751_v17 = vpop.f32.mrf.mxu1  ;;  %7109 = vmatprep.subr.bf16.mxu1 %v7513_v46 }
 0x3d4   : > { %v8788_v28 = vpop.f32.mrf.mxu0  ;;  %7172 = vmatmul.mubr.bf16.gmra.mxu0 %v8583_v47 }
 0x3d5   : > { %v6790_v43 = vpop.f32.mrf.mxu1  ;;  %7175 = vmatprep.mubr.bf16.mxu0 %v8585_v19 }
 0x3d6   : > { %7110 = vmatpush3.bf16.msra.mxu1 %v7513_v46  ;;  %v8796_v29 = vpop.f32.mrf.mxu0 }
 0x3d7   : > { %v8753_v33 = vpop.f32.mrf.mxu1  ;;  %7111 = vmatprep.subr.bf16.mxu1 %v7515_v31 }
 0x3d8   : > { %v6886_v55 = vpop.f32.mrf.mxu0 }
 0x3d9   : > { %v8758_v53 = vpop.f32.mrf.mxu1  ;;  %7032 = vmatmul.mubr.bf16.gmra.mxu1 %v8591_v21 }
 0x3da   : > { %7035 = vmatprep.mubr.bf16.mxu1 %v8593_v32  ;;  %7112 = vmatpush3.bf16.msra.mxu1 %v7515_v31  ;;  %v8800_v44 = vpop.f32.mrf.mxu0 }
 0x3db   : > { %v8765_v25 = vpop.f32.mrf.mxu1  ;;  %7113 = vmatprep.subr.bf16.mxu1 %v7518_v52 }
 0x3dc   : > { %v8804_v22 = vpop.f32.mrf.mxu0  ;;  %7176 = vmatmul.mubr.bf16.gmra.mxu0 %v8591_v21 }
 0x3dd   : > { %v6794_v26 = vpop.f32.mrf.mxu1  ;;  %7179 = vmatprep.mubr.bf16.mxu0 %v8593_v32 }
 0x3de   : > { %7114 = vmatpush3.bf16.msra.mxu1 %v7518_v52  ;;  %v8812_v16 = vpop.f32.mrf.mxu0 }
 0x3df   : > { %v8769_v60 = vpop.f32.mrf.mxu1  ;;  %7195 = vmatprep.subr.bf16.mxu1 %v8657_v36 }
 0x3e0   : > { %v6890_v45 = vpop.f32.mrf.mxu0 }
 0x3e1   : > { %v8775_v49 = vpop.f32.mrf.mxu1  ;;  %7036 = vmatmul.mubr.bf16.gmra.mxu1 %v8599_v62 }
 0x3e2   : > { %7039 = vmatprep.mubr.bf16.mxu1 %v8601_v39  ;;  %v8816_v31 = vpop.f32.mrf.mxu0 }
 0x3e3   : > { %v8782_v37 = vpop.f32.mrf.mxu1 }
 0x3e4   : > { %v8820_v52 = vpop.f32.mrf.mxu0  ;;  %7180 = vmatmul.mubr.bf16.gmra.mxu0 %v8599_v62 }
 0x3e5   : > { %v6798_v59 = vpop.f32.mrf.mxu1  ;;  %7183 = vmatprep.mubr.bf16.mxu0 %v8601_v39 }
 0x3e6   : > { %v8828_v26 = vpop.f32.mrf.mxu0 }
 0x3e7   : > { %v8786_v48 = vpop.f32.mrf.mxu1 }
 0x3e8   : > { %v6894_v59 = vpop.f32.mrf.mxu0 }
 0x3e9   : > { %v8791_v35 = vpop.f32.mrf.mxu1  ;;  %7040 = vmatmul.mubr.bf16.gmra.mxu1 %v8607_v56 }
 0x3ea   : > { %7043 = vmatprep.mubr.bf16.mxu1 %v8609_v2 }
 0x3eb   : > { %v8798_v30 = vpop.f32.mrf.mxu1 }
 0x3ec   : > { %7184 = vmatmul.mubr.bf16.gmra.mxu0 %v8607_v56 }
 0x3ed   : > { %v6802_v18 = vpop.f32.mrf.mxu1  ;;  %7187 = vmatprep.mubr.bf16.mxu0 %v8609_v2 }
 0x3ee   : > { %v8832_v18 = vpop.f32.mrf.mxu0 }
 0x3ef   : > { %v8802_v10 = vpop.f32.mrf.mxu1 }
 0x3f1   : > { %v8807_v14 = vpop.f32.mrf.mxu1  ;;  %7044 = vmatmul.mubr.bf16.gmra.mxu1 %v8615_v8 }
 0x3f2   : > { %7047 = vmatprep.mubr.bf16.mxu1 %v8629_v42 }
 0x3f3   : > { %v8814_v23 = vpop.f32.mrf.mxu1 }
 0x3f4   : > { %7188 = vmatmul.mubr.bf16.gmra.mxu0 %v8615_v8 }
 0x3f5   : > { %v6806_v46 = vpop.f32.mrf.mxu1 }
 0x3f6   : > { %v8836_v46 = vpop.f32.mrf.mxu0 }
 0x3f7   : > { %v8818_v43 = vpop.f32.mrf.mxu1 }
 0x3f8   : > { %v8843_v59 = vpop.f32.mrf.mxu0 }
 0x3f9   : > { %v8823_v9 = vpop.f32.mrf.mxu1  ;;  %7048 = vmatmul.mubr.bf16.gmra.mxu1 %v8635_v58  ;;  %v7521_v58 = vld [vmem:[#allocation3 + $0x10] sm:$0xff]  }
 0x3fa   : > { %9424 = vst [vmem:[#allocation24_spill] sm:$0xff] %v8823_v9  ;;  %7115 = vmatprep.mubr.bf16.mxu1 %v8617_v57  ;;  %v6898_v9 = vpop.f32.mrf.mxu0 }
 0x3fb   : > { %v8830_v38 = vpop.f32.mrf.mxu1 }
 0x3fc   : > { %9425 = vst [vmem:[#allocation25_spill] sm:$0xff] %v8830_v38  ;;  %v8850_v2 = vpop.f32.mrf.mxu0 }
 0x3fd   : > { %v6810_v55 = vpop.f32.mrf.mxu1 }
 0x3ff   : > { %v8834_v45 = vpop.f32.mrf.mxu1 }
 0x400   : > { %9426 = vst [vmem:[#allocation26_spill] sm:$0xff] %v8834_v45 }
 0x401   : > { %v6829_v42 = vpop.f32.mrf.mxu1  ;;  %7116 = vmatmul.mubr.bf16.vlgmr.msra.gmra.mxu1 %v8623_v6 }
 0x402   : > { %v3552_v57 = vadd.f32 %v6829_v42, %v8726_v54  ;;  %7203 = vmatpush3.bf16.msra.mxu1 %v8657_v36  ;;  %7119 = vmatprep.mubr.bf16.mxu1 %v7521_v58  ;;  %v8854_v36 = vpop.f32.mrf.mxu0 }
 0x403   : > { %v3543_v55 = vpop.f32.mrf.mxu1  ;;  %7196 = vmatprep.subr.bf16.mxu1 %v8677_v40 }
 0x404   : > { %v3894_v45 = vadd.f32 %v8755_v50, %v3552_v57  ;;  %v3544_v38 = vadd.f32 %v3543_v55, %v8731_v12  ;;  %v7522_v50 = vld [vmem:[#allocation3 + $0x18] sm:$0xff]  }
 0x405   : > { %v6830_v56 = vpop.f32.mrf.mxu1 }
 0x406   : > { %v3892_v6 = vadd.f32 %v8763_v1, %v3544_v38  ;;  %7204 = vmatpush3.bf16.msra.mxu1 %v8677_v40  ;;  %v7523_v1 = vld [vmem:[#allocation3 + $0x20] sm:$0xff]   ;;  %v8860_v40 = vpop.f32.mrf.mxu0  ;;  %v3918_v9 = vrot.slane %v3894_v45, 7 }
 0x407   : > { %v3546_v42 = vpop.f32.mrf.mxu1  ;;  %7197 = vmatprep.subr.bf16.mxu1 %v8684_v27 }
 0x408   : > { %v3547_v58 = vadd.f32 %v3546_v42, %v8733_v5  ;;  %v3916_v5 = vrot.slane %v3892_v6, 7  ;;  %v6902_v42 = vpop.f32.mrf.mxu0 }
 0x409   : > { %v6833_v54 = vpop.f32.mrf.mxu1  ;;  %7120 = vmatmul.mubr.bf16.gmra.mxu1 %v7522_v50 }
 0x40a   : > { %v3893_v56 = vadd.f32 %v8767_v3, %v3547_v58  ;;  %v3567_v12 = vadd.f32 %v6833_v54, %v8736_v24  ;;  %7123 = vmatprep.mubr.bf16.mxu1 %v7523_v1  ;;  %7205 = vmatpush3.bf16.msra.mxu1 %v8684_v27  ;;  %v8867_v58 = vpop.f32.mrf.mxu0  ;;  %v7524_v54 = vld [vmem:[#allocation3 + $0x28] sm:$0xff]  }
 0x40b   : > { %v3558_v38 = vpop.f32.mrf.mxu1  ;;  %7198 = vmatprep.subr.bf16.mxu1 %v8689_v11 }
 0x40c   : > { %v3917_v57 = vrot.slane %v3893_v56, 7  ;;  %v3897_v8 = vadd.f32 %v8772_v61, %v3567_v12  ;;  %v3559_v55 = vadd.f32 %v3558_v38, %v8741_v41  ;;  %v8879_v61 = vpop.f32.mrf.mxu0  ;;  %v7525_v56 = vld [vmem:[#allocation3 + $0x30] sm:$0xff]  }
 0x40d   : > { %v6834_v3 = vpop.f32.mrf.mxu1 }
 0x40e   : > { %v3895_v24 = vadd.f32 %v8780_v34, %v3559_v55  ;;  %7206 = vmatpush3.bf16.msra.mxu1 %v8689_v11  ;;  %v8871_v27 = vsel %vm1262_vm0, %v3917_v57, %v3918_v9  ;;  %v8875_v45 = vsel %vm1262_vm0, %v3916_v5, %v3917_v57  ;;  %v8884_v12 = vpop.f32.mrf.mxu0  ;;  %v3921_v1 = vrot.slane %v3897_v8, 7 }
 0x40f   : > { %v3561_v6 = vpop.f32.mrf.mxu1  ;;  %7199 = vmatprep.subr.bf16.mxu1 %v8696_v7 }
 0x410   : > { %v3562_v41 = vadd.f32 %v3561_v6, %v8743_v13  ;;  %v3919_v13 = vrot.slane %v3895_v24, 7  ;;  %v6906_v55 = vpop.f32.mrf.mxu0  ;;  %v7526_v24 = vld [vmem:[#allocation3 + $0x38] sm:$0xff]  }
 0x411   : > { %v6837_v34 = vpop.f32.mrf.mxu1  ;;  %7124 = vmatmul.mubr.bf16.gmra.mxu1 %v7524_v54 }
 0x412   : > { %v3896_v11 = vadd.f32 %v8784_v15, %v3562_v41  ;;  %v3582_v50 = vadd.f32 %v6837_v34, %v8746_v0  ;;  %7127 = vmatprep.mubr.bf16.mxu1 %v7525_v56  ;;  %7207 = vmatpush3.bf16.msra.mxu1 %v8696_v7  ;;  %v8891_v42 = vpop.f32.mrf.mxu0  ;;  %v7527_v41 = vld [vmem:[#allocation3 + $0x40] sm:$0xff]  }
 0x413   : > { %v3573_v9 = vpop.f32.mrf.mxu1  ;;  %7200 = vmatprep.subr.bf16.mxu1 %v8701_v4 }
 0x414   : > { %v3920_v38 = vrot.slane %v3896_v11, 7  ;;  %v3900_v5 = vadd.f32 %v8788_v28, %v3582_v50  ;;  %v3574_v57 = vadd.f32 %v3573_v9, %v8751_v17  ;;  %v8903_v28 = vpop.f32.mrf.mxu0 }
 0x415   : > { %v6838_v15 = vpop.f32.mrf.mxu1 }
 0x416   : > { %v3898_v0 = vadd.f32 %v8796_v29, %v3574_v57  ;;  %7208 = vmatpush3.bf16.msra.mxu1 %v8701_v4  ;;  %v8895_v7 = vsel %vm1262_vm0, %v3920_v38, %v3921_v1  ;;  %v8899_v8 = vsel %vm1262_vm0, %v3919_v13, %v3920_v38  ;;  %v4265_v34 = vpop.f32.mrf.mxu0  ;;  %v3924_v54 = vrot.slane %v3900_v5, 7 }
 0x417   : > { %v3576_v3 = vpop.f32.mrf.mxu1  ;;  %7201 = vmatprep.subr.bf16.mxu1 %v8708_v63 }
 0x418   : > { %v3577_v17 = vadd.f32 %v3576_v3, %v8753_v33  ;;  %v3922_v50 = vrot.slane %v3898_v0, 7  ;;  %v6974_v9 = vpop.f32.mrf.mxu0 }
 0x419   : > { %v6841_v29 = vpop.f32.mrf.mxu1  ;;  %7128 = vmatmul.mubr.bf16.gmra.mxu1 %v7526_v24 }
 0x41a   : > { %v3899_v4 = vadd.f32 %v8800_v44, %v3577_v17  ;;  %v3597_v6 = vadd.f32 %v6841_v29, %v8758_v53  ;;  %7131 = vmatprep.mubr.bf16.mxu1 %v7527_v41  ;;  %7209 = vmatpush3.bf16.msra.mxu1 %v8708_v63  ;;  %v8913_v53 = vpop.f32.mrf.mxu0 }
 0x41b   : > { %v3588_v11 = vpop.f32.mrf.mxu1  ;;  %7202 = vmatprep.subr.bf16.mxu1 %v8713_v51 }
 0x41c   : > { %v3923_v33 = vrot.slane %v3899_v4, 7  ;;  %v3903_v56 = vadd.f32 %v8804_v22, %v3597_v6  ;;  %v3589_v1 = vadd.f32 %v3588_v11, %v8765_v25  ;;  %v8924_v25 = vpop.f32.mrf.mxu0 }
 0x41d   : > { %v6842_v13 = vpop.f32.mrf.mxu1 }
 0x41e   : > { %v3901_v44 = vadd.f32 %v8812_v16, %v3589_v1  ;;  %7210 = vmatpush3.bf16.msra.mxu1 %v8713_v51  ;;  %v8917_v63 = vsel %vm1262_vm0, %v3923_v33, %v3924_v54  ;;  %v8921_v38 = vsel %vm1262_vm0, %v3922_v50, %v3923_v33  ;;  %v4279_v55 = vpop.f32.mrf.mxu0  ;;  %v3927_v15 = vrot.slane %v3903_v56, 7 }
 0x41f   : > { %v3591_v5 = vpop.f32.mrf.mxu1 }
 0x420   : > { %v3592_v22 = vadd.f32 %v3591_v5, %v8769_v60  ;;  %v3925_v3 = vrot.slane %v3901_v44, 7  ;;  %v6978_v24 = vpop.f32.mrf.mxu0 }
 0x421   : > { %v6845_v57 = vpop.f32.mrf.mxu1  ;;  %7132 = vmatmul.mubr.bf16.gmra.mxu1 %v8583_v47  ;;  %v9427_v24 = vld [vmem:[#allocation21_spill] sm:$0xff] }
 0x422   : > { %v3902_v51 = vadd.f32 %v8816_v31, %v3592_v22  ;;  %v3612_v16 = vadd.f32 %v6845_v57, %v8775_v49  ;;  %7135 = vmatprep.mubr.bf16.mxu1 %v8585_v19  ;;  %v8941_v31 = vpop.f32.mrf.mxu0 }
 0x423   : > { %v3603_v0 = vpop.f32.mrf.mxu1 }
 0x424   : > { %v3926_v17 = vrot.slane %v3902_v51, 7  ;;  %v3906_v29 = vadd.f32 %v8820_v52, %v3612_v16  ;;  %v3604_v60 = vadd.f32 %v3603_v0, %v8782_v37  ;;  %v8944_v52 = vpop.f32.mrf.mxu0 }
 0x425   : > { %v6846_v4 = vpop.f32.mrf.mxu1 }
 0x426   : > { %v8934_v47 = vsel %vm1262_vm0, %v3926_v17, %v3927_v15  ;;  %v8938_v49 = vsel %vm1262_vm0, %v3925_v3, %v3926_v17  ;;  %v3904_v19 = vadd.f32 %v8828_v26, %v3604_v60  ;;  %v4293_v11 = vpop.f32.mrf.mxu0  ;;  %v3930_v50 = vrot.slane %v3906_v29, 7 }
 0x427   : > { %v3606_v6 = vpop.f32.mrf.mxu1 }
 0x428   : > { %v3607_v41 = vadd.f32 %v3606_v6, %v8786_v48  ;;  %v3928_v26 = vrot.slane %v3904_v19, 7  ;;  %v6982_v9 = vpop.f32.mrf.mxu0  ;;  %v9428_v19 = vld [vmem:[#allocation24_spill] sm:$0xff] }
 0x429   : > { %v6849_v37 = vpop.f32.mrf.mxu1  ;;  %7136 = vmatmul.mubr.bf16.gmra.mxu1 %v8591_v21 }
 0x42a   : > { %v3905_v34 = vadd.f32 %v8832_v18, %v3607_v41  ;;  %v3627_v54 = vadd.f32 %v6849_v37, %v8791_v35  ;;  %7139 = vmatprep.mubr.bf16.mxu1 %v8593_v32  ;;  %v8961_v18 = vpop.f32.mrf.mxu0  ;;  %v9429_v41 = vld [vmem:[#allocation22_spill] sm:$0xff] }
 0x42b   : > { %v3618_v33 = vpop.f32.mrf.mxu1 }
 0x42c   : > { %v3929_v56 = vrot.slane %v3905_v34, 7  ;;  %v3909_v1 = vadd.f32 %v8836_v46, %v3627_v54  ;;  %v3619_v48 = vadd.f32 %v3618_v33, %v8798_v30  ;;  %v8964_v46 = vpop.f32.mrf.mxu0  ;;  %v9430_v33 = vld [vmem:[#allocation25_spill] sm:$0xff] }
 0x42d   : > { %v6850_v13 = vpop.f32.mrf.mxu1 }
 0x42e   : > { %v8954_v21 = vsel %vm1262_vm0, %v3929_v56, %v3930_v50  ;;  %v8958_v35 = vsel %vm1262_vm0, %v3928_v26, %v3929_v56  ;;  %v3907_v32 = vadd.f32 %v8843_v59, %v3619_v48  ;;  %v4307_v51 = vpop.f32.mrf.mxu0  ;;  %v3933_v16 = vrot.slane %v3909_v1, 7 }
 0x42f   : > { %v3621_v44 = vpop.f32.mrf.mxu1 }
 0x430   : > { %v3622_v5 = vadd.f32 %v3621_v44, %v8802_v10  ;;  %v3931_v59 = vrot.slane %v3907_v32, 7  ;;  %v6986_v3 = vpop.f32.mrf.mxu0  ;;  %v9431_v32 = vld [vmem:[#allocation26_spill] sm:$0xff] }
 0x431   : > { %v6853_v30 = vpop.f32.mrf.mxu1  ;;  %7140 = vmatmul.mubr.bf16.gmra.mxu1 %v8599_v62 }
 0x432   : > { %v3908_v22 = vadd.f32 %v8850_v2, %v3622_v5  ;;  %v3642_v57 = vadd.f32 %v6853_v30, %v8807_v14  ;;  %7143 = vmatprep.mubr.bf16.mxu1 %v8601_v39  ;;  %v8981_v2 = vpop.f32.mrf.mxu0  ;;  %v9432_v30 = vld [vmem:[#allocation23_spill] sm:$0xff] }
 0x433   : > { %v3633_v55 = vpop.f32.mrf.mxu1 }
 0x434   : > { %v3932_v15 = vrot.slane %v3908_v22, 7  ;;  %v3912_v0 = vadd.f32 %v8854_v36, %v3642_v57  ;;  %v3634_v10 = vadd.f32 %v3633_v55, %v8814_v23  ;;  %v8984_v36 = vpop.f32.mrf.mxu0 }
 0x435   : > { %v6854_v17 = vpop.f32.mrf.mxu1 }
 0x436   : > { %v8974_v62 = vsel %vm1262_vm0, %v3932_v15, %v3933_v16  ;;  %v8978_v14 = vsel %vm1262_vm0, %v3931_v59, %v3932_v15  ;;  %v3910_v39 = vadd.f32 %v8860_v40, %v3634_v10  ;;  %v4321_v37 = vpop.f32.mrf.mxu0  ;;  %v3936_v34 = vrot.slane %v3912_v0, 7 }
 0x437   : > { %v3636_v29 = vpop.f32.mrf.mxu1 }
 0x438   : > { %v3637_v60 = vadd.f32 %v3636_v29, %v8818_v43  ;;  %v3934_v40 = vrot.slane %v3910_v39, 7  ;;  %v6990_v26 = vpop.f32.mrf.mxu0 }
 0x439   : > { %v6857_v23 = vpop.f32.mrf.mxu1  ;;  %7144 = vmatmul.mubr.bf16.gmra.mxu1 %v9427_v24 }
 0x43a   : > { %v3911_v4 = vadd.f32 %v8867_v58, %v3637_v60  ;;  %v3657_v6 = vadd.f32 %v6857_v23, %v9428_v19  ;;  %7191 = vmatprep.mubr.bf16.mxu1 %v9429_v41  ;;  %v4323_v9 = vpop.f32.mrf.mxu0 }
 0x43b   : > { %v3648_v54 = vpop.f32.mrf.mxu1 }
 0x43c   : > { %v3935_v11 = vrot.slane %v3911_v4, 7  ;;  %v3915_v50 = vadd.f32 %v8879_v61, %v3657_v6  ;;  %v3649_v43 = vadd.f32 %v3648_v54, %v9430_v33  ;;  %v6993_v5 = vpop.f32.mrf.mxu0 }
 0x43d   : > { %v6858_v56 = vpop.f32.mrf.mxu1 }
 0x43e   : > { %v8994_v1 = vsel %vm1262_vm0, %v3935_v11, %v3936_v34  ;;  %v8998_v58 = vsel %vm1262_vm0, %v3934_v40, %v3935_v11  ;;  %v3913_v48 = vadd.f32 %v8884_v12, %v3649_v43  ;;  %v4335_v51 = vpop.f32.mrf.mxu0  ;;  %v3939_v55 = vrot.slane %v3915_v50, 7 }
 0x43f   : > { %v3651_v13 = vpop.f32.mrf.mxu1 }
 0x440   : > { %v3652_v44 = vadd.f32 %v3651_v13, %v9431_v32  ;;  %v3937_v59 = vrot.slane %v3913_v48, 7  ;;  %v6994_v0 = vpop.f32.mrf.mxu0 }
 0x441   : > { %v6925_v61 = vpop.f32.mrf.mxu1  ;;  %7192 = vmatmul.mubr.bf16.vlgmr.msra.gmra.mxu1 %v9432_v30 }
 0x442   : > { %v3914_v22 = vadd.f32 %v8891_v42, %v3652_v44  ;;  %v9005_v57 = vadd.f32 %v8903_v28, %v6925_v61  ;;  %v4337_v17 = vpop.f32.mrf.mxu0 }
 0x443   : > { %v4072_v16 = vpop.f32.mrf.mxu1 }
 0x444   : > { %v3938_v15 = vrot.slane %v3914_v22, 7  ;;  %v6997_v39 = vpop.f32.mrf.mxu0 }
 0x445   : > { %v6926_v12 = vpop.f32.mrf.mxu1 }
 0x446   : > { %v9009_v10 = vsel %vm1262_vm0, %v3938_v15, %v3939_v55  ;;  %v9013_v3 = vsel %vm1262_vm0, %v3937_v59, %v3938_v15  ;;  %v4349_v23 = vpop.f32.mrf.mxu0 }
 0x447   : > { %v4074_v42 = vpop.f32.mrf.mxu1 }
 0x448   : > { %v9016_v28 = vadd.f32 %v8913_v53, %v4074_v42  ;;  %v6998_v4 = vpop.f32.mrf.mxu0 }
 0x449   : > { %v6929_v29 = vpop.f32.mrf.mxu1 }
 0x44a   : > { %v9019_v60 = vadd.f32 %v8924_v25, %v6929_v29  ;;  %v4351_v6 = vpop.f32.mrf.mxu0 }
 0x44b   : > { %v4086_v24 = vpop.f32.mrf.mxu1 }
 0x44c   : > { %v7001_v34 = vpop.f32.mrf.mxu0 }
 0x44d   : > { %v6930_v19 = vpop.f32.mrf.mxu1 }
 0x44e   : > { %v4363_v53 = vpop.f32.mrf.mxu0 }
 0x44f   : > { %v4088_v41 = vpop.f32.mrf.mxu1 }
 0x450   : > { %v9022_v37 = vadd.f32 %v8941_v31, %v4088_v41  ;;  %v7002_v50 = vpop.f32.mrf.mxu0 }
 0x451   : > { %v6933_v54 = vpop.f32.mrf.mxu1 }
 0x452   : > { %v9025_v40 = vadd.f32 %v8944_v52, %v6933_v54  ;;  %v4365_v25 = vpop.f32.mrf.mxu0 }
 0x453   : > { %v4100_v11 = vpop.f32.mrf.mxu1 }
 0x454   : > { %v9030_v56 = vpop.f32.mrf.mxu0 }
 0x455   : > { %v6934_v33 = vpop.f32.mrf.mxu1 }
 0x456   : > { %v4734_v13 = vpop.f32.mrf.mxu0 }
 0x457   : > { %v4102_v43 = vpop.f32.mrf.mxu1 }
 0x458   : > { %v9028_v26 = vadd.f32 %v8961_v18, %v4102_v43  ;;  %v9035_v44 = vpop.f32.mrf.mxu0 }
 0x459   : > { %v6937_v48 = vpop.f32.mrf.mxu1 }
 0x45a   : > { %v9033_v31 = vadd.f32 %v8964_v46, %v6937_v48  ;;  %v9037_v61 = vpop.f32.mrf.mxu0 }
 0x45b   : > { %v4114_v32 = vpop.f32.mrf.mxu1 }
 0x45c   : > { %v9042_v51 = vpop.f32.mrf.mxu0 }
 0x45d   : > { %v6938_v52 = vpop.f32.mrf.mxu1 }
 0x45e   : > { %v4749_v55 = vpop.f32.mrf.mxu0 }
 0x45f   : > { %v4116_v30 = vpop.f32.mrf.mxu1 }
 0x460   : > { %v9040_v22 = vadd.f32 %v8981_v2, %v4116_v30  ;;  %v9047_v59 = vpop.f32.mrf.mxu0 }
 0x461   : > { %v6941_v18 = vpop.f32.mrf.mxu1 }
 0x462   : > { %v9045_v16 = vadd.f32 %v8984_v36, %v6941_v18  ;;  %v9049_v0 = vpop.f32.mrf.mxu0 }
 0x463   : > { %v4128_v46 = vpop.f32.mrf.mxu1 }
 0x464   : > { %v9053_v29 = vpop.f32.mrf.mxu0 }
 0x465   : > { %v6942_v15 = vpop.f32.mrf.mxu1 }
 0x466   : > { %v4764_v24 = vpop.f32.mrf.mxu0 }
 0x467   : > { %v4130_v12 = vpop.f32.mrf.mxu1 }
 0x468   : > { %v9051_v42 = vadd.f32 %v4323_v9, %v4130_v12  ;;  %v9057_v19 = vpop.f32.mrf.mxu0 }
 0x469   : > { %v6945_v2 = vpop.f32.mrf.mxu1 }
 0x46a   : > { %v9055_v23 = vadd.f32 %v6993_v5, %v6945_v2  ;;  %v9059_v41 = vpop.f32.mrf.mxu0 }
 0x46b   : > { %v4142_v4 = vpop.f32.mrf.mxu1 }
 0x46c   : > { %v9063_v11 = vpop.f32.mrf.mxu0 }
 0x46d   : > { %v6946_v36 = vpop.f32.mrf.mxu1 }
 0x46e   : > { %v4779_v33 = vpop.f32.mrf.mxu0 }
 0x46f   : > { %v4144_v54 = vpop.f32.mrf.mxu1 }
 0x470   : > { %v9061_v53 = vadd.f32 %v4337_v17, %v4144_v54  ;;  %v9067_v48 = vpop.f32.mrf.mxu0 }
 0x471   : > { %v6949_v50 = vpop.f32.mrf.mxu1 }
 0x472   : > { %v9065_v9 = vadd.f32 %v6997_v39, %v6949_v50  ;;  %v9069_v13 = vpop.f32.mrf.mxu0 }
 0x473   : > { %v4156_v43 = vpop.f32.mrf.mxu1 }
 0x474   : > { %v9073_v30 = vpop.f32.mrf.mxu0 }
 0x475   : > { %v6950_v5 = vpop.f32.mrf.mxu1 }
 0x476   : > { %v4794_v55 = vpop.f32.mrf.mxu0 }
 0x477   : > { %v4158_v32 = vpop.f32.mrf.mxu1 }
 0x478   : > { %v9071_v52 = vadd.f32 %v4351_v6, %v4158_v32  ;;  %v9077_v15 = vpop.f32.mrf.mxu0 }
 0x479   : > { %v6953_v18 = vpop.f32.mrf.mxu1 }
 0x47a   : > { %v9075_v17 = vadd.f32 %v7001_v34, %v6953_v18  ;;  %v9079_v12 = vpop.f32.mrf.mxu0 }
 0x47b   : > { %v4170_v46 = vpop.f32.mrf.mxu1 }
 0x47c   : > { %v9083_v4 = vpop.f32.mrf.mxu0 }
 0x47d   : > { %v6954_v39 = vpop.f32.mrf.mxu1 }
 0x47e   : > { %v4809_v54 = vpop.f32.mrf.mxu0 }
 0x47f   : > { %v4172_v2 = vpop.f32.mrf.mxu1 }
 0x480   : > { %v9081_v24 = vadd.f32 %v4365_v25, %v4172_v2  ;;  %v9089_v33 = vpop.f32.mrf.mxu0 }
 0x481   : > { %v7021_v36 = vpop.f32.mrf.mxu1 }
 0x482   : > { %v4587_v6 = vadd.f32 %v7021_v36, %v9005_v57  ;;  %v9091_v5 = vpop.f32.mrf.mxu0 }
 0x483   : > { %v4475_v50 = vpop.f32.mrf.mxu1 }
 0x484   : > { %v9087_v34 = vadd.f32 %v4587_v6, %v8871_v27  ;;  %v9094_v25 = vpop.f32.mrf.mxu0 }
 0x485   : > { %v7022_v43 = vpop.f32.mrf.mxu1 }
 0x486   : > { %v4824_v39 = vpop.f32.mrf.mxu0 }
 0x487   : > { %v4477_v32 = vpop.f32.mrf.mxu1 }
 0x488   : > { %v4586_v18 = vadd.f32 %v4477_v32, %v9016_v28  ;;  %v9103_v36 = vpop.f32.mrf.mxu0 }
 0x489   : > { %v7025_v55 = vpop.f32.mrf.mxu1  ;;  %9433 = vst [vmem:[#allocation21_spill] sm:$0xff] %v9103_v36 }
 0x48a   : > { %v9097_v46 = vadd.f32 %v4586_v18, %v8875_v45  ;;  %v4589_v57 = vadd.f32 %v7025_v55, %v9019_v60  ;;  %v9105_v54 = vpop.f32.mrf.mxu0 }
 0x48b   : > { %v4489_v2 = vpop.f32.mrf.mxu1  ;;  %9434 = vst [vmem:[#allocation24_spill] sm:$0xff] %v9105_v54 }
 0x48c   : > { %v9101_v27 = vadd.f32 %v4589_v57, %v8895_v7  ;;  %v9108_v43 = vpop.f32.mrf.mxu0 }
 0x48d   : > { %v7026_v6 = vpop.f32.mrf.mxu1  ;;  %9435 = vst [vmem:[#allocation22_spill] sm:$0xff] %v9108_v43 }
 0x48e   : > { %v4839_v18 = vpop.f32.mrf.mxu0 }
 0x48f   : > { %v4491_v50 = vpop.f32.mrf.mxu1 }
 0x490   : > { %v4588_v28 = vadd.f32 %v4491_v50, %v9022_v37  ;;  %v9117_v57 = vpop.f32.mrf.mxu0 }
 0x491   : > { %v7029_v32 = vpop.f32.mrf.mxu1  ;;  %9436 = vst [vmem:[#allocation25_spill] sm:$0xff] %v9117_v57 }
 0x492   : > { %v9111_v45 = vadd.f32 %v4588_v28, %v8899_v8  ;;  %v4591_v60 = vadd.f32 %v7029_v32, %v9025_v40  ;;  %v9119_v2 = vpop.f32.mrf.mxu0 }
 0x493   : > { %v4503_v55 = vpop.f32.mrf.mxu1  ;;  %9437 = vst [vmem:[#allocation26_spill] sm:$0xff] %v9119_v2 }
 0x494   : > { %v9115_v7 = vadd.f32 %v4591_v60, %v8917_v63  ;;  %v9122_v50 = vpop.f32.mrf.mxu0 }
 0x495   : > { %v7030_v39 = vpop.f32.mrf.mxu1 }
 0x496   : > { %v5153_v28 = vpop.f32.mrf.mxu0 }
 0x497   : > { %v4505_v6 = vpop.f32.mrf.mxu1 }
 0x498   : > { %v4590_v37 = vadd.f32 %v4505_v6, %v9028_v26  ;;  %v9131_v60 = vpop.f32.mrf.mxu0 }
 0x499   : > { %v7033_v43 = vpop.f32.mrf.mxu1 }
 0x49a   : > { %v9125_v8 = vadd.f32 %v4590_v37, %v8921_v38  ;;  %v4593_v40 = vadd.f32 %v7033_v43, %v9033_v31  ;;  %v9133_v55 = vpop.f32.mrf.mxu0 }
 0x49b   : > { %v4517_v32 = vpop.f32.mrf.mxu1 }
 0x49c   : > { %v9129_v63 = vadd.f32 %v4593_v40, %v8934_v47  ;;  %v9136_v6 = vpop.f32.mrf.mxu0 }
 0x49d   : > { %v7034_v18 = vpop.f32.mrf.mxu1 }
 0x49e   : > { %v5168_v43 = vpop.f32.mrf.mxu0 }
 0x49f   : > { %v4519_v39 = vpop.f32.mrf.mxu1 }
 0x4a0   : > { %v4592_v26 = vadd.f32 %v4519_v39, %v9040_v22  ;;  %v9145_v40 = vpop.f32.mrf.mxu0 }
 0x4a1   : > { %v7037_v2 = vpop.f32.mrf.mxu1 }
 0x4a2   : > { %v9139_v38 = vadd.f32 %v4592_v26, %v8938_v49  ;;  %v4595_v31 = vadd.f32 %v7037_v2, %v9045_v16  ;;  %v9147_v32 = vpop.f32.mrf.mxu0 }
 0x4a3   : > { %v4531_v37 = vpop.f32.mrf.mxu1 }
 0x4a4   : > { %v9143_v47 = vadd.f32 %v4595_v31, %v8954_v21  ;;  %v9150_v39 = vpop.f32.mrf.mxu0 }
 0x4a5   : > { %v7038_v28 = vpop.f32.mrf.mxu1 }
 0x4a6   : > { %v5183_v2 = vpop.f32.mrf.mxu0 }
 0x4a7   : > { %v4533_v18 = vpop.f32.mrf.mxu1 }
 0x4a8   : > { %v4594_v22 = vadd.f32 %v4533_v18, %v9051_v42  ;;  %v9159_v31 = vpop.f32.mrf.mxu0 }
 0x4a9   : > { %v7041_v57 = vpop.f32.mrf.mxu1 }
 0x4aa   : > { %v9153_v49 = vadd.f32 %v4594_v22, %v8958_v35  ;;  %v4597_v16 = vadd.f32 %v7041_v57, %v9055_v23  ;;  %v9161_v37 = vpop.f32.mrf.mxu0 }
 0x4ab   : > { %v4545_v26 = vpop.f32.mrf.mxu1 }
 0x4ac   : > { %v9157_v21 = vadd.f32 %v4597_v16, %v8974_v62  ;;  %v9164_v18 = vpop.f32.mrf.mxu0 }
 0x4ad   : > { %v7042_v43 = vpop.f32.mrf.mxu1 }
 0x4ae   : > { %v5198_v57 = vpop.f32.mrf.mxu0 }
 0x4af   : > { %v4547_v28 = vpop.f32.mrf.mxu1 }
 0x4b0   : > { %v4596_v42 = vadd.f32 %v4547_v28, %v9061_v53  ;;  %v9173_v16 = vpop.f32.mrf.mxu0 }
 0x4b1   : > { %v7045_v54 = vpop.f32.mrf.mxu1 }
 0x4b2   : > { %v9167_v35 = vadd.f32 %v4596_v42, %v8978_v14  ;;  %v4599_v23 = vadd.f32 %v7045_v54, %v9065_v9  ;;  %v9175_v26 = vpop.f32.mrf.mxu0 }
 0x4b3   : > { %v4559_v22 = vpop.f32.mrf.mxu1 }
 0x4b4   : > { %v9171_v62 = vadd.f32 %v4599_v23, %v8994_v1  ;;  %v9178_v28 = vpop.f32.mrf.mxu0 }
 0x4b5   : > { %v7046_v2 = vpop.f32.mrf.mxu1 }
 0x4b6   : > { %9438 = vst [vmem:[#allocation23_spill] sm:$0xff] %v9171_v62  ;;  %v5213_v54 = vpop.f32.mrf.mxu0 }
 0x4b7   : > { %v4561_v43 = vpop.f32.mrf.mxu1 }
 0x4b8   : > { %v4598_v53 = vadd.f32 %v4561_v43, %v9071_v52  ;;  %v9187_v23 = vpop.f32.mrf.mxu0 }
 0x4b9   : > { %v7049_v36 = vpop.f32.mrf.mxu1 }
 0x4ba   : > { %v9181_v14 = vadd.f32 %v4598_v53, %v8998_v58  ;;  %v4601_v9 = vadd.f32 %v7049_v36, %v9075_v17  ;;  %v9189_v22 = vpop.f32.mrf.mxu0 }
 0x4bb   : > { %v4573_v42 = vpop.f32.mrf.mxu1 }
 0x4bc   : > { %v9185_v1 = vadd.f32 %v4601_v9, %v9009_v10  ;;  %v9192_v43 = vpop.f32.mrf.mxu0 }
 0x4bd   : > { %v7050_v57 = vpop.f32.mrf.mxu1 }
 0x4be   : > { %9439 = vst [vmem:[#allocation27_spill] sm:$0xff] %v9185_v1  ;;  %v5228_v36 = vpop.f32.mrf.mxu0 }
 0x4bf   : > { %v4575_v2 = vpop.f32.mrf.mxu1 }
 0x4c0   : > { %v4600_v52 = vadd.f32 %v4575_v2, %v9081_v24  ;;  %v9198_v10 = vpop.f32.mrf.mxu0 }
 0x4c1   : > { %v7117_v62 = vpop.f32.mrf.mxu1 }
 0x4c2   : > { %v9195_v58 = vadd.f32 %v4600_v52, %v9013_v3  ;;  %v4943_v17 = vadd.f32 %v7117_v62, %v9030_v56  ;;  %v9202_v57 = vpop.f32.mrf.mxu0  ;;  %v3048_v62 = vld [vmem:[#allocation2 + $0x24] sm:$0xff]  }
 0x4c3   : > { %v4935_v53 = vpop.f32.mrf.mxu1 }
 0x4c4   : > { %9440 = vst [vmem:[#allocation28_spill] sm:$0xff] %v9195_v58  ;;  %v5273_v54 = vadd.f32 %v9122_v50, %v4943_v17  ;;  %v9206_v3 = vpop.f32.mrf.mxu0 }
 0x4c5   : > { %v7118_v9 = vpop.f32.mrf.mxu1 }
 0x4c6   : > { %v4946_v42 = vadd.f32 %v7118_v9, %v9035_v44  ;;  %v5297_v56 = vrot.slane %v5273_v54, 1  ;;  %v5243_v50 = vpop.f32.mrf.mxu0  ;;  %v3064_v9 = vunpack.c.h.bf16 %v3048_v62 }
 0x4c7   : > { %v4937_v24 = vpop.f32.mrf.mxu1 }
 0x4c8   : > { %v4938_v2 = vadd.f32 %v4937_v24, %v9037_v61  ;;  %v5274_v1 = vadd.f32 %v9131_v60, %v4946_v42  ;;  %v9215_v61 = vld [vmem:[%s9398_s4] ss:$0 sm:$0xff] }
 0x4c9   : > { %v7121_v52 = vpop.f32.mrf.mxu1 }
 0x4ca   : > { %v5298_v36 = vrot.slane %v5274_v1, 1  ;;  %v4958_v53 = vadd.f32 %v7121_v52, %v9042_v51  ;;  %v5272_v58 = vadd.f32 %v9133_v55, %v4938_v2  ;;  %v3063_v2 = vunpack.c.l.bf16 %v3048_v62 }
 0x4cb   : > { %v4950_v17 = vpop.f32.mrf.mxu1 }
 0x4cc   : > { %v5334_v44 = vsel %vm2841_vm1, %v5297_v56, %v5298_v36  ;;  %v5296_v60 = vrot.slane %v5272_v58, 1  ;;  %v5276_v55 = vadd.f32 %v9136_v6, %v4958_v53 }
 0x4cd   : > { %v5337_v54 = vadd.f32 %v5334_v44, %v9087_v34  ;;  %v7122_v42 = vpop.f32.mrf.mxu1 }
 0x4ce   : > { %v5335_v51 = vsel %vm2841_vm1, %v5296_v60, %v5297_v56  ;;  %v4961_v1 = vadd.f32 %v7122_v42, %v9047_v59  ;;  %v5300_v56 = vrot.slane %v5276_v55, 1  ;;  %v3050_v60 = vld [vmem:[#allocation2 + $0x34] sm:$0xff]  }
 0x4cf   : > { %v5360_v24 = vadd.f32 %v9215_v61, %v5337_v54  ;;  %v5336_v52 = vadd.f32 %v5335_v51, %v9097_v46  ;;  %v4952_v36 = vpop.f32.mrf.mxu1 }
 0x4d0   : > { %v4953_v58 = vadd.f32 %v4952_v36, %v9049_v0  ;;  %v5277_v50 = vadd.f32 %v9145_v40, %v4961_v1 }
 0x4d1   : > { %v5376_v34 = vadd.f32 %v5360_v24, %v3064_v9  ;;  %v5359_v17 = vadd.f32 %v9215_v61, %v5336_v52  ;;  %v7125_v44 = vpop.f32.mrf.mxu1  ;;  %v3066_v9 = vunpack.c.h.bf16 %v3050_v60 }
 0x4d2   : > { %v5301_v6 = vrot.slane %v5277_v50, 1  ;;  %v4973_v59 = vadd.f32 %v7125_v44, %v9053_v29  ;;  %v5275_v62 = vadd.f32 %v9147_v32, %v4953_v58 }
 0x4d3   : > { %v5392_v53 = vmax.f32 %v5376_v34, 0.0  ;;  %v5375_v46 = vadd.f32 %v5359_v17, %v3063_v2  ;;  %v4965_v54 = vpop.f32.mrf.mxu1  ;;  %v3065_v2 = vunpack.c.l.bf16 %v3050_v60 }
 0x4d4   : > { %v5332_v0 = vsel %vm2841_vm1, %v5300_v56, %v5301_v6  ;;  %v5299_v42 = vrot.slane %v5275_v62, 1  ;;  %v5279_v29 = vadd.f32 %v9150_v39, %v4973_v59  ;;  %v3052_v39 = vld [vmem:[#allocation2 + $0x44] sm:$0xff]  }
 0x4d5   : > { %5408 = vst [vmem:[%s7879_s16 + $0x8] sm:$0xff] %v5392_v53  ;;  %v5391_v40 = vmax.f32 %v5375_v46, 0.0  ;;  %v5339_v51 = vadd.f32 %v5332_v0, %v9101_v27  ;;  %v7126_v55 = vpop.f32.mrf.mxu1  ;;  %v3068_v53 = vunpack.c.h.bf16 %v3052_v39 }
 0x4d6   : > { %v5333_v1 = vsel %vm2841_vm1, %v5299_v42, %v5300_v56  ;;  %v4976_v32 = vadd.f32 %v7126_v55, %v9057_v19  ;;  %v5303_v44 = vrot.slane %v5279_v29, 1 }
 0x4d7   : > { %5407 = vst [vmem:[%s7879_s16] sm:$0xff] %v5391_v40  ;;  %v5362_v24 = vadd.f32 %v9215_v61, %v5339_v51  ;;  %v5338_v52 = vadd.f32 %v5333_v1, %v9111_v45  ;;  %v4967_v36 = vpop.f32.mrf.mxu1  ;;  %v3067_v40 = vunpack.c.l.bf16 %v3052_v39 }
 0x4d8   : > { %v4968_v58 = vadd.f32 %v4967_v36, %v9059_v41  ;;  %v5280_v27 = vadd.f32 %v9159_v31, %v4976_v32 }
 0x4d9   : > { %v5378_v50 = vadd.f32 %v5362_v24, %v3066_v9  ;;  %v5361_v34 = vadd.f32 %v9215_v61, %v5338_v52  ;;  %v7129_v17 = vpop.f32.mrf.mxu1 }
 0x4da   : > { %v5304_v56 = vrot.slane %v5280_v27, 1  ;;  %v4988_v19 = vadd.f32 %v7129_v17, %v9063_v11  ;;  %v5278_v60 = vadd.f32 %v9161_v37, %v4968_v58 }
 0x4db   : > { %v5394_v6 = vmax.f32 %v5378_v50, 0.0  ;;  %v5377_v45 = vadd.f32 %v5361_v34, %v3065_v2  ;;  %v4980_v59 = vpop.f32.mrf.mxu1 }
 0x4dc   : > { %v5330_v41 = vsel %vm2841_vm1, %v5303_v44, %v5304_v56  ;;  %v5302_v62 = vrot.slane %v5278_v60, 1  ;;  %v5282_v11 = vadd.f32 %v9164_v18, %v4988_v19  ;;  %v3054_v18 = vld [vmem:[#allocation2 + $0x54] sm:$0xff]  }
 0x4dd   : > { %5410 = vst [vmem:[%s7879_s16 + $0x18] sm:$0xff] %v5394_v6  ;;  %v5393_v31 = vmax.f32 %v5377_v45, 0.0  ;;  %v5341_v46 = vadd.f32 %v5330_v41, %v9115_v7  ;;  %v7130_v54 = vpop.f32.mrf.mxu1  ;;  %v3070_v50 = vunpack.c.h.bf16 %v3054_v18  ;;  %v3069_v56 = vunpack.c.l.bf16 %v3054_v18 }
 0x4de   : > { %v5331_v0 = vsel %vm2841_vm1, %v5302_v62, %v5303_v44  ;;  %v4991_v37 = vadd.f32 %v7130_v54, %v9067_v48  ;;  %v5306_v24 = vrot.slane %v5282_v11, 1 }
 0x4df   : > { %5409 = vst [vmem:[%s7879_s16 + $0x10] sm:$0xff] %v5393_v31  ;;  %v5364_v42 = vadd.f32 %v9215_v61, %v5341_v46  ;;  %v5340_v9 = vadd.f32 %v5331_v0, %v9125_v8  ;;  %v4982_v51 = vpop.f32.mrf.mxu1 }
 0x4e0   : > { %v4983_v55 = vadd.f32 %v4982_v51, %v9069_v13  ;;  %v5283_v7 = vadd.f32 %v9173_v16, %v4991_v37 }
 0x4e1   : > { %v5380_v1 = vadd.f32 %v5364_v42, %v3068_v53  ;;  %v5363_v29 = vadd.f32 %v9215_v61, %v5340_v9  ;;  %v7133_v32 = vpop.f32.mrf.mxu1 }
 0x4e2   : > { %v5307_v2 = vrot.slane %v5283_v7, 1  ;;  %v5003_v48 = vadd.f32 %v7133_v32, %v9073_v30  ;;  %v5281_v52 = vadd.f32 %v9175_v26, %v4983_v55 }
 0x4e3   : > { %v5396_v36 = vmax.f32 %v5380_v1, 0.0  ;;  %v5379_v8 = vadd.f32 %v5363_v29, %v3067_v40  ;;  %v4995_v58 = vpop.f32.mrf.mxu1 }
 0x4e4   : > { %v5328_v13 = vsel %vm2841_vm1, %v5306_v24, %v5307_v2  ;;  %v5305_v27 = vrot.slane %v5281_v52, 1  ;;  %v5285_v30 = vadd.f32 %v9178_v28, %v5003_v48  ;;  %v3056_v28 = vld [vmem:[#allocation2 + $0x64] sm:$0xff]  }
 0x4e5   : > { %5412 = vst [vmem:[%s7879_s16 + $0x28] sm:$0xff] %v5396_v36  ;;  %v5395_v16 = vmax.f32 %v5379_v8, 0.0  ;;  %v5343_v34 = vadd.f32 %v5328_v13, %v9129_v63  ;;  %v7134_v17 = vpop.f32.mrf.mxu1  ;;  %v3072_v11 = vunpack.c.h.bf16 %v3056_v28  ;;  %v3071_v51 = vunpack.c.l.bf16 %v3056_v28  ;;  %v7190_v8 = vpop.f32.mrf.mxu0 }
 0x4e6   : > { %v5329_v44 = vsel %vm2841_vm1, %v5305_v27, %v5306_v24  ;;  %v5006_v26 = vadd.f32 %v7134_v17, %v9077_v15  ;;  %v5309_v62 = vrot.slane %v5285_v30, 1 }
 0x4e7   : > { %5411 = vst [vmem:[%s7879_s16 + $0x20] sm:$0xff] %v5395_v16  ;;  %v5366_v39 = vadd.f32 %v9215_v61, %v5343_v34  ;;  %v5342_v19 = vadd.f32 %v5329_v44, %v9139_v38  ;;  %v4997_v60 = vpop.f32.mrf.mxu1 }
 0x4e8   : > { %v4998_v6 = vadd.f32 %v4997_v60, %v9079_v12  ;;  %v5286_v63 = vadd.f32 %v9187_v23, %v5006_v26 }
 0x4e9   : > { %v5382_v45 = vadd.f32 %v5366_v39, %v3070_v50  ;;  %v5365_v59 = vadd.f32 %v9215_v61, %v5342_v19  ;;  %v7137_v41 = vpop.f32.mrf.mxu1  ;;  %v5245_v39 = vpop.f32.mrf.mxu0 }
 0x4ea   : > { %v5310_v31 = vrot.slane %v5286_v63, 1  ;;  %v5018_v15 = vadd.f32 %v7137_v41, %v9083_v4  ;;  %v5284_v53 = vadd.f32 %v9189_v22, %v4998_v6 }
 0x4eb   : > { %v5398_v46 = vmax.f32 %v5382_v45, 0.0  ;;  %v5381_v38 = vadd.f32 %v5365_v59, %v3069_v56  ;;  %v5010_v54 = vpop.f32.mrf.mxu1  ;;  %v9442_v56 = vld [vmem:[#allocation24_spill] sm:$0xff]  ;;  %v3060_v45 = vld [vmem:[#allocation2 + $0x84] sm:$0xff]  }
 0x4ec   : > { %v5326_v12 = vsel %vm2841_vm1, %v5309_v62, %v5310_v31  ;;  %v5308_v0 = vrot.slane %v5284_v53, 1  ;;  %v5288_v4 = vadd.f32 %v9192_v43, %v5018_v15  ;;  %v3058_v43 = vld [vmem:[#allocation2 + $0x74] sm:$0xff]  }
 0x4ed   : > { %5414 = vst [vmem:[%s7879_s16 + $0x38] sm:$0xff] %v5398_v46  ;;  %v5397_v23 = vmax.f32 %v5381_v38, 0.0  ;;  %v5345_v37 = vadd.f32 %v5326_v12, %v9143_v47  ;;  %v7138_v42 = vpop.f32.mrf.mxu1  ;;  %v3074_v13 = vunpack.c.h.bf16 %v3058_v43  ;;  %v3073_v44 = vunpack.c.l.bf16 %v3058_v43  ;;  %v9443_v38 = vld [vmem:[#allocation23_spill] sm:$0xff] }
 0x4ee   : > { %v5327_v40 = vsel %vm2841_vm1, %v5308_v0, %v5309_v62  ;;  %v5021_v22 = vadd.f32 %v7138_v42, %v9089_v33  ;;  %v5312_v18 = vrot.slane %v5288_v4, 1  ;;  %v3076_v46 = vunpack.c.h.bf16 %v3060_v45 }
 0x4ef   : > { %5413 = vst [vmem:[%s7879_s16 + $0x30] sm:$0xff] %v5397_v23  ;;  %v5368_v9 = vadd.f32 %v9215_v61, %v5345_v37  ;;  %v5344_v55 = vadd.f32 %v5327_v40, %v9153_v49  ;;  %v5012_v7 = vpop.f32.mrf.mxu1 }
 0x4f0   : > { %v5013_v1 = vadd.f32 %v5012_v7, %v9091_v5  ;;  %v5289_v47 = vadd.f32 %v9198_v10, %v5021_v22 }
 0x4f1   : > { %v5384_v29 = vadd.f32 %v5368_v9, %v3072_v11  ;;  %v5367_v32 = vadd.f32 %v9215_v61, %v5344_v55  ;;  %v7141_v24 = vpop.f32.mrf.mxu1  ;;  %v3075_v11 = vunpack.c.l.bf16 %v3060_v45  ;;  %v9444_v9 = vld [vmem:[#allocation22_spill] sm:$0xff] }
 0x4f2   : > { %v5313_v2 = vrot.slane %v5289_v47, 1  ;;  %v5033_v33 = vadd.f32 %v7141_v24, %v9094_v25  ;;  %v5287_v48 = vadd.f32 %v9202_v57, %v5013_v1  ;;  %v9441_v57 = vld [vmem:[#allocation21_spill] sm:$0xff] }
 0x4f3   : > { %v5400_v52 = vmax.f32 %v5384_v29, 0.0  ;;  %v5383_v49 = vadd.f32 %v5367_v32, %v3071_v51  ;;  %v5025_v36 = vpop.f32.mrf.mxu1  ;;  %v9445_v47 = vld [vmem:[#allocation25_spill] sm:$0xff] }
 0x4f4   : > { %v5324_v5 = vsel %vm2841_vm1, %v5312_v18, %v5313_v2  ;;  %v5311_v10 = vrot.slane %v5287_v48, 1  ;;  %v5291_v50 = vadd.f32 %v9206_v3, %v5033_v33 }
 0x4f5   : > { %5416 = vst [vmem:[%s7879_s16 + $0x48] sm:$0xff] %v5400_v52  ;;  %v5399_v58 = vmax.f32 %v5383_v49, 0.0  ;;  %v5347_v27 = vadd.f32 %v5324_v5, %v9157_v21  ;;  %v7142_v16 = vpop.f32.mrf.mxu1  ;;  %v3062_v52 = vld [vmem:[#allocation2 + $0x94] sm:$0xff]  }
 0x4f6   : > { %v5325_v25 = vsel %vm2841_vm1, %v5311_v10, %v5312_v18  ;;  %v5036_v34 = vadd.f32 %v7142_v16, %v9441_v57  ;;  %v5315_v3 = vrot.slane %v5291_v50, 1  ;;  %v3078_v10 = vunpack.c.h.bf16 %v3062_v52  ;;  %v9448_v50 = vld [vmem:[#allocation28_spill] sm:$0xff] }
 0x4f7   : > { %5415 = vst [vmem:[%s7879_s16 + $0x40] sm:$0xff] %v5399_v58  ;;  %v5370_v17 = vadd.f32 %v9215_v61, %v5347_v27  ;;  %v5346_v30 = vadd.f32 %v5325_v25, %v9167_v35  ;;  %v5027_v26 = vpop.f32.mrf.mxu1  ;;  %v9447_v58 = vld [vmem:[#allocation27_spill] sm:$0xff]  ;;  %v3077_v25 = vunpack.c.l.bf16 %v3062_v52 }
 0x4f8   : > { %v5028_v19 = vadd.f32 %v5027_v26, %v9442_v56  ;;  %v5292_v21 = vadd.f32 %v7190_v8, %v5036_v34 }
 0x4f9   : > { %v5386_v60 = vadd.f32 %v5370_v17, %v3074_v13  ;;  %v5369_v6 = vadd.f32 %v9215_v61, %v5346_v30  ;;  %v7145_v63 = vpop.f32.mrf.mxu1 }
 0x4fa   : > { %v5316_v59 = vrot.slane %v5292_v21, 1  ;;  %v5290_v41 = vadd.f32 %v5245_v39, %v5028_v19  ;;  %v5048_v51 = vadd.f32 %v7145_v63, %v9444_v9 }
 0x4fb   : > { %v5402_v62 = vmax.f32 %v5386_v60, 0.0  ;;  %v5385_v28 = vadd.f32 %v5369_v6, %v3073_v44  ;;  %v5040_v31 = vpop.f32.mrf.mxu1 }
 0x4fc   : > { %v5322_v35 = vsel %vm2841_vm1, %v5315_v3, %v5316_v59  ;;  %v5314_v15 = vrot.slane %v5290_v41, 1 }
 0x4fd   : > { %5418 = vst [vmem:[%s7879_s16 + $0x58] sm:$0xff] %v5402_v62  ;;  %v5401_v53 = vmax.f32 %v5385_v28, 0.0  ;;  %v5349_v54 = vadd.f32 %v5322_v35, %v9443_v38  ;;  %v7146_v12 = vpop.f32.mrf.mxu1 }
 0x4fe   : > { %v5323_v0 = vsel %vm2841_vm1, %v5314_v15, %v5315_v3  ;;  %v5051_v29 = vadd.f32 %v7146_v12, %v9445_v47 }
 0x4ff   : > { %5417 = vst [vmem:[%s7879_s16 + $0x50] sm:$0xff] %v5401_v53  ;;  %v5372_v23 = vadd.f32 %v9215_v61, %v5349_v54  ;;  %v5348_v37 = vadd.f32 %v5323_v0, %v9181_v14  ;;  %v5042_v42 = vpop.f32.mrf.mxu1  ;;  %v9446_v14 = vld [vmem:[#allocation26_spill] sm:$0xff] }
 0x500   : > { %v5043_v43 = vadd.f32 %v5042_v42, %v9446_v14 }
 0x501   : > { %v5388_v40 = vadd.f32 %v5372_v23, %v3076_v46  ;;  %v5371_v4 = vadd.f32 %v9215_v61, %v5348_v37  ;;  %v7193_v22 = vpop.f32.mrf.mxu1 }
 0x502   : > { %v5294_v32 = vadd.f32 %v7193_v22, %v5048_v51 }
 0x503   : > { %v5404_v55 = vmax.f32 %v5388_v40, 0.0  ;;  %v5387_v7 = vadd.f32 %v5371_v4, %v3075_v11  ;;  %v5258_v1 = vpop.f32.mrf.mxu1 }
 0x504   : > { %v5318_v48 = vrot.slane %v5294_v32, 1 }
 0x505   : > { %5420 = vst [vmem:[%s7879_s16 + $0x68] sm:$0xff] %v5404_v55  ;;  %v5403_v24 = vmax.f32 %v5387_v7, 0.0  ;;  %v7194_v18 = vpop.f32.mrf.mxu1 }
 0x506   : > { %v5295_v2 = vadd.f32 %v7194_v18, %v5051_v29 }
 0x507   : > { %5419 = vst [vmem:[%s7879_s16 + $0x60] sm:$0xff] %v5403_v24  ;;  %v5260_v33 = vpop.f32.mrf.mxu1 }
 0x508   : > { %v5319_v49 = vrot.slane %v5295_v2, 1  ;;  %v5293_v36 = vadd.f32 %v5260_v33, %v5043_v43 }
 0x50a   : > { %v5320_v8 = vsel %vm2841_vm1, %v5318_v48, %v5319_v49  ;;  %v5317_v5 = vrot.slane %v5293_v36, 1 }
 0x50b   : > { %v5351_v13 = vadd.f32 %v5320_v8, %v9447_v58 }
 0x50c   : > { %v5321_v27 = vsel %vm2841_vm1, %v5317_v5, %v5318_v48 }
 0x50d   : > { %v5374_v16 = vadd.f32 %v9215_v61, %v5351_v13  ;;  %v5350_v57 = vadd.f32 %v5321_v27, %v9448_v50 }
 0x50f   : > { %v5390_v34 = vadd.f32 %v5374_v16, %v3078_v10  ;;  %v5373_v17 = vadd.f32 %v9215_v61, %v5350_v57 }
 0x511   : > { %v5406_v44 = vmax.f32 %v5390_v34, 0.0  ;;  %v5389_v30 = vadd.f32 %v5373_v17, %v3077_v25 }
 0x513   : > { %5422 = vst [vmem:[%s7879_s16 + $0x78] sm:$0xff] %v5406_v44  ;;  %v5405_v20 = vmax.f32 %v5389_v30, 0.0 }
 0x515   : > { %5421 = vst [vmem:[%s7879_s16 + $0x70] sm:$0xff] %v5405_v20 }
 0x516   : > { %7615 = shalt.err (!%p7612_p2)
}
 0x517   : > { %s7616_s16 = scalar_lea.hbm %s9335_s6, 2048  ;;  %s7620_s29 = scalar_lea.hbm %s9399_s5, 8192 }
 0x518   : > { %p7617_p4 = scmp.ne.s32.totalorder %s9335_s6, %s7616_s16  ;;  %p7621_p7 = scmp.lt.s32.totalorder %s9335_s6, %s9399_s5 }
 0x519   : > { %p7622_p9 = scmp.lt.s32.totalorder %s7620_s29, %s7616_s16 }
 0x51a   : > { %p7618_p5 = pnand %p7617_p4, %p7799_p3 }
 0x51b   : > { %p7623_p10 = por %p7622_p9, %p7621_p7 }
 0x51c   : > { %p7619_p6 = pneg %p7618_p5 }
 0x51e   : > { %p7624_p12 = pnand %p7623_p10, %p7619_p6 }
 0x520   : > { %7627 = shalt.err (!%p7624_p12)
}
 0x521   : > { %s7715_s26 = smov 128   ;;  %s7716_s21 = smov 8  }
 0x522   : > { %7219 = dma.vmem_to_hbm [thread:$0]  (%p7799_p3), %s9337_s22, 2048, %s9335_s6, %s9343_s10, %s7715_s26, %s7715_s26, %s7716_s21  }
 0x523 PF: > { %p7236_p0 = scmp.ge.s32.totalorder %s7704_s25, 2  ;;  %s5455_s27 = sand.u32 1, %s7676_s18  }
 0x524   : > { %s5456_s30 = scalar_lea.sflag [#allocation7], %s5455_s27 }
 0x525   : > { %p7229_p1 = pnand %p7236_p0, %p7808_p8 }
 0x527   : > { %p7230_p11 = pneg %p7229_p1 }
 0x529   : > { %7671 = dma.done.wait (%p7230_p11), %s5456_s30, 2048  }
 0x52a   : > { %7673 = vsyncadd (%p7230_p11), %s5456_s30, 4294965248  ;;  %s20_s25 = sadd.s32 1, %s7704_s25   ;;  %s9450_s7 = sld [smem:[#allocation19_spill]] }
 0x52b   : > { %p17_p13 = scmp.ge.s32.totalorder %s20_s25, 6   ;;  %s9451_s6 = sld [smem:[#allocation20_spill]] }
 0x52c   : > { %s9452_s18 = smov %s7680_s19  ;;  %s9453_s19 = smov %s7684_s20 }
 0x52d   : > { %s9454_s20 = smov %s7826_s13  ;;  %s9455_s21 = smov %s7696_s23 }
 0x52e   : > { %s9456_s22 = smov %s7700_s24  ;;  %19 = sbr.rel (!%p17_p13) target bundleno = 10 (0xa), region = 108 }
 0x530   : > { %s9457_s23 = smov %s9450_s7 }
 0x531   : > { %s9458_s24 = smov %s9451_s6 }
 0x533   :  { %5461 = vsyncpa [#allocation6], 1 }
 0x534   :  { %5463 = vsyncpa [#allocation6 + $0x1], 1 }
 0x535   :  { %5464 = vsyncpa [#allocation9], 1 }
 0x536   :  { %5465 = vsyncpa [#allocation7], 1 }
 0x537   :  { %5467 = vsyncpa [#allocation7 + $0x1], 1 }
 0x538   :  { %5468 = vsyncmov [#allocation4] }
 0x53b   :  { %s5469_s8 = vpop.sfrf %5468 }
 0x53c   :  { %p5768_p3 = scmp.ne.s32.totalorder %s5469_s8, 0 }
 0x53e   :  { %5473 = shalt.err (%p5768_p3)  }

</bundles_post_ra>
